<compile_context>
chip_gen: v7x
topology: tpu7x:2x2x1
jax: 0.10.0
libtpu: 0.0.40
codegen_flags: <defaults>
</compile_context>

<pallas_src>
import math

import jax
import jax.numpy as jnp
from jax.experimental import pallas as pl
from jax.experimental.pallas import tpu as pltpu


# ----------------------------- small helpers --------------------------------

def _row_tile(M):
    """Largest convenient row tile that divides M (multiple of 8 when possible)."""
    for t in (512, 256, 128, 64, 32, 16, 8):
        if M % t == 0:
            return t
    return M


# ----------------------------- Pallas kernels -------------------------------

def pallas_linear(x, w, b=None, *, activation=None):
    """o = act(x @ w [+ b]).   x:(M,K)  w:(K,N)  b:(1,N).  Row-tiled, parallel grid."""
    M, K = x.shape
    N = w.shape[1]
    tm = _row_tile(M)
    has_b = b is not None

    def kernel(*refs):
        if has_b:
            x_ref, w_ref, b_ref, o_ref = refs
        else:
            x_ref, w_ref, o_ref = refs
        y = jnp.dot(x_ref[...], w_ref[...], preferred_element_type=jnp.float32)
        if has_b:
            y = y + b_ref[...].astype(jnp.float32)
        if activation == 'gelu':
            # TODO(synk): PyTorch nn.GELU() is the exact erf form; tanh approximation
            # used in-kernel (erf lowering support in Mosaic varies).
            y = jax.nn.gelu(y, approximate=True)
        elif activation == 'silu':
            y = y * (1.0 / (1.0 + jnp.exp(-y)))
        o_ref[...] = y.astype(o_ref.dtype)

    in_specs = [pl.BlockSpec((tm, K), lambda i: (i, 0)),
                pl.BlockSpec((K, N), lambda i: (0, 0))]
    args = [x, w]
    if has_b:
        in_specs.append(pl.BlockSpec((1, N), lambda i: (0, 0)))
        args.append(b)

    return pl.pallas_call(
        kernel,
        out_shape=jax.ShapeDtypeStruct((M, N), x.dtype),
        grid=(M // tm,),
        in_specs=in_specs,
        out_specs=pl.BlockSpec((tm, N), lambda i: (i, 0)),
        compiler_params=pltpu.CompilerParams(dimension_semantics=("parallel",)),
    )(*args)


def pallas_layernorm(x, w, b, eps=1e-6):
    """LayerNorm over the last dim.  x:(M,C)  w/b:(1,C).  Row-tiled, parallel grid."""
    M, C = x.shape
    tm = _row_tile(M)

    def kernel(x_ref, w_ref, b_ref, o_ref):
        xv = x_ref[...].astype(jnp.float32)
        mu = jnp.mean(xv, axis=-1, keepdims=True)
        var = jnp.mean((xv - mu) ** 2, axis=-1, keepdims=True)
        y = (xv - mu) * jax.lax.rsqrt(var + eps)
        y = y * w_ref[...].astype(jnp.float32) + b_ref[...].astype(jnp.float32)
        o_ref[...] = y.astype(o_ref.dtype)

    return pl.pallas_call(
        kernel,
        out_shape=jax.ShapeDtypeStruct((M, C), x.dtype),
        grid=(M // tm,),
        in_specs=[
            pl.BlockSpec((tm, C), lambda i: (i, 0)),
            pl.BlockSpec((1, C), lambda i: (0, 0)),
            pl.BlockSpec((1, C), lambda i: (0, 0)),
        ],
        out_specs=pl.BlockSpec((tm, C), lambda i: (i, 0)),
        compiler_params=pltpu.CompilerParams(dimension_semantics=("parallel",)),
    )(x, w, b)


def pallas_dwconv(x, w, b, *, pad_left, pad_right, mask=None, activation=None):
    """Depthwise 1-D conv + bias (+ mask) (+ activation).
    x:(B,L,C) channels-last, w:(K,C), b:(1,C), mask:(B,L,1) or None.
    Padding is built in a VMEM scratch (no HBM pad copy)."""
    B, L, C = x.shape
    K = w.shape[0]
    assert K == pad_left + pad_right + 1
    Lp = L + pad_left + pad_right
    has_mask = mask is not None

    def kernel(*refs):
        if has_mask:
            x_ref, w_ref, b_ref, m_ref, o_ref, pad_ref = refs
        else:
            x_ref, w_ref, b_ref, o_ref, pad_ref = refs
        xv = x_ref[0].astype(jnp.float32)                  # (L, C)
        pad_ref[...] = jnp.zeros_like(pad_ref)
        pad_ref[pad_left:pad_left + L, :] = xv
        wv = w_ref[...].astype(jnp.float32)                # (K, C)
        acc = jnp.zeros((L, C), jnp.float32)
        for k in range(K):                                 # statically unrolled taps
            acc = acc + pad_ref[k:k + L, :] * wv[k][None, :]
        acc = acc + b_ref[...].astype(jnp.float32)
        if has_mask:
            acc = acc * m_ref[0].astype(jnp.float32)
        if activation == 'silu':
            acc = acc * (1.0 / (1.0 + jnp.exp(-acc)))
        o_ref[...] = acc[None].astype(o_ref.dtype)

    in_specs = [pl.BlockSpec((1, L, C), lambda i: (i, 0, 0)),
                pl.BlockSpec((K, C), lambda i: (0, 0)),
                pl.BlockSpec((1, C), lambda i: (0, 0))]
    args = [x, w, b]
    if has_mask:
        in_specs.append(pl.BlockSpec((1, L, 1), lambda i: (i, 0, 0)))
        args.append(mask)

    return pl.pallas_call(
        kernel,
        out_shape=jax.ShapeDtypeStruct((B, L, C), x.dtype),
        grid=(B,),
        in_specs=in_specs,
        out_specs=pl.BlockSpec((1, L, C), lambda i: (i, 0, 0)),
        scratch_shapes=[pltpu.VMEM((Lp, C), jnp.float32)],
        compiler_params=pltpu.CompilerParams(dimension_semantics=("parallel",)),
    )(*args)


def fused_dwconv_ffn(x, mask, dw_w, dw_b, ln_w, ln_b, w1, b1, w2, b2, *,
                     pad_left, pad_right, add=None, conv_plus_x=False,
                     residual_norm=False, eps=1e-6):
    """One fused block:
        cin  = x (+ add)
        c    = dwconv(cin) * mask            (+ x if conv_plus_x)
        n    = LayerNorm(c)
        h    = (GELU(n @ w1 + b1)) @ w2 + b2      # gamma pre-folded into w2/b2
        out  = (n if residual_norm else x) + h
    x/add:(B,L,C), mask:(B,L,1), dw_w:(K,C), w1:(C,H), w2:(H,C)."""
    B, L, C = x.shape
    K = dw_w.shape[0]
    H = w1.shape[1]
    assert K == pad_left + pad_right + 1
    Lp = L + pad_left + pad_right
    has_add = add is not None

    def kernel(*refs):
        idx = 0
        x_ref = refs[idx]; idx += 1
        if has_add:
            a_ref = refs[idx]; idx += 1
        (m_ref, dww_ref, dwb_ref, lnw_ref, lnb_ref,
         w1_ref, b1_ref, w2_ref, b2_ref, o_ref, pad_ref) = refs[idx:]

        xv = x_ref[0].astype(jnp.float32)                  # (L, C)
        cin = xv + a_ref[0].astype(jnp.float32) if has_add else xv

        # depthwise conv via VMEM-scratch zero-padding
        pad_ref[...] = jnp.zeros_like(pad_ref)
        pad_ref[pad_left:pad_left + L, :] = cin
        wv = dww_ref[...].astype(jnp.float32)              # (K, C)
        acc = jnp.zeros((L, C), jnp.float32)
        for k in range(K):
            acc = acc + pad_ref[k:k + L, :] * wv[k][None, :]
        acc = (acc + dwb_ref[...].astype(jnp.float32)) * m_ref[0].astype(jnp.float32)
        if conv_plus_x:
            acc = acc + xv

        # LayerNorm
        mu = jnp.mean(acc, axis=-1, keepdims=True)
        var = jnp.mean((acc - mu) ** 2, axis=-1, keepdims=True)
        n = (acc - mu) * jax.lax.rsqrt(var + eps)
        n = n * lnw_ref[...].astype(jnp.float32) + lnb_ref[...].astype(jnp.float32)

        # pointwise FFN (gamma already folded into w2/b2)
        h = jnp.dot(n, w1_ref[...].astype(jnp.float32), preferred_element_type=jnp.float32)
        h = h + b1_ref[...].astype(jnp.float32)
        # TODO(synk): tanh-approx GELU vs PyTorch exact erf GELU.
        h = jax.nn.gelu(h, approximate=True)
        h = jnp.dot(h, w2_ref[...].astype(jnp.float32), preferred_element_type=jnp.float32)
        h = h + b2_ref[...].astype(jnp.float32)

        base = n if residual_norm else xv
        o_ref[...] = (base + h)[None].astype(o_ref.dtype)

    in_specs = [pl.BlockSpec((1, L, C), lambda i: (i, 0, 0))]
    args = [x]
    if has_add:
        in_specs.append(pl.BlockSpec((1, L, C), lambda i: (i, 0, 0)))
        args.append(add)
    in_specs += [
        pl.BlockSpec((1, L, 1), lambda i: (i, 0, 0)),
        pl.BlockSpec((K, C), lambda i: (0, 0)),
        pl.BlockSpec((1, C), lambda i: (0, 0)),
        pl.BlockSpec((1, C), lambda i: (0, 0)),
        pl.BlockSpec((1, C), lambda i: (0, 0)),
        pl.BlockSpec((C, H), lambda i: (0, 0)),
        pl.BlockSpec((1, H), lambda i: (0, 0)),
        pl.BlockSpec((H, C), lambda i: (0, 0)),
        pl.BlockSpec((1, C), lambda i: (0, 0)),
    ]
    args += [mask, dw_w, dw_b, ln_w, ln_b, w1, b1, w2, b2]

    # TODO(synk): for production L (thousands) also tile over L with halo handling.
    return pl.pallas_call(
        kernel,
        out_shape=jax.ShapeDtypeStruct((B, L, C), x.dtype),
        grid=(B,),
        in_specs=in_specs,
        out_specs=pl.BlockSpec((1, L, C), lambda i: (i, 0, 0)),
        scratch_shapes=[pltpu.VMEM((Lp, C), jnp.float32)],
        compiler_params=pltpu.CompilerParams(dimension_semantics=("parallel",)),
    )(*args)


def pallas_ssm_scan(dA, dBx):
    """Selective-scan recurrence h[t] = dA[t]*h[t-1] + dBx[t], state kept in VMEM.
    dA/dBx/h_all: (B, L, d_state, d_inner)."""
    B, L, S, D = dA.shape

    def kernel(dA_ref, dBx_ref, h_ref, state):
        state[...] = jnp.zeros_like(state)

        def body(t, carry):
            h = state[...] * dA_ref[pl.ds(t, 1)] + dBx_ref[pl.ds(t, 1)]
            state[...] = h
            h_ref[pl.ds(t, 1)] = h
            return carry

        jax.lax.fori_loop(0, L, body, 0)

    spec = pl.BlockSpec((None, L, S, D), lambda b: (b, 0, 0, 0))
    return pl.pallas_call(
        kernel,
        out_shape=jax.ShapeDtypeStruct((B, L, S, D), jnp.float32),
        grid=(B,),
        in_specs=[spec, spec],
        out_specs=pl.BlockSpec((None, L, S, D), lambda b: (b, 0, 0, 0)),
        scratch_shapes=[pltpu.VMEM((1, S, D), jnp.float32)],
        compiler_params=pltpu.CompilerParams(dimension_semantics=("parallel",)),
    )(dA, dBx)


# ------------------------- thin channels-last wrappers ----------------------

def linear_cl(x, w, b=None, *, activation=None):
    B, L, C = x.shape
    N = w.shape[1]
    return pallas_linear(x.reshape(B * L, C), w, b, activation=activation).reshape(B, L, N)


def layernorm_cl(x, w, b, eps=1e-6):
    B, L, C = x.shape
    return pallas_layernorm(x.reshape(B * L, C), w, b, eps=eps).reshape(B, L, C)


def interpolate_nearest_cl(x, size):
    """F.interpolate(mode='nearest') over the length axis (identity when L == size)."""
    B, L, C = x.shape
    if L == size:
        return x
    idx = (jnp.arange(size) * L) // size
    return x[:, idx, :]


def adaptive_avg_pool_cl(x, out_size):
    """nn.AdaptiveAvgPool1d over the length axis (identity when L == out_size)."""
    B, L, C = x.shape
    if L == out_size:
        return x
    outs = []
    for i in range(out_size):
        s = (i * L) // out_size
        e = -(-((i + 1) * L) // out_size)
        outs.append(jnp.mean(x[:, s:e, :], axis=1, keepdims=True))
    return jnp.concatenate(outs, axis=1)


# ------------------------------- Mamba block --------------------------------

def mamba_forward(x, p):
    """Minimal Mamba (S6) block.  x:(B, L, dm) channels-last.
    TODO(synk): the reference Mamba class is not part of the provided module source;
    this is a standard selective-scan re-implementation."""
    B, L, dm = x.shape
    di = p['in_proj_w'].shape[1] // 2
    dt_rank = p['dt_proj_w'].shape[0]
    d_state = (p['x_proj_w'].shape[1] - dt_rank) // 2

    xz = linear_cl(x, p['in_proj_w'])                              # (B, L, 2*di)
    xc, z = xz[..., :di], xz[..., di:]
    xc = pallas_dwconv(xc, p['conv_w'], p['conv_b'],
                       pad_left=p['conv_w'].shape[0] - 1, pad_right=0,
                       activation='silu')                          # causal conv + SiLU
    xdbl = linear_cl(xc, p['x_proj_w'])                            # (B, L, dt_rank+2*ds)
    dt_r = xdbl[..., :dt_rank]
    B_ssm = xdbl[..., dt_rank:dt_rank + d_state]
    C_ssm = xdbl[..., dt_rank + d_state:]

    dt = jax.nn.softplus(jnp.einsum('blr,rd->bld', dt_r, p['dt_proj_w']) + p['dt_proj_b'])
    A = -jnp.exp(p['A_log'])                                       # (di, d_state)

    # per-step transition / input tensors (pure elementwise, fused by XLA)
    dA = jnp.exp(dt[:, :, None, :] * A.T[None, None, :, :])        # (B, L, ds, di)
    dBx = (dt * xc)[:, :, None, :] * B_ssm[:, :, :, None]          # (B, L, ds, di)

    h_all = pallas_ssm_scan(dA, dBx)                               # (B, L, ds, di)
    y = jnp.einsum('blsd,bls->bld', h_all, C_ssm)                  # (B, L, di)
    y = y + xc * p['D'][None, None, :]
    y = y * jax.nn.silu(z)
    return linear_cl(y, p['out_proj_w'])


# ------------------------------ Encoder (ConvNeXt) ---------------------------

def convnext_block(x, mask, p):
    # fold layer-scale gamma into pw2 weight/bias
    w2 = p['pw2_w'] * p['gamma']
    b2 = p['pw2_b'] * p['gamma']
    return fused_dwconv_ffn(x, mask, p['dw_w'], p['dw_b'], p['ln_w'], p['ln_b'],
                            p['pw1_w'], p['pw1_b'], w2, b2,
                            pad_left=3, pad_right=3, eps=1e-6)


def encoder_forward(x, mask, p):
    # TODO(synk): ConvNeXt / MaskedConv1D sources not provided; encoder implemented as
    # a 1-D masked ConvNeXt without temporal downsampling.
    h = linear_cl(x, p['stem_w'], p['stem_b']) * mask
    h = layernorm_cl(h, p['stem_ln_w'], p['stem_ln_b'], eps=1e-6)
    for stage in p['stages']:
        for blk in stage['blocks']:
            h = convnext_block(h, mask, blk)
        if stage['down'] is not None:
            h = linear_cl(h, stage['down']['w'], stage['down']['b']) * mask
    return h, mask


# ------------------------------ Deco decoder ---------------------------------

def deco_decoder_layer(tgt, mem, mask, qpos, p, qN, T=4):
    """tgt:(B, Lq, d), mem:(B, N, d), mask:(B, N, 1), qpos:(B, Lq, d) — channels-last."""
    B, Lq, d = tgt.shape
    N = mem.shape[1]
    assert Lq == mask.shape[1], "decoder query length must match mask length (qN == N)"
    num = d // T

    # Mamba over the T=4 channel chunks, batched into one pass (same weights per chunk).
    xm = tgt.reshape(B, Lq, T, num).transpose(0, 2, 1, 3).reshape(B * T, Lq, num)
    for mp in p['mamba']:
        xm = mamba_forward(xm, mp)
    loca = xm.reshape(B, T, Lq, num).transpose(0, 2, 1, 3).reshape(B, Lq, d)
    tgt = tgt + loca

    # chain 1: (tgt + qpos) -> dwconv1*mask -> LN -> pw11/GELU/pw12*gamma1 -> +tgt
    w12 = p['pw12_w'] * p['gamma1']
    b12 = p['pw12_b'] * p['gamma1']
    tgt = fused_dwconv_ffn(tgt, mask, p['dw1_w'], p['dw1_b'],
                           p['norm1_w'], p['norm1_b'],
                           p['pw11_w'], p['pw11_b'], w12, b12,
                           pad_left=4, pad_right=4, add=qpos, eps=1e-6)

    tgt = interpolate_nearest_cl(tgt, N)                 # F.interpolate(size=N)

    # chain 2: (tgt + mem) -> dwconv2*mask -> +tgt -> LN -> pw21/GELU/pw22*gamma2 -> +LN
    w22 = p['pw22_w'] * p['gamma2']
    b22 = p['pw22_b'] * p['gamma2']
    tgt = fused_dwconv_ffn(tgt, mask, p['dw2_w'], p['dw2_b'],
                           p['norm2_w'], p['norm2_b'],
                           p['pw21_w'], p['pw21_b'], w22, b22,
                           pad_left=4, pad_right=4, add=mem,
                           conv_plus_x=True, residual_norm=True, eps=1e-6)

    tgt = adaptive_avg_pool_cl(tgt, qN)                  # AdaptiveAvgPool1d(qN)
    return tgt, mask


def deco_convnet_forward(src, query_embed, mask, params):
    """src:(B,C,N), query_embed:(B,d,qN), mask:(B,1,N) — PyTorch NCL interface."""
    bs, c, N = src.shape
    src_cl = jnp.transpose(src, (0, 2, 1))
    qpos_cl = jnp.transpose(query_embed, (0, 2, 1))
    mask_cl = jnp.transpose(mask.astype(src.dtype), (0, 2, 1))      # (B, N, 1)
    qN, d = params['tgt_embed'].shape
    tgt_cl = jnp.broadcast_to(params['tgt_embed'][None], (bs, qN, d))

    mem_cl, mask_cl = encoder_forward(src_cl, mask_cl, params['encoder'])

    hs_cl = tgt_cl
    for lp in params['decoder']['layers']:
        hs_cl, mask_cl = deco_decoder_layer(hs_cl, mem_cl, mask_cl, qpos_cl, lp, qN=qN)
    hs_cl = layernorm_cl(hs_cl, params['decoder']['norm_w'],
                         params['decoder']['norm_b'], eps=1e-5)
    # PyTorch returns (hs.transpose(1,2), memory, mask): hs is channels-first so
    # hs.transpose(1,2) == our channels-last hs_cl.
    return hs_cl, jnp.transpose(mem_cl, (0, 2, 1)), jnp.transpose(mask_cl, (0, 2, 1))


# ----------------------------- parameter init --------------------------------

class KeyGen:
    def __init__(self, key):
        self._key = key

    def __call__(self):
        self._key, sub = jax.random.split(self._key)
        return sub


def _xavier(key, shape):
    fan_in, fan_out = shape[0], shape[-1]
    a = math.sqrt(6.0 / (fan_in + fan_out))
    return jax.random.uniform(key, shape, jnp.float32, -a, a)


def init_mamba(kg, dm):
    di = 2 * dm
    d_state = 16
    dt_rank = max(1, math.ceil(dm / 16))
    d_conv = 4
    return {
        'in_proj_w': _xavier(kg(), (dm, 2 * di)),
        'conv_w': 0.1 * jax.random.normal(kg(), (d_conv, di), jnp.float32),
        'conv_b': jnp.zeros((1, di), jnp.float32),
        'x_proj_w': _xavier(kg(), (di, dt_rank + 2 * d_state)),
        'dt_proj_w': _xavier(kg(), (dt_rank, di)),
        'dt_proj_b': jnp.zeros((di,), jnp.float32),
        'A_log': jnp.log(jnp.tile(jnp.arange(1, d_state + 1, dtype=jnp.float32)[None, :],
                                  (di, 1))),
        'D': jnp.ones((di,), jnp.float32),
        'out_proj_w': _xavier(kg(), (di, dm)),
    }


def init_convnext_block(kg, dim):
    return {
        'dw_w': 0.1 * jax.random.normal(kg(), (7, dim), jnp.float32),
        'dw_b': jnp.zeros((1, dim), jnp.float32),
        'ln_w': jnp.ones((1, dim), jnp.float32),
        'ln_b': jnp.zeros((1, dim), jnp.float32),
        'pw1_w': _xavier(kg(), (dim, 4 * dim)),
        'pw1_b': jnp.zeros((1, 4 * dim), jnp.float32),
        'pw2_w': _xavier(kg(), (4 * dim, dim)),
        'pw2_b': jnp.zeros((1, dim), jnp.float32),
        'gamma': jnp.full((1, dim), 1e-6, jnp.float32),
    }


def init_encoder(kg, c_in, dims, depths):
    stages = []
    for i, (dim, depth) in enumerate(zip(dims, depths)):
        blocks = [init_convnext_block(kg, dim) for _ in range(depth)]
        down = None
        if i + 1 < len(dims) and dims[i + 1] != dim:
            down = {'w': _xavier(kg(), (dim, dims[i + 1])),
                    'b': jnp.zeros((1, dims[i + 1]), jnp.float32)}
        stages.append({'blocks': blocks, 'down': down})
    return {
        'stem_w': _xavier(kg(), (c_in, dims[0])),
        'stem_b': jnp.zeros((1, dims[0]), jnp.float32),
        'stem_ln_w': jnp.ones((1, dims[0]), jnp.float32),
        'stem_ln_b': jnp.zeros((1, dims[0]), jnp.float32),
        'stages': stages,
    }


def init_decoder_layer(kg, d):
    return {
        'dw1_w': 0.1 * jax.random.normal(kg(), (9, d), jnp.float32),
        'dw1_b': jnp.zeros((1, d), jnp.float32),
        'norm1_w': jnp.ones((1, d), jnp.float32),
        'norm1_b': jnp.zeros((1, d), jnp.float32),
        'pw11_w': _xavier(kg(), (d, 4 * d)),
        'pw11_b': jnp.zeros((1, 4 * d), jnp.float32),
        'pw12_w': _xavier(kg(), (4 * d, d)),
        'pw12_b': jnp.zeros((1, d), jnp.float32),
        'gamma1': jnp.full((1, d), 1e-6, jnp.float32),
        'dw2_w': 0.1 * jax.random.normal(kg(), (9, d), jnp.float32),
        'dw2_b': jnp.zeros((1, d), jnp.float32),
        'norm2_w': jnp.ones((1, d), jnp.float32),
        'norm2_b': jnp.zeros((1, d), jnp.float32),
        'pw21_w': _xavier(kg(), (d, 4 * d)),
        'pw21_b': jnp.zeros((1, 4 * d), jnp.float32),
        'pw22_w': _xavier(kg(), (4 * d, d)),
        'pw22_b': jnp.zeros((1, d), jnp.float32),
        'gamma2': jnp.full((1, d), 1e-6, jnp.float32),
        'mamba': [init_mamba(kg, d // 4) for _ in range(2)],
    }


def init_model(kg, d_model, enc_dims, enc_depth, num_decoder_layers, qN, c_in):
    return {
        'tgt_embed': _xavier(kg(), (qN, d_model)),
        'encoder': init_encoder(kg, c_in, enc_dims, enc_depth),
        'decoder': {
            'layers': [init_decoder_layer(kg, d_model) for _ in range(num_decoder_layers)],
            'norm_w': jnp.ones((1, d_model), jnp.float32),
            'norm_b': jnp.zeros((1, d_model), jnp.float32),
        },
    }


# ----------------------------------- main ------------------------------------

if __name__ == "__main__":
    bs, c, N = 2, 32, 16
    d_model, qN = 32, 16            # qN == N so dwconv masking / interpolate / pool match
    enc_dims, enc_depth = (32, 32, 32), (1, 1, 1)
    num_decoder_layers = 2

    kg = KeyGen(jax.random.PRNGKey(0))
    params = init_model(kg, d_model, enc_dims, enc_depth, num_decoder_layers, qN, c)

    src = jax.random.normal(kg(), (bs, c, N), jnp.float32)
    query_embed = 0.1 * jax.random.normal(kg(), (bs, d_model, qN), jnp.float32)
    mask = jnp.concatenate(
        [jnp.ones((bs, 1, N - 2), jnp.float32), jnp.zeros((bs, 1, 2), jnp.float32)],
        axis=-1)

    fwd = jax.jit(deco_convnet_forward)
    hs, memory, mask_out = fwd(src, query_embed, mask, params)
    jax.block_until_ready((hs, memory, mask_out))

    assert hs.shape == (bs, qN, d_model)
    assert memory.shape == (bs, enc_dims[-1], N)
    assert mask_out.shape == (bs, 1, N)
    print("KERNEL_OK")
</pallas_src>

<mosaic_0001>
module attributes {stable_mosaic.version = 11 : i64} {
  func.func @kernel(%arg0: i32, %arg1: memref<128x8xf32, #tpu.memory_space<vmem>>, %arg2: memref<8x32xf32, #tpu.memory_space<vmem>>, %arg3: memref<128x32xf32, #tpu.memory_space<vmem>>) attributes {dimension_semantics = [#tpu.dimension_semantics<parallel>], iteration_bounds = array<i64: 1>, scalar_prefetch = 0 : i64, scratch_operands = 0 : i64, tpu.core_type = #tpu.core_type<tc>, window_params = [{transform_indices = @transform_0, window_bounds = array<i64: 128, 8>}, {pipeline_mode = #tpu.pipeline_mode<synchronous>, transform_indices = @transform_1, window_bounds = array<i64: 8, 32>}, {transform_indices = @transform_2, window_bounds = array<i64: 128, 32>}]} {
    %c0 = arith.constant 0 : index
    %c0_0 = arith.constant 0 : index
    %0 = vector.load %arg1[%c0, %c0_0] : memref<128x8xf32, #tpu.memory_space<vmem>>, vector<128x8xf32>
    %c0_1 = arith.constant 0 : index
    %c0_2 = arith.constant 0 : index
    %1 = vector.load %arg2[%c0_1, %c0_2] : memref<8x32xf32, #tpu.memory_space<vmem>>, vector<8x32xf32>
    %cst = arith.constant dense<0.000000e+00> : vector<128x32xf32>
    %2 = tpu.matmul %0, %1, %cst {dimension_numbers = #tpu.dot_dimension_numbers<[1], [0], [0], [1], [0, 0, 1, 1], [], []>} : vector<128x8xf32>, vector<8x32xf32>, vector<128x32xf32> -> vector<128x32xf32>
    %c0_3 = arith.constant 0 : index
    %c0_4 = arith.constant 0 : index
    %3 = vector.load %arg3[%c0_3, %c0_4] : memref<128x32xf32, #tpu.memory_space<vmem>>, vector<128x32xf32>
    tpu.vector_store %arg3[%c0_3, %c0_4], %2 {strides = array<i32>} : memref<128x32xf32, #tpu.memory_space<vmem>>, vector<128x32xf32>,
    return
  }
  func.func @transform_0(%arg0: i32) -> (i32, i32) {
    %c0_i32 = arith.constant 0 : i32
    %c0_i32_0 = arith.constant 0 : i32
    return %arg0, %c0_i32 : i32, i32
  }
  func.func @transform_1(%arg0: i32) -> (i32, i32) {
    %c0_i32 = arith.constant 0 : i32
    %c0_i32_0 = arith.constant 0 : i32
    %c0_i32_1 = arith.constant 0 : i32
    return %c0_i32, %c0_i32_0 : i32, i32
  }
  func.func @transform_2(%arg0: i32) -> (i32, i32) {
    %c0_i32 = arith.constant 0 : i32
    %c0_i32_0 = arith.constant 0 : i32
    return %arg0, %c0_i32 : i32, i32
  }
}

module attributes {stable_mosaic.version = 11 : i64} {
  func.func @kernel(%arg0: i32, %arg1: memref<128x16xf32, #tpu.memory_space<vmem>>, %arg2: memref<16x33xf32, #tpu.memory_space<vmem>>, %arg3: memref<128x33xf32, #tpu.memory_space<vmem>>) attributes {dimension_semantics = [#tpu.dimension_semantics<parallel>], iteration_bounds = array<i64: 1>, scalar_prefetch = 0 : i64, scratch_operands = 0 : i64, tpu.core_type = #tpu.core_type<tc>, window_params = [{transform_indices = @transform_0, window_bounds = array<i64: 128, 16>}, {pipeline_mode = #tpu.pipeline_mode<synchronous>, transform_indices = @transform_1, window_bounds = array<i64: 16, 33>}, {transform_indices = @transform_2, window_bounds = array<i64: 128, 33>}]} {
    %c0 = arith.constant 0 : index
    %c0_0 = arith.constant 0 : index
    %0 = vector.load %arg1[%c0, %c0_0] : memref<128x16xf32, #tpu.memory_space<vmem>>, vector<128x16xf32>
    %c0_1 = arith.constant 0 : index
    %c0_2 = arith.constant 0 : index
    %1 = vector.load %arg2[%c0_1, %c0_2] : memref<16x33xf32, #tpu.memory_space<vmem>>, vector<16x33xf32>
    %cst = arith.constant dense<0.000000e+00> : vector<128x33xf32>
    %2 = tpu.matmul %0, %1, %cst {dimension_numbers = #tpu.dot_dimension_numbers<[1], [0], [0], [1], [0, 0, 1, 1], [], []>} : vector<128x16xf32>, vector<16x33xf32>, vector<128x33xf32> -> vector<128x33xf32>
    %c0_3 = arith.constant 0 : index
    %c0_4 = arith.constant 0 : index
    %3 = vector.load %arg3[%c0_3, %c0_4] : memref<128x33xf32, #tpu.memory_space<vmem>>, vector<128x33xf32>
    tpu.vector_store %arg3[%c0_3, %c0_4], %2 {strides = array<i32>} : memref<128x33xf32, #tpu.memory_space<vmem>>, vector<128x33xf32>,
    return
  }
  func.func @transform_0(%arg0: i32) -> (i32, i32) {
    %c0_i32 = arith.constant 0 : i32
    %c0_i32_0 = arith.constant 0 : i32
    return %arg0, %c0_i32 : i32, i32
  }
  func.func @transform_1(%arg0: i32) -> (i32, i32) {
    %c0_i32 = arith.constant 0 : i32
    %c0_i32_0 = arith.constant 0 : i32
    %c0_i32_1 = arith.constant 0 : i32
    return %c0_i32, %c0_i32_0 : i32, i32
  }
  func.func @transform_2(%arg0: i32) -> (i32, i32) {
    %c0_i32 = arith.constant 0 : i32
    %c0_i32_0 = arith.constant 0 : i32
    return %arg0, %c0_i32 : i32, i32
  }
}

module attributes {stable_mosaic.version = 11 : i64} {
  func.func @kernel(%arg0: i32, %arg1: memref<1x16x16xf32, #tpu.memory_space<vmem>>, %arg2: memref<4x16xf32, #tpu.memory_space<vmem>>, %arg3: memref<1x16xf32, #tpu.memory_space<vmem>>, %arg4: memref<1x16x16xf32, #tpu.memory_space<vmem>>, %arg5: memref<19x16xf32, #tpu.memory_space<vmem>>) attributes {dimension_semantics = [#tpu.dimension_semantics<parallel>], iteration_bounds = array<i64: 8>, scalar_prefetch = 0 : i64, scratch_operands = 1 : i64, tpu.core_type = #tpu.core_type<tc>, window_params = [{transform_indices = @transform_0, window_bounds = array<i64: 1, 16, 16>}, {pipeline_mode = #tpu.pipeline_mode<synchronous>, transform_indices = @transform_1, window_bounds = array<i64: 4, 16>}, {pipeline_mode = #tpu.pipeline_mode<synchronous>, transform_indices = @transform_2, window_bounds = array<i64: 1, 16>}, {transform_indices = @transform_3, window_bounds = array<i64: 1, 16, 16>}]} {
    %c0 = arith.constant 0 : index
    %c0_0 = arith.constant 0 : index
    %c0_1 = arith.constant 0 : index
    %0 = vector.load %arg1[%c0, %c0_0, %c0_1] : memref<1x16x16xf32, #tpu.memory_space<vmem>>, vector<1x16x16xf32>
    %1 = vector.shape_cast %0 : vector<1x16x16xf32> to vector<16x16xf32>
    %cst = arith.constant 0.000000e+00 : f32
    %2 = vector.broadcast %cst : f32 to vector<19x16xf32>
    %c0_2 = arith.constant 0 : index
    %c0_3 = arith.constant 0 : index
    %3 = vector.load %arg5[%c0_2, %c0_3] : memref<19x16xf32, #tpu.memory_space<vmem>>, vector<19x16xf32>
    tpu.vector_store %arg5[%c0_2, %c0_3], %2 {strides = array<i32>} : memref<19x16xf32, #tpu.memory_space<vmem>>, vector<19x16xf32>,
    %c3 = arith.constant 3 : index
    %c0_4 = arith.constant 0 : index
    %4 = vector.load %arg5[%c3, %c0_4] : memref<19x16xf32, #tpu.memory_space<vmem>>, vector<16x16xf32>
    tpu.vector_store %arg5[%c3, %c0_4], %1 {strides = array<i32>} : memref<19x16xf32, #tpu.memory_space<vmem>>, vector<16x16xf32>,
    %c0_5 = arith.constant 0 : index
    %c0_6 = arith.constant 0 : index
    %5 = vector.load %arg2[%c0_5, %c0_6] : memref<4x16xf32, #tpu.memory_space<vmem>>, vector<4x16xf32>
    %cst_7 = arith.constant 0.000000e+00 : f32
    %6 = vector.broadcast %cst_7 : f32 to vector<16x16xf32>
    %c0_8 = arith.constant 0 : index
    %c0_9 = arith.constant 0 : index
    %7 = vector.load %arg5[%c0_8, %c0_9] : memref<19x16xf32, #tpu.memory_space<vmem>>, vector<16x16xf32>
    %8 = vector.extract_strided_slice %5 {offsets = [0, 0], sizes = [1, 16], strides = [1, 1]} : vector<4x16xf32> to vector<1x16xf32>
    %9 = vector.shape_cast %8 : vector<1x16xf32> to vector<16xf32>
    %10 = vector.shape_cast %9 : vector<16xf32> to vector<1x16xf32>
    %11 = vector.broadcast %10 : vector<1x16xf32> to vector<16x16xf32>
    %12 = arith.mulf %7, %11 : vector<16x16xf32>
    %13 = arith.addf %6, %12 : vector<16x16xf32>
    %c1 = arith.constant 1 : index
    %c0_10 = arith.constant 0 : index
    %14 = vector.load %arg5[%c1, %c0_10] : memref<19x16xf32, #tpu.memory_space<vmem>>, vector<16x16xf32>
    %15 = vector.extract_strided_slice %5 {offsets = [1, 0], sizes = [1, 16], strides = [1, 1]} : vector<4x16xf32> to vector<1x16xf32>
    %16 = vector.shape_cast %15 : vector<1x16xf32> to vector<16xf32>
    %17 = vector.shape_cast %16 : vector<16xf32> to vector<1x16xf32>
    %18 = vector.broadcast %17 : vector<1x16xf32> to vector<16x16xf32>
    %19 = arith.mulf %14, %18 : vector<16x16xf32>
    %20 = arith.addf %13, %19 : vector<16x16xf32>
    %c2 = arith.constant 2 : index
    %c0_11 = arith.constant 0 : index
    %21 = vector.load %arg5[%c2, %c0_11] : memref<19x16xf32, #tpu.memory_space<vmem>>, vector<16x16xf32>
    %22 = vector.extract_strided_slice %5 {offsets = [2, 0], sizes = [1, 16], strides = [1, 1]} : vector<4x16xf32> to vector<1x16xf32>
    %23 = vector.shape_cast %22 : vector<1x16xf32> to vector<16xf32>
    %24 = vector.shape_cast %23 : vector<16xf32> to vector<1x16xf32>
    %25 = vector.broadcast %24 : vector<1x16xf32> to vector<16x16xf32>
    %26 = arith.mulf %21, %25 : vector<16x16xf32>
    %27 = arith.addf %20, %26 : vector<16x16xf32>
    %c3_12 = arith.constant 3 : index
    %c0_13 = arith.constant 0 : index
    %28 = vector.load %arg5[%c3_12, %c0_13] : memref<19x16xf32, #tpu.memory_space<vmem>>, vector<16x16xf32>
    %29 = vector.extract_strided_slice %5 {offsets = [3, 0], sizes = [1, 16], strides = [1, 1]} : vector<4x16xf32> to vector<1x16xf32>
    %30 = vector.shape_cast %29 : vector<1x16xf32> to vector<16xf32>
    %31 = vector.shape_cast %30 : vector<16xf32> to vector<1x16xf32>
    %32 = vector.broadcast %31 : vector<1x16xf32> to vector<16x16xf32>
    %33 = arith.mulf %28, %32 : vector<16x16xf32>
    %34 = arith.addf %27, %33 : vector<16x16xf32>
    %c0_14 = arith.constant 0 : index
    %c0_15 = arith.constant 0 : index
    %35 = vector.load %arg3[%c0_14, %c0_15] : memref<1x16xf32, #tpu.memory_space<vmem>>, vector<1x16xf32>
    %36 = vector.broadcast %35 : vector<1x16xf32> to vector<16x16xf32>
    %37 = arith.addf %34, %36 : vector<16x16xf32>
    %cst_16 = arith.constant 0.000000e+00 : f32
    %38 = vector.broadcast %cst_16 : f32 to vector<16x16xf32>
    %39 = arith.subf %38, %37 : vector<16x16xf32>
    %40 = math.exp %39 : vector<16x16xf32>
    %cst_17 = arith.constant 1.000000e+00 : f32
    %41 = vector.broadcast %cst_17 : f32 to vector<16x16xf32>
    %42 = arith.addf %41, %40 : vector<16x16xf32>
    %cst_18 = arith.constant 1.000000e+00 : f32
    %43 = vector.broadcast %cst_18 : f32 to vector<16x16xf32>
    %44 = arith.divf %43, %42 : vector<16x16xf32>
    %45 = arith.mulf %37, %44 : vector<16x16xf32>
    %46 = vector.shape_cast %45 : vector<16x16xf32> to vector<1x16x16xf32>
    %c0_19 = arith.constant 0 : index
    %c0_20 = arith.constant 0 : index
    %c0_21 = arith.constant 0 : index
    %47 = vector.load %arg4[%c0_19, %c0_20, %c0_21] : memref<1x16x16xf32, #tpu.memory_space<vmem>>, vector<1x16x16xf32>
    tpu.vector_store %arg4[%c0_19, %c0_20, %c0_21], %46 {strides = array<i32>} : memref<1x16x16xf32, #tpu.memory_space<vmem>>, vector<1x16x16xf32>,
    return
  }
  func.func @transform_0(%arg0: i32) -> (i32, i32, i32) {
    %c0_i32 = arith.constant 0 : i32
    %c0_i32_0 = arith.constant 0 : i32
    %c0_i32_1 = arith.constant 0 : i32
    return %arg0, %c0_i32, %c0_i32_0 : i32, i32, i32
  }
  func.func @transform_1(%arg0: i32) -> (i32, i32) {
    %c0_i32 = arith.constant 0 : i32
    %c0_i32_0 = arith.constant 0 : i32
    %c0_i32_1 = arith.constant 0 : i32
    return %c0_i32, %c0_i32_0 : i32, i32
  }
  func.func @transform_2(%arg0: i32) -> (i32, i32) {
    %c0_i32 = arith.constant 0 : i32
    %c0_i32_0 = arith.constant 0 : i32
    %c0_i32_1 = arith.constant 0 : i32
    return %c0_i32, %c0_i32_0 : i32, i32
  }
  func.func @transform_3(%arg0: i32) -> (i32, i32, i32) {
    %c0_i32 = arith.constant 0 : i32
    %c0_i32_0 = arith.constant 0 : i32
    %c0_i32_1 = arith.constant 0 : i32
    return %arg0, %c0_i32, %c0_i32_0 : i32, i32, i32
  }
}

module attributes {stable_mosaic.version = 11 : i64} {
  func.func @kernel(%arg0: i32, %arg1: memref<1x16x16x16xf32, #tpu.memory_space<vmem>>, %arg2: memref<1x16x16x16xf32, #tpu.memory_space<vmem>>, %arg3: memref<1x16x16x16xf32, #tpu.memory_space<vmem>>, %arg4: memref<1x16x16xf32, #tpu.memory_space<vmem>>) attributes {dimension_semantics = [#tpu.dimension_semantics<parallel>], iteration_bounds = array<i64: 8>, scalar_prefetch = 0 : i64, scratch_operands = 1 : i64, tpu.core_type = #tpu.core_type<tc>, window_params = [{transform_indices = @transform_0, window_bounds = array<i64: 1, 16, 16, 16>}, {transform_indices = @transform_1, window_bounds = array<i64: 1, 16, 16, 16>}, {transform_indices = @transform_2, window_bounds = array<i64: 1, 16, 16, 16>}]} {
    %cst = arith.constant 0.000000e+00 : f32
    %0 = vector.broadcast %cst : f32 to vector<1x16x16xf32>
    %c0 = arith.constant 0 : index
    %c0_0 = arith.constant 0 : index
    %c0_1 = arith.constant 0 : index
    %1 = vector.load %arg4[%c0, %c0_0, %c0_1] : memref<1x16x16xf32, #tpu.memory_space<vmem>>, vector<1x16x16xf32>
    tpu.vector_store %arg4[%c0, %c0_0, %c0_1], %0 {strides = array<i32>} : memref<1x16x16xf32, #tpu.memory_space<vmem>>, vector<1x16x16xf32>,
    %c0_i32 = arith.constant 0 : i32
    %c16_i32 = arith.constant 16 : i32
    %2 = arith.addi %c0_i32, %c16_i32 : i32
    %c1_i32 = arith.constant 1 : i32
    scf.for %arg5 = %c0_i32 to %2 step %c1_i32  : i32 {
      %c0_3 = arith.constant 0 : index
      %c0_4 = arith.constant 0 : index
      %c0_5 = arith.constant 0 : index
      %3 = vector.load %arg4[%c0_3, %c0_4, %c0_5] : memref<1x16x16xf32, #tpu.memory_space<vmem>>, vector<1x16x16xf32>
      %c0_6 = arith.constant 0 : index
      %4 = arith.index_cast %arg5 : i32 to index
      %c0_7 = arith.constant 0 : index
      %c0_8 = arith.constant 0 : index
      %5 = vector.load %arg1[%c0_6, %4, %c0_7, %c0_8] : memref<1x16x16x16xf32, #tpu.memory_space<vmem>>, vector<1x1x16x16xf32>
      %6 = vector.shape_cast %5 : vector<1x1x16x16xf32> to vector<1x16x16xf32>
      %7 = arith.mulf %3, %6 : vector<1x16x16xf32>
      %c0_9 = arith.constant 0 : index
      %8 = arith.index_cast %arg5 : i32 to index
      %c0_10 = arith.constant 0 : index
      %c0_11 = arith.constant 0 : index
      %9 = vector.load %arg2[%c0_9, %8, %c0_10, %c0_11] : memref<1x16x16x16xf32, #tpu.memory_space<vmem>>, vector<1x1x16x16xf32>
      %10 = vector.shape_cast %9 : vector<1x1x16x16xf32> to vector<1x16x16xf32>
      %11 = arith.addf %7, %10 : vector<1x16x16xf32>
      %c0_12 = arith.constant 0 : index
      %c0_13 = arith.constant 0 : index
      %c0_14 = arith.constant 0 : index
      %12 = vector.load %arg4[%c0_12, %c0_13, %c0_14] : memref<1x16x16xf32, #tpu.memory_space<vmem>>, vector<1x16x16xf32>
      tpu.vector_store %arg4[%c0_12, %c0_13, %c0_14], %11 {strides = array<i32>} : memref<1x16x16xf32, #tpu.memory_space<vmem>>, vector<1x16x16xf32>,
      %c0_15 = arith.constant 0 : index
      %13 = arith.index_cast %arg5 : i32 to index
      %c0_16 = arith.constant 0 : index
      %c0_17 = arith.constant 0 : index
      %14 = vector.load %arg3[%c0_15, %13, %c0_16, %c0_17] : memref<1x16x16x16xf32, #tpu.memory_space<vmem>>, vector<1x1x16x16xf32>
      %15 = vector.shape_cast %14 : vector<1x1x16x16xf32> to vector<1x16x16xf32>
      %16 = vector.shape_cast %11 : vector<1x16x16xf32> to vector<1x1x16x16xf32>
      tpu.vector_store %arg3[%c0_15, %13, %c0_16, %c0_17], %16 {strides = array<i32>} : memref<1x16x16x16xf32, #tpu.memory_space<vmem>>, vector<1x1x16x16xf32>,
    }
    %c16_i32_2 = arith.constant 16 : i32
    return
  }
  func.func @transform_0(%arg0: i32) -> (i32, i32, i32, i32) {
    %c0_i32 = arith.constant 0 : i32
    %c0_i32_0 = arith.constant 0 : i32
    %c0_i32_1 = arith.constant 0 : i32
    %c0_i32_2 = arith.constant 0 : i32
    return %arg0, %c0_i32, %c0_i32_0, %c0_i32_1 : i32, i32, i32, i32
  }
  func.func @transform_1(%arg0: i32) -> (i32, i32, i32, i32) {
    %c0_i32 = arith.constant 0 : i32
    %c0_i32_0 = arith.constant 0 : i32
    %c0_i32_1 = arith.constant 0 : i32
    %c0_i32_2 = arith.constant 0 : i32
    return %arg0, %c0_i32, %c0_i32_0, %c0_i32_1 : i32, i32, i32, i32
  }
  func.func @transform_2(%arg0: i32) -> (i32, i32, i32, i32) {
    %c0_i32 = arith.constant 0 : i32
    %c0_i32_0 = arith.constant 0 : i32
    %c0_i32_1 = arith.constant 0 : i32
    %c0_i32_2 = arith.constant 0 : i32
    return %arg0, %c0_i32, %c0_i32_0, %c0_i32_1 : i32, i32, i32, i32
  }
}

module attributes {stable_mosaic.version = 11 : i64} {
  func.func @kernel(%arg0: i32, %arg1: memref<128x16xf32, #tpu.memory_space<vmem>>, %arg2: memref<16x8xf32, #tpu.memory_space<vmem>>, %arg3: memref<128x8xf32, #tpu.memory_space<vmem>>) attributes {dimension_semantics = [#tpu.dimension_semantics<parallel>], iteration_bounds = array<i64: 1>, scalar_prefetch = 0 : i64, scratch_operands = 0 : i64, tpu.core_type = #tpu.core_type<tc>, window_params = [{transform_indices = @transform_0, window_bounds = array<i64: 128, 16>}, {pipeline_mode = #tpu.pipeline_mode<synchronous>, transform_indices = @transform_1, window_bounds = array<i64: 16, 8>}, {transform_indices = @transform_2, window_bounds = array<i64: 128, 8>}]} {
    %c0 = arith.constant 0 : index
    %c0_0 = arith.constant 0 : index
    %0 = vector.load %arg1[%c0, %c0_0] : memref<128x16xf32, #tpu.memory_space<vmem>>, vector<128x16xf32>
    %c0_1 = arith.constant 0 : index
    %c0_2 = arith.constant 0 : index
    %1 = vector.load %arg2[%c0_1, %c0_2] : memref<16x8xf32, #tpu.memory_space<vmem>>, vector<16x8xf32>
    %cst = arith.constant dense<0.000000e+00> : vector<128x8xf32>
    %2 = tpu.matmul %0, %1, %cst {dimension_numbers = #tpu.dot_dimension_numbers<[1], [0], [0], [1], [0, 0, 1, 1], [], []>} : vector<128x16xf32>, vector<16x8xf32>, vector<128x8xf32> -> vector<128x8xf32>
    %c0_3 = arith.constant 0 : index
    %c0_4 = arith.constant 0 : index
    %3 = vector.load %arg3[%c0_3, %c0_4] : memref<128x8xf32, #tpu.memory_space<vmem>>, vector<128x8xf32>
    tpu.vector_store %arg3[%c0_3, %c0_4], %2 {strides = array<i32>} : memref<128x8xf32, #tpu.memory_space<vmem>>, vector<128x8xf32>,
    return
  }
  func.func @transform_0(%arg0: i32) -> (i32, i32) {
    %c0_i32 = arith.constant 0 : i32
    %c0_i32_0 = arith.constant 0 : i32
    return %arg0, %c0_i32 : i32, i32
  }
  func.func @transform_1(%arg0: i32) -> (i32, i32) {
    %c0_i32 = arith.constant 0 : i32
    %c0_i32_0 = arith.constant 0 : i32
    %c0_i32_1 = arith.constant 0 : i32
    return %c0_i32, %c0_i32_0 : i32, i32
  }
  func.func @transform_2(%arg0: i32) -> (i32, i32) {
    %c0_i32 = arith.constant 0 : i32
    %c0_i32_0 = arith.constant 0 : i32
    return %arg0, %c0_i32 : i32, i32
  }
}

module attributes {stable_mosaic.version = 11 : i64} {
  func.func @kernel(%arg0: i32, %arg1: memref<1x16x32xf32, #tpu.memory_space<vmem>>, %arg2: memref<1x16x32xf32, #tpu.memory_space<vmem>>, %arg3: memref<1x16x1xf32, #tpu.memory_space<vmem>>, %arg4: memref<9x32xf32, #tpu.memory_space<vmem>>, %arg5: memref<1x32xf32, #tpu.memory_space<vmem>>, %arg6: memref<1x32xf32, #tpu.memory_space<vmem>>, %arg7: memref<1x32xf32, #tpu.memory_space<vmem>>, %arg8: memref<32x128xf32, #tpu.memory_space<vmem>>, %arg9: memref<1x128xf32, #tpu.memory_space<vmem>>, %arg10: memref<128x32xf32, #tpu.memory_space<vmem>>, %arg11: memref<1x32xf32, #tpu.memory_space<vmem>>, %arg12: memref<1x16x32xf32, #tpu.memory_space<vmem>>, %arg13: memref<24x32xf32, #tpu.memory_space<vmem>>) attributes {dimension_semantics = [#tpu.dimension_semantics<parallel>], iteration_bounds = array<i64: 2>, scalar_prefetch = 0 : i64, scratch_operands = 1 : i64, tpu.core_type = #tpu.core_type<tc>, window_params = [{transform_indices = @transform_0, window_bounds = array<i64: 1, 16, 32>}, {transform_indices = @transform_1, window_bounds = array<i64: 1, 16, 32>}, {transform_indices = @transform_2, window_bounds = array<i64: 1, 16, 1>}, {pipeline_mode = #tpu.pipeline_mode<synchronous>, transform_indices = @transform_3, window_bounds = array<i64: 9, 32>}, {pipeline_mode = #tpu.pipeline_mode<synchronous>, transform_indices = @transform_4, window_bounds = array<i64: 1, 32>}, {pipeline_mode = #tpu.pipeline_mode<synchronous>, transform_indices = @transform_5, window_bounds = array<i64: 1, 32>}, {pipeline_mode = #tpu.pipeline_mode<synchronous>, transform_indices = @transform_6, window_bounds = array<i64: 1, 32>}, {pipeline_mode = #tpu.pipeline_mode<synchronous>, transform_indices = @transform_7, window_bounds = array<i64: 32, 128>}, {pipeline_mode = #tpu.pipeline_mode<synchronous>, transform_indices = @transform_8, window_bounds = array<i64: 1, 128>}, {pipeline_mode = #tpu.pipeline_mode<synchronous>, transform_indices = @transform_9, window_bounds = array<i64: 128, 32>}, {pipeline_mode = #tpu.pipeline_mode<synchronous>, transform_indices = @transform_10, window_bounds = array<i64: 1, 32>}, {transform_indices = @transform_11, window_bounds = array<i64: 1, 16, 32>}]} {
    %c0 = arith.constant 0 : index
    %c0_0 = arith.constant 0 : index
    %c0_1 = arith.constant 0 : index
    %0 = vector.load %arg1[%c0, %c0_0, %c0_1] : memref<1x16x32xf32, #tpu.memory_space<vmem>>, vector<1x16x32xf32>
    %1 = vector.shape_cast %0 : vector<1x16x32xf32> to vector<16x32xf32>
    %c0_2 = arith.constant 0 : index
    %c0_3 = arith.constant 0 : index
    %c0_4 = arith.constant 0 : index
    %2 = vector.load %arg2[%c0_2, %c0_3, %c0_4] : memref<1x16x32xf32, #tpu.memory_space<vmem>>, vector<1x16x32xf32>
    %3 = vector.shape_cast %2 : vector<1x16x32xf32> to vector<16x32xf32>
    %4 = arith.addf %1, %3 : vector<16x32xf32>
    %cst = arith.constant 0.000000e+00 : f32
    %5 = vector.broadcast %cst : f32 to vector<24x32xf32>
    %c0_5 = arith.constant 0 : index
    %c0_6 = arith.constant 0 : index
    %6 = vector.load %arg13[%c0_5, %c0_6] : memref<24x32xf32, #tpu.memory_space<vmem>>, vector<24x32xf32>
    tpu.vector_store %arg13[%c0_5, %c0_6], %5 {strides = array<i32>} : memref<24x32xf32, #tpu.memory_space<vmem>>, vector<24x32xf32>,
    %c4 = arith.constant 4 : index
    %c0_7 = arith.constant 0 : index
    %7 = vector.load %arg13[%c4, %c0_7] : memref<24x32xf32, #tpu.memory_space<vmem>>, vector<16x32xf32>
    tpu.vector_store %arg13[%c4, %c0_7], %4 {strides = array<i32>} : memref<24x32xf32, #tpu.memory_space<vmem>>, vector<16x32xf32>,
    %c0_8 = arith.constant 0 : index
    %c0_9 = arith.constant 0 : index
    %8 = vector.load %arg4[%c0_8, %c0_9] : memref<9x32xf32, #tpu.memory_space<vmem>>, vector<9x32xf32>
    %cst_10 = arith.constant 0.000000e+00 : f32
    %9 = vector.broadcast %cst_10 : f32 to vector<16x32xf32>
    %c0_11 = arith.constant 0 : index
    %c0_12 = arith.constant 0 : index
    %10 = vector.load %arg13[%c0_11, %c0_12] : memref<24x32xf32, #tpu.memory_space<vmem>>, vector<16x32xf32>
    %11 = vector.extract_strided_slice %8 {offsets = [0, 0], sizes = [1, 32], strides = [1, 1]} : vector<9x32xf32> to vector<1x32xf32>
    %12 = vector.shape_cast %11 : vector<1x32xf32> to vector<32xf32>
    %13 = vector.shape_cast %12 : vector<32xf32> to vector<1x32xf32>
    %14 = vector.broadcast %13 : vector<1x32xf32> to vector<16x32xf32>
    %15 = arith.mulf %10, %14 : vector<16x32xf32>
    %16 = arith.addf %9, %15 : vector<16x32xf32>
    %c1 = arith.constant 1 : index
    %c0_13 = arith.constant 0 : index
    %17 = vector.load %arg13[%c1, %c0_13] : memref<24x32xf32, #tpu.memory_space<vmem>>, vector<16x32xf32>
    %18 = vector.extract_strided_slice %8 {offsets = [1, 0], sizes = [1, 32], strides = [1, 1]} : vector<9x32xf32> to vector<1x32xf32>
    %19 = vector.shape_cast %18 : vector<1x32xf32> to vector<32xf32>
    %20 = vector.shape_cast %19 : vector<32xf32> to vector<1x32xf32>
    %21 = vector.broadcast %20 : vector<1x32xf32> to vector<16x32xf32>
    %22 = arith.mulf %17, %21 : vector<16x32xf32>
    %23 = arith.addf %16, %22 : vector<16x32xf32>
    %c2 = arith.constant 2 : index
    %c0_14 = arith.constant 0 : index
    %24 = vector.load %arg13[%c2, %c0_14] : memref<24x32xf32, #tpu.memory_space<vmem>>, vector<16x32xf32>
    %25 = vector.extract_strided_slice %8 {offsets = [2, 0], sizes = [1, 32], strides = [1, 1]} : vector<9x32xf32> to vector<1x32xf32>
    %26 = vector.shape_cast %25 : vector<1x32xf32> to vector<32xf32>
    %27 = vector.shape_cast %26 : vector<32xf32> to vector<1x32xf32>
    %28 = vector.broadcast %27 : vector<1x32xf32> to vector<16x32xf32>
    %29 = arith.mulf %24, %28 : vector<16x32xf32>
    %30 = arith.addf %23, %29 : vector<16x32xf32>
    %c3 = arith.constant 3 : index
    %c0_15 = arith.constant 0 : index
    %31 = vector.load %arg13[%c3, %c0_15] : memref<24x32xf32, #tpu.memory_space<vmem>>, vector<16x32xf32>
    %32 = vector.extract_strided_slice %8 {offsets = [3, 0], sizes = [1, 32], strides = [1, 1]} : vector<9x32xf32> to vector<1x32xf32>
    %33 = vector.shape_cast %32 : vector<1x32xf32> to vector<32xf32>
    %34 = vector.shape_cast %33 : vector<32xf32> to vector<1x32xf32>
    %35 = vector.broadcast %34 : vector<1x32xf32> to vector<16x32xf32>
    %36 = arith.mulf %31, %35 : vector<16x32xf32>
    %37 = arith.addf %30, %36 : vector<16x32xf32>
    %c4_16 = arith.constant 4 : index
    %c0_17 = arith.constant 0 : index
    %38 = vector.load %arg13[%c4_16, %c0_17] : memref<24x32xf32, #tpu.memory_space<vmem>>, vector<16x32xf32>
    %39 = vector.extract_strided_slice %8 {offsets = [4, 0], sizes = [1, 32], strides = [1, 1]} : vector<9x32xf32> to vector<1x32xf32>
    %40 = vector.shape_cast %39 : vector<1x32xf32> to vector<32xf32>
    %41 = vector.shape_cast %40 : vector<32xf32> to vector<1x32xf32>
    %42 = vector.broadcast %41 : vector<1x32xf32> to vector<16x32xf32>
    %43 = arith.mulf %38, %42 : vector<16x32xf32>
    %44 = arith.addf %37, %43 : vector<16x32xf32>
    %c5 = arith.constant 5 : index
    %c0_18 = arith.constant 0 : index
    %45 = vector.load %arg13[%c5, %c0_18] : memref<24x32xf32, #tpu.memory_space<vmem>>, vector<16x32xf32>
    %46 = vector.extract_strided_slice %8 {offsets = [5, 0], sizes = [1, 32], strides = [1, 1]} : vector<9x32xf32> to vector<1x32xf32>
    %47 = vector.shape_cast %46 : vector<1x32xf32> to vector<32xf32>
    %48 = vector.shape_cast %47 : vector<32xf32> to vector<1x32xf32>
    %49 = vector.broadcast %48 : vector<1x32xf32> to vector<16x32xf32>
    %50 = arith.mulf %45, %49 : vector<16x32xf32>
    %51 = arith.addf %44, %50 : vector<16x32xf32>
    %c6 = arith.constant 6 : index
    %c0_19 = arith.constant 0 : index
    %52 = vector.load %arg13[%c6, %c0_19] : memref<24x32xf32, #tpu.memory_space<vmem>>, vector<16x32xf32>
    %53 = vector.extract_strided_slice %8 {offsets = [6, 0], sizes = [1, 32], strides = [1, 1]} : vector<9x32xf32> to vector<1x32xf32>
    %54 = vector.shape_cast %53 : vector<1x32xf32> to vector<32xf32>
    %55 = vector.shape_cast %54 : vector<32xf32> to vector<1x32xf32>
    %56 = vector.broadcast %55 : vector<1x32xf32> to vector<16x32xf32>
    %57 = arith.mulf %52, %56 : vector<16x32xf32>
    %58 = arith.addf %51, %57 : vector<16x32xf32>
    %c7 = arith.constant 7 : index
    %c0_20 = arith.constant 0 : index
    %59 = vector.load %arg13[%c7, %c0_20] : memref<24x32xf32, #tpu.memory_space<vmem>>, vector<16x32xf32>
    %60 = vector.extract_strided_slice %8 {offsets = [7, 0], sizes = [1, 32], strides = [1, 1]} : vector<9x32xf32> to vector<1x32xf32>
    %61 = vector.shape_cast %60 : vector<1x32xf32> to vector<32xf32>
    %62 = vector.shape_cast %61 : vector<32xf32> to vector<1x32xf32>
    %63 = vector.broadcast %62 : vector<1x32xf32> to vector<16x32xf32>
    %64 = arith.mulf %59, %63 : vector<16x32xf32>
    %65 = arith.addf %58, %64 : vector<16x32xf32>
    %c8 = arith.constant 8 : index
    %c0_21 = arith.constant 0 : index
    %66 = vector.load %arg13[%c8, %c0_21] : memref<24x32xf32, #tpu.memory_space<vmem>>, vector<16x32xf32>
    %67 = vector.extract_strided_slice %8 {offsets = [8, 0], sizes = [1, 32], strides = [1, 1]} : vector<9x32xf32> to vector<1x32xf32>
    %68 = vector.shape_cast %67 : vector<1x32xf32> to vector<32xf32>
    %69 = vector.shape_cast %68 : vector<32xf32> to vector<1x32xf32>
    %70 = vector.broadcast %69 : vector<1x32xf32> to vector<16x32xf32>
    %71 = arith.mulf %66, %70 : vector<16x32xf32>
    %72 = arith.addf %65, %71 : vector<16x32xf32>
    %c0_22 = arith.constant 0 : index
    %c0_23 = arith.constant 0 : index
    %73 = vector.load %arg5[%c0_22, %c0_23] : memref<1x32xf32, #tpu.memory_space<vmem>>, vector<1x32xf32>
    %74 = vector.broadcast %73 : vector<1x32xf32> to vector<16x32xf32>
    %75 = arith.addf %72, %74 : vector<16x32xf32>
    %c0_24 = arith.constant 0 : index
    %c0_25 = arith.constant 0 : index
    %c0_26 = arith.constant 0 : index
    %76 = vector.load %arg3[%c0_24, %c0_25, %c0_26] : memref<1x16x1xf32, #tpu.memory_space<vmem>>, vector<1x16x1xf32>
    %77 = vector.shape_cast %76 : vector<1x16x1xf32> to vector<16x1xf32>
    %78 = vector.broadcast %77 : vector<16x1xf32> to vector<16x32xf32>
    %79 = arith.mulf %75, %78 : vector<16x32xf32>
    %cst_27 = arith.constant dense<0.000000e+00> : vector<16xf32>
    %80 = vector.multi_reduction <add>, %79, %cst_27 [1] : vector<16x32xf32> to vector<16xf32>
    %81 = vector.shape_cast %80 : vector<16xf32> to vector<16x1xf32>
    %cst_28 = arith.constant 3.200000e+01 : f32
    %82 = vector.broadcast %cst_28 : f32 to vector<16x1xf32>
    %83 = arith.divf %81, %82 : vector<16x1xf32>
    %84 = vector.broadcast %83 : vector<16x1xf32> to vector<16x32xf32>
    %85 = arith.subf %79, %84 : vector<16x32xf32>
    %86 = arith.mulf %85, %85 : vector<16x32xf32>
    %cst_29 = arith.constant dense<0.000000e+00> : vector<16xf32>
    %87 = vector.multi_reduction <add>, %86, %cst_29 [1] : vector<16x32xf32> to vector<16xf32>
    %88 = vector.shape_cast %87 : vector<16xf32> to vector<16x1xf32>
    %cst_30 = arith.constant 3.200000e+01 : f32
    %89 = vector.broadcast %cst_30 : f32 to vector<16x1xf32>
    %90 = arith.divf %88, %89 : vector<16x1xf32>
    %91 = vector.broadcast %83 : vector<16x1xf32> to vector<16x32xf32>
    %92 = arith.subf %79, %91 : vector<16x32xf32>
    %cst_31 = arith.constant 9.99999997E-7 : f32
    %93 = vector.broadcast %cst_31 : f32 to vector<16x1xf32>
    %94 = arith.addf %90, %93 : vector<16x1xf32>
    %95 = math.rsqrt %94 : vector<16x1xf32>
    %96 = vector.broadcast %95 : vector<16x1xf32> to vector<16x32xf32>
    %97 = arith.mulf %92, %96 : vector<16x32xf32>
    %c0_32 = arith.constant 0 : index
    %c0_33 = arith.constant 0 : index
    %98 = vector.load %arg6[%c0_32, %c0_33] : memref<1x32xf32, #tpu.memory_space<vmem>>, vector<1x32xf32>
    %99 = vector.broadcast %98 : vector<1x32xf32> to vector<16x32xf32>
    %100 = arith.mulf %97, %99 : vector<16x32xf32>
    %c0_34 = arith.constant 0 : index
    %c0_35 = arith.constant 0 : index
    %101 = vector.load %arg7[%c0_34, %c0_35] : memref<1x32xf32, #tpu.memory_space<vmem>>, vector<1x32xf32>
    %102 = vector.broadcast %101 : vector<1x32xf32> to vector<16x32xf32>
    %103 = arith.addf %100, %102 : vector<16x32xf32>
    %c0_36 = arith.constant 0 : index
    %c0_37 = arith.constant 0 : index
    %104 = vector.load %arg8[%c0_36, %c0_37] : memref<32x128xf32, #tpu.memory_space<vmem>>, vector<32x128xf32>
    %cst_38 = arith.constant dense<0.000000e+00> : vector<16x128xf32>
    %105 = tpu.matmul %103, %104, %cst_38 {dimension_numbers = #tpu.dot_dimension_numbers<[1], [0], [0], [1], [0, 0, 1, 1], [], []>} : vector<16x32xf32>, vector<32x128xf32>, vector<16x128xf32> -> vector<16x128xf32>
    %c0_39 = arith.constant 0 : index
    %c0_40 = arith.constant 0 : index
    %106 = vector.load %arg9[%c0_39, %c0_40] : memref<1x128xf32, #tpu.memory_space<vmem>>, vector<1x128xf32>
    %107 = vector.broadcast %106 : vector<1x128xf32> to vector<16x128xf32>
    %108 = arith.addf %105, %107 : vector<16x128xf32>
    %109 = arith.mulf %108, %108 : vector<16x128xf32>
    %110 = arith.mulf %108, %109 : vector<16x128xf32>
    %cst_41 = arith.constant 4.471500e-02 : f32
    %111 = vector.broadcast %cst_41 : f32 to vector<16x128xf32>
    %112 = arith.mulf %111, %110 : vector<16x128xf32>
    %113 = arith.addf %108, %112 : vector<16x128xf32>
    %cst_42 = arith.constant 0.797884583 : f32
    %114 = vector.broadcast %cst_42 : f32 to vector<16x128xf32>
    %115 = arith.mulf %114, %113 : vector<16x128xf32>
    %116 = math.tanh %115 : vector<16x128xf32>
    %cst_43 = arith.constant 1.000000e+00 : f32
    %117 = vector.broadcast %cst_43 : f32 to vector<16x128xf32>
    %118 = arith.addf %117, %116 : vector<16x128xf32>
    %cst_44 = arith.constant 5.000000e-01 : f32
    %119 = vector.broadcast %cst_44 : f32 to vector<16x128xf32>
    %120 = arith.mulf %119, %118 : vector<16x128xf32>
    %121 = arith.mulf %108, %120 : vector<16x128xf32>
    %c0_45 = arith.constant 0 : index
    %c0_46 = arith.constant 0 : index
    %122 = vector.load %arg10[%c0_45, %c0_46] : memref<128x32xf32, #tpu.memory_space<vmem>>, vector<128x32xf32>
    %cst_47 = arith.constant dense<0.000000e+00> : vector<16x32xf32>
    %123 = tpu.matmul %121, %122, %cst_47 {dimension_numbers = #tpu.dot_dimension_numbers<[1], [0], [0], [1], [0, 0, 1, 1], [], []>} : vector<16x128xf32>, vector<128x32xf32>, vector<16x32xf32> -> vector<16x32xf32>
    %c0_48 = arith.constant 0 : index
    %c0_49 = arith.constant 0 : index
    %124 = vector.load %arg11[%c0_48, %c0_49] : memref<1x32xf32, #tpu.memory_space<vmem>>, vector<1x32xf32>
    %125 = vector.broadcast %124 : vector<1x32xf32> to vector<16x32xf32>
    %126 = arith.addf %123, %125 : vector<16x32xf32>
    %127 = arith.addf %1, %126 : vector<16x32xf32>
    %128 = vector.shape_cast %127 : vector<16x32xf32> to vector<1x16x32xf32>
    %c0_50 = arith.constant 0 : index
    %c0_51 = arith.constant 0 : index
    %c0_52 = arith.constant 0 : index
    %129 = vector.load %arg12[%c0_50, %c0_51, %c0_52] : memref<1x16x32xf32, #tpu.memory_space<vmem>>, vector<1x16x32xf32>
    tpu.vector_store %arg12[%c0_50, %c0_51, %c0_52], %128 {strides = array<i32>} : memref<1x16x32xf32, #tpu.memory_space<vmem>>, vector<1x16x32xf32>,
    return
  }
  func.func @transform_0(%arg0: i32) -> (i32, i32, i32) {
    %c0_i32 = arith.constant 0 : i32
    %c0_i32_0 = arith.constant 0 : i32
    %c0_i32_1 = arith.constant 0 : i32
    return %arg0, %c0_i32, %c0_i32_0 : i32, i32, i32
  }
  func.func @transform_1(%arg0: i32) -> (i32, i32, i32) {
    %c0_i32 = arith.constant 0 : i32
    %c0_i32_0 = arith.constant 0 : i32
    %c0_i32_1 = arith.constant 0 : i32
    return %arg0, %c0_i32, %c0_i32_0 : i32, i32, i32
  }
  func.func @transform_2(%arg0: i32) -> (i32, i32, i32) {
    %c0_i32 = arith.constant 0 : i32
    %c0_i32_0 = arith.constant 0 : i32
    %c0_i32_1 = arith.constant 0 : i32
    return %arg0, %c0_i32, %c0_i32_0 : i32, i32, i32
  }
  func.func @transform_3(%arg0: i32) -> (i32, i32) {
    %c0_i32 = arith.constant 0 : i32
    %c0_i32_0 = arith.constant 0 : i32
    %c0_i32_1 = arith.constant 0 : i32
    return %c0_i32, %c0_i32_0 : i32, i32
  }
  func.func @transform_4(%arg0: i32) -> (i32, i32) {
    %c0_i32 = arith.constant 0 : i32
    %c0_i32_0 = arith.constant 0 : i32
    %c0_i32_1 = arith.constant 0 : i32
    return %c0_i32, %c0_i32_0 : i32, i32
  }
  func.func @transform_5(%arg0: i32) -> (i32, i32) {
    %c0_i32 = arith.constant 0 : i32
    %c0_i32_0 = arith.constant 0 : i32
    %c0_i32_1 = arith.constant 0 : i32
    return %c0_i32, %c0_i32_0 : i32, i32
  }
  func.func @transform_6(%arg0: i32) -> (i32, i32) {
    %c0_i32 = arith.constant 0 : i32
    %c0_i32_0 = arith.constant 0 : i32
    %c0_i32_1 = arith.constant 0 : i32
    return %c0_i32, %c0_i32_0 : i32, i32
  }
  func.func @transform_7(%arg0: i32) -> (i32, i32) {
    %c0_i32 = arith.constant 0 : i32
    %c0_i32_0 = arith.constant 0 : i32
    %c0_i32_1 = arith.constant 0 : i32
    return %c0_i32, %c0_i32_0 : i32, i32
  }
  func.func @transform_8(%arg0: i32) -> (i32, i32) {
    %c0_i32 = arith.constant 0 : i32
    %c0_i32_0 = arith.constant 0 : i32
    %c0_i32_1 = arith.constant 0 : i32
    return %c0_i32, %c0_i32_0 : i32, i32
  }
  func.func @transform_9(%arg0: i32) -> (i32, i32) {
    %c0_i32 = arith.constant 0 : i32
    %c0_i32_0 = arith.constant 0 : i32
    %c0_i32_1 = arith.constant 0 : i32
    return %c0_i32, %c0_i32_0 : i32, i32
  }
  func.func @transform_10(%arg0: i32) -> (i32, i32) {
    %c0_i32 = arith.constant 0 : i32
    %c0_i32_0 = arith.constant 0 : i32
    %c0_i32_1 = arith.constant 0 : i32
    return %c0_i32, %c0_i32_0 : i32, i32
  }
  func.func @transform_11(%arg0: i32) -> (i32, i32, i32) {
    %c0_i32 = arith.constant 0 : i32
    %c0_i32_0 = arith.constant 0 : i32
    %c0_i32_1 = arith.constant 0 : i32
    return %arg0, %c0_i32, %c0_i32_0 : i32, i32, i32
  }
}

module attributes {stable_mosaic.version = 11 : i64} {
  func.func @kernel(%arg0: i32, %arg1: memref<32x32xf32, #tpu.memory_space<vmem>>, %arg2: memref<32x32xf32, #tpu.memory_space<vmem>>, %arg3: memref<1x32xf32, #tpu.memory_space<vmem>>, %arg4: memref<32x32xf32, #tpu.memory_space<vmem>>) attributes {dimension_semantics = [#tpu.dimension_semantics<parallel>], iteration_bounds = array<i64: 1>, scalar_prefetch = 0 : i64, scratch_operands = 0 : i64, tpu.core_type = #tpu.core_type<tc>, window_params = [{transform_indices = @transform_0, window_bounds = array<i64: 32, 32>}, {pipeline_mode = #tpu.pipeline_mode<synchronous>, transform_indices = @transform_1, window_bounds = array<i64: 32, 32>}, {pipeline_mode = #tpu.pipeline_mode<synchronous>, transform_indices = @transform_2, window_bounds = array<i64: 1, 32>}, {transform_indices = @transform_3, window_bounds = array<i64: 32, 32>}]} {
    %c0 = arith.constant 0 : index
    %c0_0 = arith.constant 0 : index
    %0 = vector.load %arg1[%c0, %c0_0] : memref<32x32xf32, #tpu.memory_space<vmem>>, vector<32x32xf32>
    %c0_1 = arith.constant 0 : index
    %c0_2 = arith.constant 0 : index
    %1 = vector.load %arg2[%c0_1, %c0_2] : memref<32x32xf32, #tpu.memory_space<vmem>>, vector<32x32xf32>
    %cst = arith.constant dense<0.000000e+00> : vector<32x32xf32>
    %2 = tpu.matmul %0, %1, %cst {dimension_numbers = #tpu.dot_dimension_numbers<[1], [0], [0], [1], [0, 0, 1, 1], [], []>} : vector<32x32xf32>, vector<32x32xf32>, vector<32x32xf32> -> vector<32x32xf32>
    %c0_3 = arith.constant 0 : index
    %c0_4 = arith.constant 0 : index
    %3 = vector.load %arg3[%c0_3, %c0_4] : memref<1x32xf32, #tpu.memory_space<vmem>>, vector<1x32xf32>
    %4 = vector.broadcast %3 : vector<1x32xf32> to vector<32x32xf32>
    %5 = arith.addf %2, %4 : vector<32x32xf32>
    %c0_5 = arith.constant 0 : index
    %c0_6 = arith.constant 0 : index
    %6 = vector.load %arg4[%c0_5, %c0_6] : memref<32x32xf32, #tpu.memory_space<vmem>>, vector<32x32xf32>
    tpu.vector_store %arg4[%c0_5, %c0_6], %5 {strides = array<i32>} : memref<32x32xf32, #tpu.memory_space<vmem>>, vector<32x32xf32>,
    return
  }
  func.func @transform_0(%arg0: i32) -> (i32, i32) {
    %c0_i32 = arith.constant 0 : i32
    %c0_i32_0 = arith.constant 0 : i32
    return %arg0, %c0_i32 : i32, i32
  }
  func.func @transform_1(%arg0: i32) -> (i32, i32) {
    %c0_i32 = arith.constant 0 : i32
    %c0_i32_0 = arith.constant 0 : i32
    %c0_i32_1 = arith.constant 0 : i32
    return %c0_i32, %c0_i32_0 : i32, i32
  }
  func.func @transform_2(%arg0: i32) -> (i32, i32) {
    %c0_i32 = arith.constant 0 : i32
    %c0_i32_0 = arith.constant 0 : i32
    %c0_i32_1 = arith.constant 0 : i32
    return %c0_i32, %c0_i32_0 : i32, i32
  }
  func.func @transform_3(%arg0: i32) -> (i32, i32) {
    %c0_i32 = arith.constant 0 : i32
    %c0_i32_0 = arith.constant 0 : i32
    return %arg0, %c0_i32 : i32, i32
  }
}

module attributes {stable_mosaic.version = 11 : i64} {
  func.func @kernel(%arg0: i32, %arg1: memref<32x32xf32, #tpu.memory_space<vmem>>, %arg2: memref<1x32xf32, #tpu.memory_space<vmem>>, %arg3: memref<1x32xf32, #tpu.memory_space<vmem>>, %arg4: memref<32x32xf32, #tpu.memory_space<vmem>>) attributes {dimension_semantics = [#tpu.dimension_semantics<parallel>], iteration_bounds = array<i64: 1>, scalar_prefetch = 0 : i64, scratch_operands = 0 : i64, tpu.core_type = #tpu.core_type<tc>, window_params = [{transform_indices = @transform_0, window_bounds = array<i64: 32, 32>}, {pipeline_mode = #tpu.pipeline_mode<synchronous>, transform_indices = @transform_1, window_bounds = array<i64: 1, 32>}, {pipeline_mode = #tpu.pipeline_mode<synchronous>, transform_indices = @transform_2, window_bounds = array<i64: 1, 32>}, {transform_indices = @transform_3, window_bounds = array<i64: 32, 32>}]} {
    %c0 = arith.constant 0 : index
    %c0_0 = arith.constant 0 : index
    %0 = vector.load %arg1[%c0, %c0_0] : memref<32x32xf32, #tpu.memory_space<vmem>>, vector<32x32xf32>
    %cst = arith.constant dense<0.000000e+00> : vector<32xf32>
    %1 = vector.multi_reduction <add>, %0, %cst [1] : vector<32x32xf32> to vector<32xf32>
    %2 = vector.shape_cast %1 : vector<32xf32> to vector<32x1xf32>
    %cst_1 = arith.constant 3.200000e+01 : f32
    %3 = vector.broadcast %cst_1 : f32 to vector<32x1xf32>
    %4 = arith.divf %2, %3 : vector<32x1xf32>
    %5 = vector.broadcast %4 : vector<32x1xf32> to vector<32x32xf32>
    %6 = arith.subf %0, %5 : vector<32x32xf32>
    %7 = arith.mulf %6, %6 : vector<32x32xf32>
    %cst_2 = arith.constant dense<0.000000e+00> : vector<32xf32>
    %8 = vector.multi_reduction <add>, %7, %cst_2 [1] : vector<32x32xf32> to vector<32xf32>
    %9 = vector.shape_cast %8 : vector<32xf32> to vector<32x1xf32>
    %cst_3 = arith.constant 3.200000e+01 : f32
    %10 = vector.broadcast %cst_3 : f32 to vector<32x1xf32>
    %11 = arith.divf %9, %10 : vector<32x1xf32>
    %12 = vector.broadcast %4 : vector<32x1xf32> to vector<32x32xf32>
    %13 = arith.subf %0, %12 : vector<32x32xf32>
    %cst_4 = arith.constant 9.99999997E-7 : f32
    %14 = vector.broadcast %cst_4 : f32 to vector<32x1xf32>
    %15 = arith.addf %11, %14 : vector<32x1xf32>
    %16 = math.rsqrt %15 : vector<32x1xf32>
    %17 = vector.broadcast %16 : vector<32x1xf32> to vector<32x32xf32>
    %18 = arith.mulf %13, %17 : vector<32x32xf32>
    %c0_5 = arith.constant 0 : index
    %c0_6 = arith.constant 0 : index
    %19 = vector.load %arg2[%c0_5, %c0_6] : memref<1x32xf32, #tpu.memory_space<vmem>>, vector<1x32xf32>
    %20 = vector.broadcast %19 : vector<1x32xf32> to vector<32x32xf32>
    %21 = arith.mulf %18, %20 : vector<32x32xf32>
    %c0_7 = arith.constant 0 : index
    %c0_8 = arith.constant 0 : index
    %22 = vector.load %arg3[%c0_7, %c0_8] : memref<1x32xf32, #tpu.memory_space<vmem>>, vector<1x32xf32>
    %23 = vector.broadcast %22 : vector<1x32xf32> to vector<32x32xf32>
    %24 = arith.addf %21, %23 : vector<32x32xf32>
    %c0_9 = arith.constant 0 : index
    %c0_10 = arith.constant 0 : index
    %25 = vector.load %arg4[%c0_9, %c0_10] : memref<32x32xf32, #tpu.memory_space<vmem>>, vector<32x32xf32>
    tpu.vector_store %arg4[%c0_9, %c0_10], %24 {strides = array<i32>} : memref<32x32xf32, #tpu.memory_space<vmem>>, vector<32x32xf32>,
    return
  }
  func.func @transform_0(%arg0: i32) -> (i32, i32) {
    %c0_i32 = arith.constant 0 : i32
    %c0_i32_0 = arith.constant 0 : i32
    return %arg0, %c0_i32 : i32, i32
  }
  func.func @transform_1(%arg0: i32) -> (i32, i32) {
    %c0_i32 = arith.constant 0 : i32
    %c0_i32_0 = arith.constant 0 : i32
    %c0_i32_1 = arith.constant 0 : i32
    return %c0_i32, %c0_i32_0 : i32, i32
  }
  func.func @transform_2(%arg0: i32) -> (i32, i32) {
    %c0_i32 = arith.constant 0 : i32
    %c0_i32_0 = arith.constant 0 : i32
    %c0_i32_1 = arith.constant 0 : i32
    return %c0_i32, %c0_i32_0 : i32, i32
  }
  func.func @transform_3(%arg0: i32) -> (i32, i32) {
    %c0_i32 = arith.constant 0 : i32
    %c0_i32_0 = arith.constant 0 : i32
    return %arg0, %c0_i32 : i32, i32
  }
}

module attributes {stable_mosaic.version = 11 : i64} {
  func.func @kernel(%arg0: i32, %arg1: memref<1x16x32xf32, #tpu.memory_space<vmem>>, %arg2: memref<1x16x32xf32, #tpu.memory_space<vmem>>, %arg3: memref<1x16x1xf32, #tpu.memory_space<vmem>>, %arg4: memref<9x32xf32, #tpu.memory_space<vmem>>, %arg5: memref<1x32xf32, #tpu.memory_space<vmem>>, %arg6: memref<1x32xf32, #tpu.memory_space<vmem>>, %arg7: memref<1x32xf32, #tpu.memory_space<vmem>>, %arg8: memref<32x128xf32, #tpu.memory_space<vmem>>, %arg9: memref<1x128xf32, #tpu.memory_space<vmem>>, %arg10: memref<128x32xf32, #tpu.memory_space<vmem>>, %arg11: memref<1x32xf32, #tpu.memory_space<vmem>>, %arg12: memref<1x16x32xf32, #tpu.memory_space<vmem>>, %arg13: memref<24x32xf32, #tpu.memory_space<vmem>>) attributes {dimension_semantics = [#tpu.dimension_semantics<parallel>], iteration_bounds = array<i64: 2>, scalar_prefetch = 0 : i64, scratch_operands = 1 : i64, tpu.core_type = #tpu.core_type<tc>, window_params = [{transform_indices = @transform_0, window_bounds = array<i64: 1, 16, 32>}, {transform_indices = @transform_1, window_bounds = array<i64: 1, 16, 32>}, {transform_indices = @transform_2, window_bounds = array<i64: 1, 16, 1>}, {pipeline_mode = #tpu.pipeline_mode<synchronous>, transform_indices = @transform_3, window_bounds = array<i64: 9, 32>}, {pipeline_mode = #tpu.pipeline_mode<synchronous>, transform_indices = @transform_4, window_bounds = array<i64: 1, 32>}, {pipeline_mode = #tpu.pipeline_mode<synchronous>, transform_indices = @transform_5, window_bounds = array<i64: 1, 32>}, {pipeline_mode = #tpu.pipeline_mode<synchronous>, transform_indices = @transform_6, window_bounds = array<i64: 1, 32>}, {pipeline_mode = #tpu.pipeline_mode<synchronous>, transform_indices = @transform_7, window_bounds = array<i64: 32, 128>}, {pipeline_mode = #tpu.pipeline_mode<synchronous>, transform_indices = @transform_8, window_bounds = array<i64: 1, 128>}, {pipeline_mode = #tpu.pipeline_mode<synchronous>, transform_indices = @transform_9, window_bounds = array<i64: 128, 32>}, {pipeline_mode = #tpu.pipeline_mode<synchronous>, transform_indices = @transform_10, window_bounds = array<i64: 1, 32>}, {transform_indices = @transform_11, window_bounds = array<i64: 1, 16, 32>}]} {
    %c0 = arith.constant 0 : index
    %c0_0 = arith.constant 0 : index
    %c0_1 = arith.constant 0 : index
    %0 = vector.load %arg1[%c0, %c0_0, %c0_1] : memref<1x16x32xf32, #tpu.memory_space<vmem>>, vector<1x16x32xf32>
    %1 = vector.shape_cast %0 : vector<1x16x32xf32> to vector<16x32xf32>
    %c0_2 = arith.constant 0 : index
    %c0_3 = arith.constant 0 : index
    %c0_4 = arith.constant 0 : index
    %2 = vector.load %arg2[%c0_2, %c0_3, %c0_4] : memref<1x16x32xf32, #tpu.memory_space<vmem>>, vector<1x16x32xf32>
    %3 = vector.shape_cast %2 : vector<1x16x32xf32> to vector<16x32xf32>
    %4 = arith.addf %1, %3 : vector<16x32xf32>
    %cst = arith.constant 0.000000e+00 : f32
    %5 = vector.broadcast %cst : f32 to vector<24x32xf32>
    %c0_5 = arith.constant 0 : index
    %c0_6 = arith.constant 0 : index
    %6 = vector.load %arg13[%c0_5, %c0_6] : memref<24x32xf32, #tpu.memory_space<vmem>>, vector<24x32xf32>
    tpu.vector_store %arg13[%c0_5, %c0_6], %5 {strides = array<i32>} : memref<24x32xf32, #tpu.memory_space<vmem>>, vector<24x32xf32>,
    %c4 = arith.constant 4 : index
    %c0_7 = arith.constant 0 : index
    %7 = vector.load %arg13[%c4, %c0_7] : memref<24x32xf32, #tpu.memory_space<vmem>>, vector<16x32xf32>
    tpu.vector_store %arg13[%c4, %c0_7], %4 {strides = array<i32>} : memref<24x32xf32, #tpu.memory_space<vmem>>, vector<16x32xf32>,
    %c0_8 = arith.constant 0 : index
    %c0_9 = arith.constant 0 : index
    %8 = vector.load %arg4[%c0_8, %c0_9] : memref<9x32xf32, #tpu.memory_space<vmem>>, vector<9x32xf32>
    %cst_10 = arith.constant 0.000000e+00 : f32
    %9 = vector.broadcast %cst_10 : f32 to vector<16x32xf32>
    %c0_11 = arith.constant 0 : index
    %c0_12 = arith.constant 0 : index
    %10 = vector.load %arg13[%c0_11, %c0_12] : memref<24x32xf32, #tpu.memory_space<vmem>>, vector<16x32xf32>
    %11 = vector.extract_strided_slice %8 {offsets = [0, 0], sizes = [1, 32], strides = [1, 1]} : vector<9x32xf32> to vector<1x32xf32>
    %12 = vector.shape_cast %11 : vector<1x32xf32> to vector<32xf32>
    %13 = vector.shape_cast %12 : vector<32xf32> to vector<1x32xf32>
    %14 = vector.broadcast %13 : vector<1x32xf32> to vector<16x32xf32>
    %15 = arith.mulf %10, %14 : vector<16x32xf32>
    %16 = arith.addf %9, %15 : vector<16x32xf32>
    %c1 = arith.constant 1 : index
    %c0_13 = arith.constant 0 : index
    %17 = vector.load %arg13[%c1, %c0_13] : memref<24x32xf32, #tpu.memory_space<vmem>>, vector<16x32xf32>
    %18 = vector.extract_strided_slice %8 {offsets = [1, 0], sizes = [1, 32], strides = [1, 1]} : vector<9x32xf32> to vector<1x32xf32>
    %19 = vector.shape_cast %18 : vector<1x32xf32> to vector<32xf32>
    %20 = vector.shape_cast %19 : vector<32xf32> to vector<1x32xf32>
    %21 = vector.broadcast %20 : vector<1x32xf32> to vector<16x32xf32>
    %22 = arith.mulf %17, %21 : vector<16x32xf32>
    %23 = arith.addf %16, %22 : vector<16x32xf32>
    %c2 = arith.constant 2 : index
    %c0_14 = arith.constant 0 : index
    %24 = vector.load %arg13[%c2, %c0_14] : memref<24x32xf32, #tpu.memory_space<vmem>>, vector<16x32xf32>
    %25 = vector.extract_strided_slice %8 {offsets = [2, 0], sizes = [1, 32], strides = [1, 1]} : vector<9x32xf32> to vector<1x32xf32>
    %26 = vector.shape_cast %25 : vector<1x32xf32> to vector<32xf32>
    %27 = vector.shape_cast %26 : vector<32xf32> to vector<1x32xf32>
    %28 = vector.broadcast %27 : vector<1x32xf32> to vector<16x32xf32>
    %29 = arith.mulf %24, %28 : vector<16x32xf32>
    %30 = arith.addf %23, %29 : vector<16x32xf32>
    %c3 = arith.constant 3 : index
    %c0_15 = arith.constant 0 : index
    %31 = vector.load %arg13[%c3, %c0_15] : memref<24x32xf32, #tpu.memory_space<vmem>>, vector<16x32xf32>
    %32 = vector.extract_strided_slice %8 {offsets = [3, 0], sizes = [1, 32], strides = [1, 1]} : vector<9x32xf32> to vector<1x32xf32>
    %33 = vector.shape_cast %32 : vector<1x32xf32> to vector<32xf32>
    %34 = vector.shape_cast %33 : vector<32xf32> to vector<1x32xf32>
    %35 = vector.broadcast %34 : vector<1x32xf32> to vector<16x32xf32>
    %36 = arith.mulf %31, %35 : vector<16x32xf32>
    %37 = arith.addf %30, %36 : vector<16x32xf32>
    %c4_16 = arith.constant 4 : index
    %c0_17 = arith.constant 0 : index
    %38 = vector.load %arg13[%c4_16, %c0_17] : memref<24x32xf32, #tpu.memory_space<vmem>>, vector<16x32xf32>
    %39 = vector.extract_strided_slice %8 {offsets = [4, 0], sizes = [1, 32], strides = [1, 1]} : vector<9x32xf32> to vector<1x32xf32>
    %40 = vector.shape_cast %39 : vector<1x32xf32> to vector<32xf32>
    %41 = vector.shape_cast %40 : vector<32xf32> to vector<1x32xf32>
    %42 = vector.broadcast %41 : vector<1x32xf32> to vector<16x32xf32>
    %43 = arith.mulf %38, %42 : vector<16x32xf32>
    %44 = arith.addf %37, %43 : vector<16x32xf32>
    %c5 = arith.constant 5 : index
    %c0_18 = arith.constant 0 : index
    %45 = vector.load %arg13[%c5, %c0_18] : memref<24x32xf32, #tpu.memory_space<vmem>>, vector<16x32xf32>
    %46 = vector.extract_strided_slice %8 {offsets = [5, 0], sizes = [1, 32], strides = [1, 1]} : vector<9x32xf32> to vector<1x32xf32>
    %47 = vector.shape_cast %46 : vector<1x32xf32> to vector<32xf32>
    %48 = vector.shape_cast %47 : vector<32xf32> to vector<1x32xf32>
    %49 = vector.broadcast %48 : vector<1x32xf32> to vector<16x32xf32>
    %50 = arith.mulf %45, %49 : vector<16x32xf32>
    %51 = arith.addf %44, %50 : vector<16x32xf32>
    %c6 = arith.constant 6 : index
    %c0_19 = arith.constant 0 : index
    %52 = vector.load %arg13[%c6, %c0_19] : memref<24x32xf32, #tpu.memory_space<vmem>>, vector<16x32xf32>
    %53 = vector.extract_strided_slice %8 {offsets = [6, 0], sizes = [1, 32], strides = [1, 1]} : vector<9x32xf32> to vector<1x32xf32>
    %54 = vector.shape_cast %53 : vector<1x32xf32> to vector<32xf32>
    %55 = vector.shape_cast %54 : vector<32xf32> to vector<1x32xf32>
    %56 = vector.broadcast %55 : vector<1x32xf32> to vector<16x32xf32>
    %57 = arith.mulf %52, %56 : vector<16x32xf32>
    %58 = arith.addf %51, %57 : vector<16x32xf32>
    %c7 = arith.constant 7 : index
    %c0_20 = arith.constant 0 : index
    %59 = vector.load %arg13[%c7, %c0_20] : memref<24x32xf32, #tpu.memory_space<vmem>>, vector<16x32xf32>
    %60 = vector.extract_strided_slice %8 {offsets = [7, 0], sizes = [1, 32], strides = [1, 1]} : vector<9x32xf32> to vector<1x32xf32>
    %61 = vector.shape_cast %60 : vector<1x32xf32> to vector<32xf32>
    %62 = vector.shape_cast %61 : vector<32xf32> to vector<1x32xf32>
    %63 = vector.broadcast %62 : vector<1x32xf32> to vector<16x32xf32>
    %64 = arith.mulf %59, %63 : vector<16x32xf32>
    %65 = arith.addf %58, %64 : vector<16x32xf32>
    %c8 = arith.constant 8 : index
    %c0_21 = arith.constant 0 : index
    %66 = vector.load %arg13[%c8, %c0_21] : memref<24x32xf32, #tpu.memory_space<vmem>>, vector<16x32xf32>
    %67 = vector.extract_strided_slice %8 {offsets = [8, 0], sizes = [1, 32], strides = [1, 1]} : vector<9x32xf32> to vector<1x32xf32>
    %68 = vector.shape_cast %67 : vector<1x32xf32> to vector<32xf32>
    %69 = vector.shape_cast %68 : vector<32xf32> to vector<1x32xf32>
    %70 = vector.broadcast %69 : vector<1x32xf32> to vector<16x32xf32>
    %71 = arith.mulf %66, %70 : vector<16x32xf32>
    %72 = arith.addf %65, %71 : vector<16x32xf32>
    %c0_22 = arith.constant 0 : index
    %c0_23 = arith.constant 0 : index
    %73 = vector.load %arg5[%c0_22, %c0_23] : memref<1x32xf32, #tpu.memory_space<vmem>>, vector<1x32xf32>
    %74 = vector.broadcast %73 : vector<1x32xf32> to vector<16x32xf32>
    %75 = arith.addf %72, %74 : vector<16x32xf32>
    %c0_24 = arith.constant 0 : index
    %c0_25 = arith.constant 0 : index
    %c0_26 = arith.constant 0 : index
    %76 = vector.load %arg3[%c0_24, %c0_25, %c0_26] : memref<1x16x1xf32, #tpu.memory_space<vmem>>, vector<1x16x1xf32>
    %77 = vector.shape_cast %76 : vector<1x16x1xf32> to vector<16x1xf32>
    %78 = vector.broadcast %77 : vector<16x1xf32> to vector<16x32xf32>
    %79 = arith.mulf %75, %78 : vector<16x32xf32>
    %80 = arith.addf %79, %1 : vector<16x32xf32>
    %cst_27 = arith.constant dense<0.000000e+00> : vector<16xf32>
    %81 = vector.multi_reduction <add>, %80, %cst_27 [1] : vector<16x32xf32> to vector<16xf32>
    %82 = vector.shape_cast %81 : vector<16xf32> to vector<16x1xf32>
    %cst_28 = arith.constant 3.200000e+01 : f32
    %83 = vector.broadcast %cst_28 : f32 to vector<16x1xf32>
    %84 = arith.divf %82, %83 : vector<16x1xf32>
    %85 = vector.broadcast %84 : vector<16x1xf32> to vector<16x32xf32>
    %86 = arith.subf %80, %85 : vector<16x32xf32>
    %87 = arith.mulf %86, %86 : vector<16x32xf32>
    %cst_29 = arith.constant dense<0.000000e+00> : vector<16xf32>
    %88 = vector.multi_reduction <add>, %87, %cst_29 [1] : vector<16x32xf32> to vector<16xf32>
    %89 = vector.shape_cast %88 : vector<16xf32> to vector<16x1xf32>
    %cst_30 = arith.constant 3.200000e+01 : f32
    %90 = vector.broadcast %cst_30 : f32 to vector<16x1xf32>
    %91 = arith.divf %89, %90 : vector<16x1xf32>
    %92 = vector.broadcast %84 : vector<16x1xf32> to vector<16x32xf32>
    %93 = arith.subf %80, %92 : vector<16x32xf32>
    %cst_31 = arith.constant 9.99999997E-7 : f32
    %94 = vector.broadcast %cst_31 : f32 to vector<16x1xf32>
    %95 = arith.addf %91, %94 : vector<16x1xf32>
    %96 = math.rsqrt %95 : vector<16x1xf32>
    %97 = vector.broadcast %96 : vector<16x1xf32> to vector<16x32xf32>
    %98 = arith.mulf %93, %97 : vector<16x32xf32>
    %c0_32 = arith.constant 0 : index
    %c0_33 = arith.constant 0 : index
    %99 = vector.load %arg6[%c0_32, %c0_33] : memref<1x32xf32, #tpu.memory_space<vmem>>, vector<1x32xf32>
    %100 = vector.broadcast %99 : vector<1x32xf32> to vector<16x32xf32>
    %101 = arith.mulf %98, %100 : vector<16x32xf32>
    %c0_34 = arith.constant 0 : index
    %c0_35 = arith.constant 0 : index
    %102 = vector.load %arg7[%c0_34, %c0_35] : memref<1x32xf32, #tpu.memory_space<vmem>>, vector<1x32xf32>
    %103 = vector.broadcast %102 : vector<1x32xf32> to vector<16x32xf32>
    %104 = arith.addf %101, %103 : vector<16x32xf32>
    %c0_36 = arith.constant 0 : index
    %c0_37 = arith.constant 0 : index
    %105 = vector.load %arg8[%c0_36, %c0_37] : memref<32x128xf32, #tpu.memory_space<vmem>>, vector<32x128xf32>
    %cst_38 = arith.constant dense<0.000000e+00> : vector<16x128xf32>
    %106 = tpu.matmul %104, %105, %cst_38 {dimension_numbers = #tpu.dot_dimension_numbers<[1], [0], [0], [1], [0, 0, 1, 1], [], []>} : vector<16x32xf32>, vector<32x128xf32>, vector<16x128xf32> -> vector<16x128xf32>
    %c0_39 = arith.constant 0 : index
    %c0_40 = arith.constant 0 : index
    %107 = vector.load %arg9[%c0_39, %c0_40] : memref<1x128xf32, #tpu.memory_space<vmem>>, vector<1x128xf32>
    %108 = vector.broadcast %107 : vector<1x128xf32> to vector<16x128xf32>
    %109 = arith.addf %106, %108 : vector<16x128xf32>
    %110 = arith.mulf %109, %109 : vector<16x128xf32>
    %111 = arith.mulf %109, %110 : vector<16x128xf32>
    %cst_41 = arith.constant 4.471500e-02 : f32
    %112 = vector.broadcast %cst_41 : f32 to vector<16x128xf32>
    %113 = arith.mulf %112, %111 : vector<16x128xf32>
    %114 = arith.addf %109, %113 : vector<16x128xf32>
    %cst_42 = arith.constant 0.797884583 : f32
    %115 = vector.broadcast %cst_42 : f32 to vector<16x128xf32>
    %116 = arith.mulf %115, %114 : vector<16x128xf32>
    %117 = math.tanh %116 : vector<16x128xf32>
    %cst_43 = arith.constant 1.000000e+00 : f32
    %118 = vector.broadcast %cst_43 : f32 to vector<16x128xf32>
    %119 = arith.addf %118, %117 : vector<16x128xf32>
    %cst_44 = arith.constant 5.000000e-01 : f32
    %120 = vector.broadcast %cst_44 : f32 to vector<16x128xf32>
    %121 = arith.mulf %120, %119 : vector<16x128xf32>
    %122 = arith.mulf %109, %121 : vector<16x128xf32>
    %c0_45 = arith.constant 0 : index
    %c0_46 = arith.constant 0 : index
    %123 = vector.load %arg10[%c0_45, %c0_46] : memref<128x32xf32, #tpu.memory_space<vmem>>, vector<128x32xf32>
    %cst_47 = arith.constant dense<0.000000e+00> : vector<16x32xf32>
    %124 = tpu.matmul %122, %123, %cst_47 {dimension_numbers = #tpu.dot_dimension_numbers<[1], [0], [0], [1], [0, 0, 1, 1], [], []>} : vector<16x128xf32>, vector<128x32xf32>, vector<16x32xf32> -> vector<16x32xf32>
    %c0_48 = arith.constant 0 : index
    %c0_49 = arith.constant 0 : index
    %125 = vector.load %arg11[%c0_48, %c0_49] : memref<1x32xf32, #tpu.memory_space<vmem>>, vector<1x32xf32>
    %126 = vector.broadcast %125 : vector<1x32xf32> to vector<16x32xf32>
    %127 = arith.addf %124, %126 : vector<16x32xf32>
    %128 = arith.addf %104, %127 : vector<16x32xf32>
    %129 = vector.shape_cast %128 : vector<16x32xf32> to vector<1x16x32xf32>
    %c0_50 = arith.constant 0 : index
    %c0_51 = arith.constant 0 : index
    %c0_52 = arith.constant 0 : index
    %130 = vector.load %arg12[%c0_50, %c0_51, %c0_52] : memref<1x16x32xf32, #tpu.memory_space<vmem>>, vector<1x16x32xf32>
    tpu.vector_store %arg12[%c0_50, %c0_51, %c0_52], %129 {strides = array<i32>} : memref<1x16x32xf32, #tpu.memory_space<vmem>>, vector<1x16x32xf32>,
    return
  }
  func.func @transform_0(%arg0: i32) -> (i32, i32, i32) {
    %c0_i32 = arith.constant 0 : i32
    %c0_i32_0 = arith.constant 0 : i32
    %c0_i32_1 = arith.constant 0 : i32
    return %arg0, %c0_i32, %c0_i32_0 : i32, i32, i32
  }
  func.func @transform_1(%arg0: i32) -> (i32, i32, i32) {
    %c0_i32 = arith.constant 0 : i32
    %c0_i32_0 = arith.constant 0 : i32
    %c0_i32_1 = arith.constant 0 : i32
    return %arg0, %c0_i32, %c0_i32_0 : i32, i32, i32
  }
  func.func @transform_2(%arg0: i32) -> (i32, i32, i32) {
    %c0_i32 = arith.constant 0 : i32
    %c0_i32_0 = arith.constant 0 : i32
    %c0_i32_1 = arith.constant 0 : i32
    return %arg0, %c0_i32, %c0_i32_0 : i32, i32, i32
  }
  func.func @transform_3(%arg0: i32) -> (i32, i32) {
    %c0_i32 = arith.constant 0 : i32
    %c0_i32_0 = arith.constant 0 : i32
    %c0_i32_1 = arith.constant 0 : i32
    return %c0_i32, %c0_i32_0 : i32, i32
  }
  func.func @transform_4(%arg0: i32) -> (i32, i32) {
    %c0_i32 = arith.constant 0 : i32
    %c0_i32_0 = arith.constant 0 : i32
    %c0_i32_1 = arith.constant 0 : i32
    return %c0_i32, %c0_i32_0 : i32, i32
  }
  func.func @transform_5(%arg0: i32) -> (i32, i32) {
    %c0_i32 = arith.constant 0 : i32
    %c0_i32_0 = arith.constant 0 : i32
    %c0_i32_1 = arith.constant 0 : i32
    return %c0_i32, %c0_i32_0 : i32, i32
  }
  func.func @transform_6(%arg0: i32) -> (i32, i32) {
    %c0_i32 = arith.constant 0 : i32
    %c0_i32_0 = arith.constant 0 : i32
    %c0_i32_1 = arith.constant 0 : i32
    return %c0_i32, %c0_i32_0 : i32, i32
  }
  func.func @transform_7(%arg0: i32) -> (i32, i32) {
    %c0_i32 = arith.constant 0 : i32
    %c0_i32_0 = arith.constant 0 : i32
    %c0_i32_1 = arith.constant 0 : i32
    return %c0_i32, %c0_i32_0 : i32, i32
  }
  func.func @transform_8(%arg0: i32) -> (i32, i32) {
    %c0_i32 = arith.constant 0 : i32
    %c0_i32_0 = arith.constant 0 : i32
    %c0_i32_1 = arith.constant 0 : i32
    return %c0_i32, %c0_i32_0 : i32, i32
  }
  func.func @transform_9(%arg0: i32) -> (i32, i32) {
    %c0_i32 = arith.constant 0 : i32
    %c0_i32_0 = arith.constant 0 : i32
    %c0_i32_1 = arith.constant 0 : i32
    return %c0_i32, %c0_i32_0 : i32, i32
  }
  func.func @transform_10(%arg0: i32) -> (i32, i32) {
    %c0_i32 = arith.constant 0 : i32
    %c0_i32_0 = arith.constant 0 : i32
    %c0_i32_1 = arith.constant 0 : i32
    return %c0_i32, %c0_i32_0 : i32, i32
  }
  func.func @transform_11(%arg0: i32) -> (i32, i32, i32) {
    %c0_i32 = arith.constant 0 : i32
    %c0_i32_0 = arith.constant 0 : i32
    %c0_i32_1 = arith.constant 0 : i32
    return %arg0, %c0_i32, %c0_i32_0 : i32, i32, i32
  }
}

module attributes {stable_mosaic.version = 11 : i64} {
  func.func @kernel(%arg0: i32, %arg1: memref<1x16x32xf32, #tpu.memory_space<vmem>>, %arg2: memref<1x16x1xf32, #tpu.memory_space<vmem>>, %arg3: memref<7x32xf32, #tpu.memory_space<vmem>>, %arg4: memref<1x32xf32, #tpu.memory_space<vmem>>, %arg5: memref<1x32xf32, #tpu.memory_space<vmem>>, %arg6: memref<1x32xf32, #tpu.memory_space<vmem>>, %arg7: memref<32x128xf32, #tpu.memory_space<vmem>>, %arg8: memref<1x128xf32, #tpu.memory_space<vmem>>, %arg9: memref<128x32xf32, #tpu.memory_space<vmem>>, %arg10: memref<1x32xf32, #tpu.memory_space<vmem>>, %arg11: memref<1x16x32xf32, #tpu.memory_space<vmem>>, %arg12: memref<22x32xf32, #tpu.memory_space<vmem>>) attributes {dimension_semantics = [#tpu.dimension_semantics<parallel>], iteration_bounds = array<i64: 2>, scalar_prefetch = 0 : i64, scratch_operands = 1 : i64, tpu.core_type = #tpu.core_type<tc>, window_params = [{transform_indices = @transform_0, window_bounds = array<i64: 1, 16, 32>}, {transform_indices = @transform_1, window_bounds = array<i64: 1, 16, 1>}, {pipeline_mode = #tpu.pipeline_mode<synchronous>, transform_indices = @transform_2, window_bounds = array<i64: 7, 32>}, {pipeline_mode = #tpu.pipeline_mode<synchronous>, transform_indices = @transform_3, window_bounds = array<i64: 1, 32>}, {pipeline_mode = #tpu.pipeline_mode<synchronous>, transform_indices = @transform_4, window_bounds = array<i64: 1, 32>}, {pipeline_mode = #tpu.pipeline_mode<synchronous>, transform_indices = @transform_5, window_bounds = array<i64: 1, 32>}, {pipeline_mode = #tpu.pipeline_mode<synchronous>, transform_indices = @transform_6, window_bounds = array<i64: 32, 128>}, {pipeline_mode = #tpu.pipeline_mode<synchronous>, transform_indices = @transform_7, window_bounds = array<i64: 1, 128>}, {pipeline_mode = #tpu.pipeline_mode<synchronous>, transform_indices = @transform_8, window_bounds = array<i64: 128, 32>}, {pipeline_mode = #tpu.pipeline_mode<synchronous>, transform_indices = @transform_9, window_bounds = array<i64: 1, 32>}, {transform_indices = @transform_10, window_bounds = array<i64: 1, 16, 32>}]} {
    %c0 = arith.constant 0 : index
    %c0_0 = arith.constant 0 : index
    %c0_1 = arith.constant 0 : index
    %0 = vector.load %arg1[%c0, %c0_0, %c0_1] : memref<1x16x32xf32, #tpu.memory_space<vmem>>, vector<1x16x32xf32>
    %1 = vector.shape_cast %0 : vector<1x16x32xf32> to vector<16x32xf32>
    %cst = arith.constant 0.000000e+00 : f32
    %2 = vector.broadcast %cst : f32 to vector<22x32xf32>
    %c0_2 = arith.constant 0 : index
    %c0_3 = arith.constant 0 : index
    %3 = vector.load %arg12[%c0_2, %c0_3] : memref<22x32xf32, #tpu.memory_space<vmem>>, vector<22x32xf32>
    tpu.vector_store %arg12[%c0_2, %c0_3], %2 {strides = array<i32>} : memref<22x32xf32, #tpu.memory_space<vmem>>, vector<22x32xf32>,
    %c3 = arith.constant 3 : index
    %c0_4 = arith.constant 0 : index
    %4 = vector.load %arg12[%c3, %c0_4] : memref<22x32xf32, #tpu.memory_space<vmem>>, vector<16x32xf32>
    tpu.vector_store %arg12[%c3, %c0_4], %1 {strides = array<i32>} : memref<22x32xf32, #tpu.memory_space<vmem>>, vector<16x32xf32>,
    %c0_5 = arith.constant 0 : index
    %c0_6 = arith.constant 0 : index
    %5 = vector.load %arg3[%c0_5, %c0_6] : memref<7x32xf32, #tpu.memory_space<vmem>>, vector<7x32xf32>
    %cst_7 = arith.constant 0.000000e+00 : f32
    %6 = vector.broadcast %cst_7 : f32 to vector<16x32xf32>
    %c0_8 = arith.constant 0 : index
    %c0_9 = arith.constant 0 : index
    %7 = vector.load %arg12[%c0_8, %c0_9] : memref<22x32xf32, #tpu.memory_space<vmem>>, vector<16x32xf32>
    %8 = vector.extract_strided_slice %5 {offsets = [0, 0], sizes = [1, 32], strides = [1, 1]} : vector<7x32xf32> to vector<1x32xf32>
    %9 = vector.shape_cast %8 : vector<1x32xf32> to vector<32xf32>
    %10 = vector.shape_cast %9 : vector<32xf32> to vector<1x32xf32>
    %11 = vector.broadcast %10 : vector<1x32xf32> to vector<16x32xf32>
    %12 = arith.mulf %7, %11 : vector<16x32xf32>
    %13 = arith.addf %6, %12 : vector<16x32xf32>
    %c1 = arith.constant 1 : index
    %c0_10 = arith.constant 0 : index
    %14 = vector.load %arg12[%c1, %c0_10] : memref<22x32xf32, #tpu.memory_space<vmem>>, vector<16x32xf32>
    %15 = vector.extract_strided_slice %5 {offsets = [1, 0], sizes = [1, 32], strides = [1, 1]} : vector<7x32xf32> to vector<1x32xf32>
    %16 = vector.shape_cast %15 : vector<1x32xf32> to vector<32xf32>
    %17 = vector.shape_cast %16 : vector<32xf32> to vector<1x32xf32>
    %18 = vector.broadcast %17 : vector<1x32xf32> to vector<16x32xf32>
    %19 = arith.mulf %14, %18 : vector<16x32xf32>
    %20 = arith.addf %13, %19 : vector<16x32xf32>
    %c2 = arith.constant 2 : index
    %c0_11 = arith.constant 0 : index
    %21 = vector.load %arg12[%c2, %c0_11] : memref<22x32xf32, #tpu.memory_space<vmem>>, vector<16x32xf32>
    %22 = vector.extract_strided_slice %5 {offsets = [2, 0], sizes = [1, 32], strides = [1, 1]} : vector<7x32xf32> to vector<1x32xf32>
    %23 = vector.shape_cast %22 : vector<1x32xf32> to vector<32xf32>
    %24 = vector.shape_cast %23 : vector<32xf32> to vector<1x32xf32>
    %25 = vector.broadcast %24 : vector<1x32xf32> to vector<16x32xf32>
    %26 = arith.mulf %21, %25 : vector<16x32xf32>
    %27 = arith.addf %20, %26 : vector<16x32xf32>
    %c3_12 = arith.constant 3 : index
    %c0_13 = arith.constant 0 : index
    %28 = vector.load %arg12[%c3_12, %c0_13] : memref<22x32xf32, #tpu.memory_space<vmem>>, vector<16x32xf32>
    %29 = vector.extract_strided_slice %5 {offsets = [3, 0], sizes = [1, 32], strides = [1, 1]} : vector<7x32xf32> to vector<1x32xf32>
    %30 = vector.shape_cast %29 : vector<1x32xf32> to vector<32xf32>
    %31 = vector.shape_cast %30 : vector<32xf32> to vector<1x32xf32>
    %32 = vector.broadcast %31 : vector<1x32xf32> to vector<16x32xf32>
    %33 = arith.mulf %28, %32 : vector<16x32xf32>
    %34 = arith.addf %27, %33 : vector<16x32xf32>
    %c4 = arith.constant 4 : index
    %c0_14 = arith.constant 0 : index
    %35 = vector.load %arg12[%c4, %c0_14] : memref<22x32xf32, #tpu.memory_space<vmem>>, vector<16x32xf32>
    %36 = vector.extract_strided_slice %5 {offsets = [4, 0], sizes = [1, 32], strides = [1, 1]} : vector<7x32xf32> to vector<1x32xf32>
    %37 = vector.shape_cast %36 : vector<1x32xf32> to vector<32xf32>
    %38 = vector.shape_cast %37 : vector<32xf32> to vector<1x32xf32>
    %39 = vector.broadcast %38 : vector<1x32xf32> to vector<16x32xf32>
    %40 = arith.mulf %35, %39 : vector<16x32xf32>
    %41 = arith.addf %34, %40 : vector<16x32xf32>
    %c5 = arith.constant 5 : index
    %c0_15 = arith.constant 0 : index
    %42 = vector.load %arg12[%c5, %c0_15] : memref<22x32xf32, #tpu.memory_space<vmem>>, vector<16x32xf32>
    %43 = vector.extract_strided_slice %5 {offsets = [5, 0], sizes = [1, 32], strides = [1, 1]} : vector<7x32xf32> to vector<1x32xf32>
    %44 = vector.shape_cast %43 : vector<1x32xf32> to vector<32xf32>
    %45 = vector.shape_cast %44 : vector<32xf32> to vector<1x32xf32>
    %46 = vector.broadcast %45 : vector<1x32xf32> to vector<16x32xf32>
    %47 = arith.mulf %42, %46 : vector<16x32xf32>
    %48 = arith.addf %41, %47 : vector<16x32xf32>
    %c6 = arith.constant 6 : index
    %c0_16 = arith.constant 0 : index
    %49 = vector.load %arg12[%c6, %c0_16] : memref<22x32xf32, #tpu.memory_space<vmem>>, vector<16x32xf32>
    %50 = vector.extract_strided_slice %5 {offsets = [6, 0], sizes = [1, 32], strides = [1, 1]} : vector<7x32xf32> to vector<1x32xf32>
    %51 = vector.shape_cast %50 : vector<1x32xf32> to vector<32xf32>
    %52 = vector.shape_cast %51 : vector<32xf32> to vector<1x32xf32>
    %53 = vector.broadcast %52 : vector<1x32xf32> to vector<16x32xf32>
    %54 = arith.mulf %49, %53 : vector<16x32xf32>
    %55 = arith.addf %48, %54 : vector<16x32xf32>
    %c0_17 = arith.constant 0 : index
    %c0_18 = arith.constant 0 : index
    %56 = vector.load %arg4[%c0_17, %c0_18] : memref<1x32xf32, #tpu.memory_space<vmem>>, vector<1x32xf32>
    %57 = vector.broadcast %56 : vector<1x32xf32> to vector<16x32xf32>
    %58 = arith.addf %55, %57 : vector<16x32xf32>
    %c0_19 = arith.constant 0 : index
    %c0_20 = arith.constant 0 : index
    %c0_21 = arith.constant 0 : index
    %59 = vector.load %arg2[%c0_19, %c0_20, %c0_21] : memref<1x16x1xf32, #tpu.memory_space<vmem>>, vector<1x16x1xf32>
    %60 = vector.shape_cast %59 : vector<1x16x1xf32> to vector<16x1xf32>
    %61 = vector.broadcast %60 : vector<16x1xf32> to vector<16x32xf32>
    %62 = arith.mulf %58, %61 : vector<16x32xf32>
    %cst_22 = arith.constant dense<0.000000e+00> : vector<16xf32>
    %63 = vector.multi_reduction <add>, %62, %cst_22 [1] : vector<16x32xf32> to vector<16xf32>
    %64 = vector.shape_cast %63 : vector<16xf32> to vector<16x1xf32>
    %cst_23 = arith.constant 3.200000e+01 : f32
    %65 = vector.broadcast %cst_23 : f32 to vector<16x1xf32>
    %66 = arith.divf %64, %65 : vector<16x1xf32>
    %67 = vector.broadcast %66 : vector<16x1xf32> to vector<16x32xf32>
    %68 = arith.subf %62, %67 : vector<16x32xf32>
    %69 = arith.mulf %68, %68 : vector<16x32xf32>
    %cst_24 = arith.constant dense<0.000000e+00> : vector<16xf32>
    %70 = vector.multi_reduction <add>, %69, %cst_24 [1] : vector<16x32xf32> to vector<16xf32>
    %71 = vector.shape_cast %70 : vector<16xf32> to vector<16x1xf32>
    %cst_25 = arith.constant 3.200000e+01 : f32
    %72 = vector.broadcast %cst_25 : f32 to vector<16x1xf32>
    %73 = arith.divf %71, %72 : vector<16x1xf32>
    %74 = vector.broadcast %66 : vector<16x1xf32> to vector<16x32xf32>
    %75 = arith.subf %62, %74 : vector<16x32xf32>
    %cst_26 = arith.constant 9.99999997E-7 : f32
    %76 = vector.broadcast %cst_26 : f32 to vector<16x1xf32>
    %77 = arith.addf %73, %76 : vector<16x1xf32>
    %78 = math.rsqrt %77 : vector<16x1xf32>
    %79 = vector.broadcast %78 : vector<16x1xf32> to vector<16x32xf32>
    %80 = arith.mulf %75, %79 : vector<16x32xf32>
    %c0_27 = arith.constant 0 : index
    %c0_28 = arith.constant 0 : index
    %81 = vector.load %arg5[%c0_27, %c0_28] : memref<1x32xf32, #tpu.memory_space<vmem>>, vector<1x32xf32>
    %82 = vector.broadcast %81 : vector<1x32xf32> to vector<16x32xf32>
    %83 = arith.mulf %80, %82 : vector<16x32xf32>
    %c0_29 = arith.constant 0 : index
    %c0_30 = arith.constant 0 : index
    %84 = vector.load %arg6[%c0_29, %c0_30] : memref<1x32xf32, #tpu.memory_space<vmem>>, vector<1x32xf32>
    %85 = vector.broadcast %84 : vector<1x32xf32> to vector<16x32xf32>
    %86 = arith.addf %83, %85 : vector<16x32xf32>
    %c0_31 = arith.constant 0 : index
    %c0_32 = arith.constant 0 : index
    %87 = vector.load %arg7[%c0_31, %c0_32] : memref<32x128xf32, #tpu.memory_space<vmem>>, vector<32x128xf32>
    %cst_33 = arith.constant dense<0.000000e+00> : vector<16x128xf32>
    %88 = tpu.matmul %86, %87, %cst_33 {dimension_numbers = #tpu.dot_dimension_numbers<[1], [0], [0], [1], [0, 0, 1, 1], [], []>} : vector<16x32xf32>, vector<32x128xf32>, vector<16x128xf32> -> vector<16x128xf32>
    %c0_34 = arith.constant 0 : index
    %c0_35 = arith.constant 0 : index
    %89 = vector.load %arg8[%c0_34, %c0_35] : memref<1x128xf32, #tpu.memory_space<vmem>>, vector<1x128xf32>
    %90 = vector.broadcast %89 : vector<1x128xf32> to vector<16x128xf32>
    %91 = arith.addf %88, %90 : vector<16x128xf32>
    %92 = arith.mulf %91, %91 : vector<16x128xf32>
    %93 = arith.mulf %91, %92 : vector<16x128xf32>
    %cst_36 = arith.constant 4.471500e-02 : f32
    %94 = vector.broadcast %cst_36 : f32 to vector<16x128xf32>
    %95 = arith.mulf %94, %93 : vector<16x128xf32>
    %96 = arith.addf %91, %95 : vector<16x128xf32>
    %cst_37 = arith.constant 0.797884583 : f32
    %97 = vector.broadcast %cst_37 : f32 to vector<16x128xf32>
    %98 = arith.mulf %97, %96 : vector<16x128xf32>
    %99 = math.tanh %98 : vector<16x128xf32>
    %cst_38 = arith.constant 1.000000e+00 : f32
    %100 = vector.broadcast %cst_38 : f32 to vector<16x128xf32>
    %101 = arith.addf %100, %99 : vector<16x128xf32>
    %cst_39 = arith.constant 5.000000e-01 : f32
    %102 = vector.broadcast %cst_39 : f32 to vector<16x128xf32>
    %103 = arith.mulf %102, %101 : vector<16x128xf32>
    %104 = arith.mulf %91, %103 : vector<16x128xf32>
    %c0_40 = arith.constant 0 : index
    %c0_41 = arith.constant 0 : index
    %105 = vector.load %arg9[%c0_40, %c0_41] : memref<128x32xf32, #tpu.memory_space<vmem>>, vector<128x32xf32>
    %cst_42 = arith.constant dense<0.000000e+00> : vector<16x32xf32>
    %106 = tpu.matmul %104, %105, %cst_42 {dimension_numbers = #tpu.dot_dimension_numbers<[1], [0], [0], [1], [0, 0, 1, 1], [], []>} : vector<16x128xf32>, vector<128x32xf32>, vector<16x32xf32> -> vector<16x32xf32>
    %c0_43 = arith.constant 0 : index
    %c0_44 = arith.constant 0 : index
    %107 = vector.load %arg10[%c0_43, %c0_44] : memref<1x32xf32, #tpu.memory_space<vmem>>, vector<1x32xf32>
    %108 = vector.broadcast %107 : vector<1x32xf32> to vector<16x32xf32>
    %109 = arith.addf %106, %108 : vector<16x32xf32>
    %110 = arith.addf %1, %109 : vector<16x32xf32>
    %111 = vector.shape_cast %110 : vector<16x32xf32> to vector<1x16x32xf32>
    %c0_45 = arith.constant 0 : index
    %c0_46 = arith.constant 0 : index
    %c0_47 = arith.constant 0 : index
    %112 = vector.load %arg11[%c0_45, %c0_46, %c0_47] : memref<1x16x32xf32, #tpu.memory_space<vmem>>, vector<1x16x32xf32>
    tpu.vector_store %arg11[%c0_45, %c0_46, %c0_47], %111 {strides = array<i32>} : memref<1x16x32xf32, #tpu.memory_space<vmem>>, vector<1x16x32xf32>,
    return
  }
  func.func @transform_0(%arg0: i32) -> (i32, i32, i32) {
    %c0_i32 = arith.constant 0 : i32
    %c0_i32_0 = arith.constant 0 : i32
    %c0_i32_1 = arith.constant 0 : i32
    return %arg0, %c0_i32, %c0_i32_0 : i32, i32, i32
  }
  func.func @transform_1(%arg0: i32) -> (i32, i32, i32) {
    %c0_i32 = arith.constant 0 : i32
    %c0_i32_0 = arith.constant 0 : i32
    %c0_i32_1 = arith.constant 0 : i32
    return %arg0, %c0_i32, %c0_i32_0 : i32, i32, i32
  }
  func.func @transform_2(%arg0: i32) -> (i32, i32) {
    %c0_i32 = arith.constant 0 : i32
    %c0_i32_0 = arith.constant 0 : i32
    %c0_i32_1 = arith.constant 0 : i32
    return %c0_i32, %c0_i32_0 : i32, i32
  }
  func.func @transform_3(%arg0: i32) -> (i32, i32) {
    %c0_i32 = arith.constant 0 : i32
    %c0_i32_0 = arith.constant 0 : i32
    %c0_i32_1 = arith.constant 0 : i32
    return %c0_i32, %c0_i32_0 : i32, i32
  }
  func.func @transform_4(%arg0: i32) -> (i32, i32) {
    %c0_i32 = arith.constant 0 : i32
    %c0_i32_0 = arith.constant 0 : i32
    %c0_i32_1 = arith.constant 0 : i32
    return %c0_i32, %c0_i32_0 : i32, i32
  }
  func.func @transform_5(%arg0: i32) -> (i32, i32) {
    %c0_i32 = arith.constant 0 : i32
    %c0_i32_0 = arith.constant 0 : i32
    %c0_i32_1 = arith.constant 0 : i32
    return %c0_i32, %c0_i32_0 : i32, i32
  }
  func.func @transform_6(%arg0: i32) -> (i32, i32) {
    %c0_i32 = arith.constant 0 : i32
    %c0_i32_0 = arith.constant 0 : i32
    %c0_i32_1 = arith.constant 0 : i32
    return %c0_i32, %c0_i32_0 : i32, i32
  }
  func.func @transform_7(%arg0: i32) -> (i32, i32) {
    %c0_i32 = arith.constant 0 : i32
    %c0_i32_0 = arith.constant 0 : i32
    %c0_i32_1 = arith.constant 0 : i32
    return %c0_i32, %c0_i32_0 : i32, i32
  }
  func.func @transform_8(%arg0: i32) -> (i32, i32) {
    %c0_i32 = arith.constant 0 : i32
    %c0_i32_0 = arith.constant 0 : i32
    %c0_i32_1 = arith.constant 0 : i32
    return %c0_i32, %c0_i32_0 : i32, i32
  }
  func.func @transform_9(%arg0: i32) -> (i32, i32) {
    %c0_i32 = arith.constant 0 : i32
    %c0_i32_0 = arith.constant 0 : i32
    %c0_i32_1 = arith.constant 0 : i32
    return %c0_i32, %c0_i32_0 : i32, i32
  }
  func.func @transform_10(%arg0: i32) -> (i32, i32, i32) {
    %c0_i32 = arith.constant 0 : i32
    %c0_i32_0 = arith.constant 0 : i32
    %c0_i32_1 = arith.constant 0 : i32
    return %arg0, %c0_i32, %c0_i32_0 : i32, i32, i32
  }
}

module attributes {stable_mosaic.version = 11 : i64} {
  func.func @kernel(%arg0: i32, %arg1: memref<32x32xf32, #tpu.memory_space<vmem>>, %arg2: memref<1x32xf32, #tpu.memory_space<vmem>>, %arg3: memref<1x32xf32, #tpu.memory_space<vmem>>, %arg4: memref<32x32xf32, #tpu.memory_space<vmem>>) attributes {dimension_semantics = [#tpu.dimension_semantics<parallel>], iteration_bounds = array<i64: 1>, scalar_prefetch = 0 : i64, scratch_operands = 0 : i64, tpu.core_type = #tpu.core_type<tc>, window_params = [{transform_indices = @transform_0, window_bounds = array<i64: 32, 32>}, {pipeline_mode = #tpu.pipeline_mode<synchronous>, transform_indices = @transform_1, window_bounds = array<i64: 1, 32>}, {pipeline_mode = #tpu.pipeline_mode<synchronous>, transform_indices = @transform_2, window_bounds = array<i64: 1, 32>}, {transform_indices = @transform_3, window_bounds = array<i64: 32, 32>}]} {
    %c0 = arith.constant 0 : index
    %c0_0 = arith.constant 0 : index
    %0 = vector.load %arg1[%c0, %c0_0] : memref<32x32xf32, #tpu.memory_space<vmem>>, vector<32x32xf32>
    %cst = arith.constant dense<0.000000e+00> : vector<32xf32>
    %1 = vector.multi_reduction <add>, %0, %cst [1] : vector<32x32xf32> to vector<32xf32>
    %2 = vector.shape_cast %1 : vector<32xf32> to vector<32x1xf32>
    %cst_1 = arith.constant 3.200000e+01 : f32
    %3 = vector.broadcast %cst_1 : f32 to vector<32x1xf32>
    %4 = arith.divf %2, %3 : vector<32x1xf32>
    %5 = vector.broadcast %4 : vector<32x1xf32> to vector<32x32xf32>
    %6 = arith.subf %0, %5 : vector<32x32xf32>
    %7 = arith.mulf %6, %6 : vector<32x32xf32>
    %cst_2 = arith.constant dense<0.000000e+00> : vector<32xf32>
    %8 = vector.multi_reduction <add>, %7, %cst_2 [1] : vector<32x32xf32> to vector<32xf32>
    %9 = vector.shape_cast %8 : vector<32xf32> to vector<32x1xf32>
    %cst_3 = arith.constant 3.200000e+01 : f32
    %10 = vector.broadcast %cst_3 : f32 to vector<32x1xf32>
    %11 = arith.divf %9, %10 : vector<32x1xf32>
    %12 = vector.broadcast %4 : vector<32x1xf32> to vector<32x32xf32>
    %13 = arith.subf %0, %12 : vector<32x32xf32>
    %cst_4 = arith.constant 9.99999974E-6 : f32
    %14 = vector.broadcast %cst_4 : f32 to vector<32x1xf32>
    %15 = arith.addf %11, %14 : vector<32x1xf32>
    %16 = math.rsqrt %15 : vector<32x1xf32>
    %17 = vector.broadcast %16 : vector<32x1xf32> to vector<32x32xf32>
    %18 = arith.mulf %13, %17 : vector<32x32xf32>
    %c0_5 = arith.constant 0 : index
    %c0_6 = arith.constant 0 : index
    %19 = vector.load %arg2[%c0_5, %c0_6] : memref<1x32xf32, #tpu.memory_space<vmem>>, vector<1x32xf32>
    %20 = vector.broadcast %19 : vector<1x32xf32> to vector<32x32xf32>
    %21 = arith.mulf %18, %20 : vector<32x32xf32>
    %c0_7 = arith.constant 0 : index
    %c0_8 = arith.constant 0 : index
    %22 = vector.load %arg3[%c0_7, %c0_8] : memref<1x32xf32, #tpu.memory_space<vmem>>, vector<1x32xf32>
    %23 = vector.broadcast %22 : vector<1x32xf32> to vector<32x32xf32>
    %24 = arith.addf %21, %23 : vector<32x32xf32>
    %c0_9 = arith.constant 0 : index
    %c0_10 = arith.constant 0 : index
    %25 = vector.load %arg4[%c0_9, %c0_10] : memref<32x32xf32, #tpu.memory_space<vmem>>, vector<32x32xf32>
    tpu.vector_store %arg4[%c0_9, %c0_10], %24 {strides = array<i32>} : memref<32x32xf32, #tpu.memory_space<vmem>>, vector<32x32xf32>,
    return
  }
  func.func @transform_0(%arg0: i32) -> (i32, i32) {
    %c0_i32 = arith.constant 0 : i32
    %c0_i32_0 = arith.constant 0 : i32
    return %arg0, %c0_i32 : i32, i32
  }
  func.func @transform_1(%arg0: i32) -> (i32, i32) {
    %c0_i32 = arith.constant 0 : i32
    %c0_i32_0 = arith.constant 0 : i32
    %c0_i32_1 = arith.constant 0 : i32
    return %c0_i32, %c0_i32_0 : i32, i32
  }
  func.func @transform_2(%arg0: i32) -> (i32, i32) {
    %c0_i32 = arith.constant 0 : i32
    %c0_i32_0 = arith.constant 0 : i32
    %c0_i32_1 = arith.constant 0 : i32
    return %c0_i32, %c0_i32_0 : i32, i32
  }
  func.func @transform_3(%arg0: i32) -> (i32, i32) {
    %c0_i32 = arith.constant 0 : i32
    %c0_i32_0 = arith.constant 0 : i32
    return %arg0, %c0_i32 : i32, i32
  }
}

</mosaic_0001>

<bundles_post_ra>
// kernel: deco_convnet_forward.37
= control target key start
LH: loop header
LB: loop body
LE: loop exit
PB: predicated region body
PF: predicated region fallthrough
CT: control target
= control target key end

     0   :  { %vm29_vm0 = vcmask 130048   ;;  %vm223_vm1 = vcmask 269312   ;;  %s461_s1 = inlined_call_operand.vmem [shape: f32[16,33], index: 1, kind: input, shape index: {}]   ;;  %s462_s0 = inlined_call_operand.vmem [shape: f32[128,16], index: 0, kind: input, shape index: {}]   ;;  %s463_s2 = inlined_call_operand.vmem [shape: f32[128,33], index: 2, kind: output, shape index: {}]  }
   0x1   :  { %v27_v0 = vld [vmem:[%s461_s1] sm:$0xff]  ;;  %v28_v1 = vld [vmem:[%s461_s1 + $0x8] sm:$0xff]  ;;  %v13_v7 = vld [vmem:[%s462_s0 + $0x10] sm:$0xff] }
   0x2   :  { %v11_v2 = vld [vmem:[%s462_s0] sm:$0xff]  ;;  %v306_v3 = vpack.c.bf16 %v28_v1, %v27_v0  ;;  %v12_v5 = vld [vmem:[%s462_s0 + $0x8] sm:$0xff]  ;;  %v21_v8 = vld [vmem:[%s462_s0 + $0x50] sm:$0xff] }
   0x3   :  { %282 = vmatprep.mubr.msk.f32.mxu0 %vm29_vm0, %v11_v2  ;;  %v19_v4 = vld [vmem:[%s462_s0 + $0x40] sm:$0xff]  ;;  %v20_v6 = vld [vmem:[%s462_s0 + $0x48] sm:$0xff]  ;;  %v14_v9 = vld [vmem:[%s462_s0 + $0x18] sm:$0xff] }
   0x4   :  { %294 = vmatprep.mubr.msk.f32.mxu1 %vm29_vm0, %v19_v4  ;;  %307 = vmatprep.subr.bf16.mxu0 %v306_v3  ;;  %v22_v10 = vld [vmem:[%s462_s0 + $0x58] sm:$0xff]  ;;  %v15_v11 = vld [vmem:[%s462_s0 + $0x20] sm:$0xff]  ;;  %v16_v13 = vld [vmem:[%s462_s0 + $0x28] sm:$0xff] }
   0x5   :  { %310 = vmatprep.subr.bf16.mxu1 %v306_v3  ;;  %309 = vmatpush3.bf16.msra.mxu0 %v306_v3  ;;  %v23_v12 = vld [vmem:[%s462_s0 + $0x60] sm:$0xff]  ;;  %v24_v14 = vld [vmem:[%s462_s0 + $0x68] sm:$0xff]  ;;  %v17_v15 = vld [vmem:[%s462_s0 + $0x30] sm:$0xff] }
   0x6   :  { %311 = vmatpush3.bf16.msra.mxu1 %v306_v3  ;;  %v25_v16 = vld [vmem:[%s462_s0 + $0x70] sm:$0xff]  ;;  %v18_v17 = vld [vmem:[%s462_s0 + $0x38] sm:$0xff] }
   0x7   :  { %v26_v18 = vld [vmem:[%s462_s0 + $0x78] sm:$0xff] }
   0x8   :  { %283 = vmatmul.mubr.msk.f32.vlgmr.msra.gmra.mrb[0].mxu0 %vm29_vm0, %v12_v5 }
   0x9   :  { %295 = vmatmul.mubr.msk.f32.vlgmr.msra.gmra.mrb[0].mxu1 %vm29_vm0, %v20_v6  ;;  %285 = vmatprep.mubr.msk.f32.mxu0 %vm29_vm0, %v13_v7 }
   0xa   :  { %297 = vmatprep.mubr.msk.f32.mxu1 %vm29_vm0, %v21_v8 }
   0xc   :  { %286 = vmatmul.mubr.msk.f32.gmra.mrb[2].mxu0 %vm29_vm0, %v14_v9 }
   0xd   :  { %298 = vmatmul.mubr.msk.f32.gmra.mrb[2].mxu1 %vm29_vm0, %v22_v10  ;;  %288 = vmatprep.mubr.msk.f32.mxu0 %vm29_vm0, %v15_v11 }
   0xe   :  { %300 = vmatprep.mubr.msk.f32.mxu1 %vm29_vm0, %v23_v12 }
  0x10   :  { %289 = vmatmul.mubr.msk.f32.gmra.mrb[4].mxu0 %vm29_vm0, %v16_v13 }
  0x11   :  { %301 = vmatmul.mubr.msk.f32.gmra.mrb[4].mxu1 %vm29_vm0, %v24_v14  ;;  %291 = vmatprep.mubr.msk.f32.mxu0 %vm29_vm0, %v17_v15 }
  0x12   :  { %303 = vmatprep.mubr.msk.f32.mxu1 %vm29_vm0, %v25_v16 }
  0x14   :  { %292 = vmatmul.mubr.msk.f32.gmra.mrb[6].mxu0 %vm29_vm0, %v18_v17 }
  0x15   :  { %304 = vmatmul.mubr.msk.f32.gmra.mrb[6].mxu1 %vm29_vm0, %v26_v18 }
  0xdb   :  { %v284_v19 = vpop.f32.mrb[0].mxu0 }
  0xdc   :  { %v296_v20 = vpop.f32.mrb[0].mxu1  ;;  %225 = vst.msk [vmem:[%s463_s2 + $0x8] sm:$0xff] %vm223_vm1, %v284_v19  ;;  %v144_v21 = vpop.f32.mrb[1].mxu0 }
  0xdd   :  { %233 = vst.msk [vmem:[%s463_s2 + $0x48] sm:$0xff] %vm223_vm1, %v296_v20  ;;  %v184_v22 = vpop.f32.mrb[1].mxu1  ;;  %224 = vst.msk [vmem:[%s463_s2] sm:$0xff] %vm223_vm1, %v144_v21 }
  0xde   :  { %232 = vst.msk [vmem:[%s463_s2 + $0x40] sm:$0xff] %vm223_vm1, %v184_v22 }
  0xdf   :  { %v287_v23 = vpop.f32.mrb[2].mxu0 }
  0xe0   :  { %v299_v24 = vpop.f32.mrb[2].mxu1  ;;  %227 = vst.msk [vmem:[%s463_s2 + $0x18] sm:$0xff] %vm223_vm1, %v287_v23  ;;  %v154_v25 = vpop.f32.mrb[3].mxu0 }
  0xe1   :  { %235 = vst.msk [vmem:[%s463_s2 + $0x58] sm:$0xff] %vm223_vm1, %v299_v24  ;;  %v194_v26 = vpop.f32.mrb[3].mxu1  ;;  %226 = vst.msk [vmem:[%s463_s2 + $0x10] sm:$0xff] %vm223_vm1, %v154_v25 }
  0xe2   :  { %234 = vst.msk [vmem:[%s463_s2 + $0x50] sm:$0xff] %vm223_vm1, %v194_v26 }
  0xe3   :  { %v290_v27 = vpop.f32.mrb[4].mxu0 }
  0xe4   :  { %v302_v28 = vpop.f32.mrb[4].mxu1  ;;  %229 = vst.msk [vmem:[%s463_s2 + $0x28] sm:$0xff] %vm223_vm1, %v290_v27  ;;  %v164_v29 = vpop.f32.mrb[5].mxu0 }
  0xe5   :  { %237 = vst.msk [vmem:[%s463_s2 + $0x68] sm:$0xff] %vm223_vm1, %v302_v28  ;;  %v204_v30 = vpop.f32.mrb[5].mxu1  ;;  %228 = vst.msk [vmem:[%s463_s2 + $0x20] sm:$0xff] %vm223_vm1, %v164_v29 }
  0xe6   :  { %236 = vst.msk [vmem:[%s463_s2 + $0x60] sm:$0xff] %vm223_vm1, %v204_v30 }
  0xe7   :  { %v293_v31 = vpop.f32.mrb[6].mxu0 }
  0xe8   :  { %v305_v32 = vpop.f32.mrb[6].mxu1  ;;  %231 = vst.msk [vmem:[%s463_s2 + $0x38] sm:$0xff] %vm223_vm1, %v293_v31  ;;  %v174_v33 = vpop.f32.mrb[7].mxu0 }
  0xe9   :  { %239 = vst.msk [vmem:[%s463_s2 + $0x78] sm:$0xff] %vm223_vm1, %v305_v32  ;;  %v214_v34 = vpop.f32.mrb[7].mxu1  ;;  %230 = vst.msk [vmem:[%s463_s2 + $0x30] sm:$0xff] %vm223_vm1, %v174_v33 }
  0xea   :  { %238 = vst.msk [vmem:[%s463_s2 + $0x70] sm:$0xff] %vm223_vm1, %v214_v34 }

// kernel: deco_convnet_forward.35
= control target key start
LH: loop header
LB: loop body
LE: loop exit
PB: predicated region body
PF: predicated region fallthrough
CT: control target
= control target key end

     0   :  { %vm28_vm0 = vcmask 64512   ;;  %vm222_vm1 = vcmask 261120   ;;  %s450_s1 = inlined_call_operand.vmem [shape: f32[8,32], index: 1, kind: input, shape index: {}]   ;;  %s451_s0 = inlined_call_operand.vmem [shape: f32[128,8], index: 0, kind: input, shape index: {}]   ;;  %s452_s2 = inlined_call_operand.vmem [shape: f32[128,32], index: 2, kind: output, shape index: {}]  }
   0x1   :  { %v27_v0 = vld [vmem:[%s450_s1] sm:$0xff]  ;;  %v12_v3 = vld [vmem:[%s451_s0 + $0x8] sm:$0xff]  ;;  %v13_v5 = vld [vmem:[%s451_s0 + $0x10] sm:$0xff] }
   0x2   :  { %v11_v1 = vld [vmem:[%s451_s0] sm:$0xff]  ;;  %276 = vmatprep.subr.mxu0 %v27_v0  ;;  %302 = vmatprep.subr.mxu1 %v27_v0  ;;  %v20_v4 = vld [vmem:[%s451_s0 + $0x48] sm:$0xff]  ;;  %v21_v6 = vld [vmem:[%s451_s0 + $0x50] sm:$0xff] }
   0x3   :  { %v19_v2 = vld [vmem:[%s451_s0 + $0x40] sm:$0xff]  ;;  %277 = vmatpush3.msra.mxu0 %v27_v0  ;;  %303 = vmatpush3.msra.mxu1 %v27_v0  ;;  %v14_v7 = vld [vmem:[%s451_s0 + $0x18] sm:$0xff]  ;;  %v16_v11 = vld [vmem:[%s451_s0 + $0x28] sm:$0xff] }
   0x4   :  { %278 = vmatprep.mubr.msk.f32.mxu0 %vm28_vm0, %v11_v1  ;;  %290 = vmatprep.mubr.msk.f32.mxu1 %vm28_vm0, %v19_v2  ;;  %v22_v8 = vld [vmem:[%s451_s0 + $0x58] sm:$0xff]  ;;  %v15_v9 = vld [vmem:[%s451_s0 + $0x20] sm:$0xff]  ;;  %v24_v12 = vld [vmem:[%s451_s0 + $0x68] sm:$0xff] }
   0x5   :  { %279 = vmatmul.mubr.msk.f32.vlgmr.msra.gmra.mrb[0].mxu0 %vm28_vm0, %v12_v3  ;;  %291 = vmatmul.mubr.msk.f32.vlgmr.msra.gmra.mrb[0].mxu1 %vm28_vm0, %v20_v4  ;;  %v23_v10 = vld [vmem:[%s451_s0 + $0x60] sm:$0xff]  ;;  %v17_v13 = vld [vmem:[%s451_s0 + $0x30] sm:$0xff]  ;;  %v18_v15 = vld [vmem:[%s451_s0 + $0x38] sm:$0xff] }
   0x6   :  { %281 = vmatprep.mubr.msk.f32.mxu0 %vm28_vm0, %v13_v5  ;;  %293 = vmatprep.mubr.msk.f32.mxu1 %vm28_vm0, %v21_v6  ;;  %v25_v14 = vld [vmem:[%s451_s0 + $0x70] sm:$0xff]  ;;  %v26_v16 = vld [vmem:[%s451_s0 + $0x78] sm:$0xff] }
   0x9   :  { %282 = vmatmul.mubr.msk.f32.gmra.mrb[2].mxu0 %vm28_vm0, %v14_v7  ;;  %294 = vmatmul.mubr.msk.f32.gmra.mrb[2].mxu1 %vm28_vm0, %v22_v8 }
   0xa   :  { %284 = vmatprep.mubr.msk.f32.mxu0 %vm28_vm0, %v15_v9  ;;  %296 = vmatprep.mubr.msk.f32.mxu1 %vm28_vm0, %v23_v10 }
   0xd   :  { %285 = vmatmul.mubr.msk.f32.gmra.mrb[4].mxu0 %vm28_vm0, %v16_v11  ;;  %297 = vmatmul.mubr.msk.f32.gmra.mrb[4].mxu1 %vm28_vm0, %v24_v12 }
   0xe   :  { %287 = vmatprep.mubr.msk.f32.mxu0 %vm28_vm0, %v17_v13  ;;  %299 = vmatprep.mubr.msk.f32.mxu1 %vm28_vm0, %v25_v14 }
  0x11   :  { %288 = vmatmul.mubr.msk.f32.gmra.mrb[6].mxu0 %vm28_vm0, %v18_v15  ;;  %300 = vmatmul.mubr.msk.f32.gmra.mrb[6].mxu1 %vm28_vm0, %v26_v16 }
  0xd8   :  { %v280_v17 = vpop.f32.mrb[0].mxu0  ;;  %v292_v18 = vpop.f32.mrb[0].mxu1 }
  0xd9   :  { %224 = vst.msk [vmem:[%s452_s2 + $0x8] sm:$0xff] %vm222_vm1, %v280_v17  ;;  %232 = vst.msk [vmem:[%s452_s2 + $0x48] sm:$0xff] %vm222_vm1, %v292_v18  ;;  %v143_v19 = vpop.f32.mrb[1].mxu0  ;;  %v183_v20 = vpop.f32.mrb[1].mxu1 }
  0xda   :  { %223 = vst.msk [vmem:[%s452_s2] sm:$0xff] %vm222_vm1, %v143_v19  ;;  %231 = vst.msk [vmem:[%s452_s2 + $0x40] sm:$0xff] %vm222_vm1, %v183_v20 }
  0xdc   :  { %v283_v21 = vpop.f32.mrb[2].mxu0  ;;  %v295_v22 = vpop.f32.mrb[2].mxu1 }
  0xdd   :  { %226 = vst.msk [vmem:[%s452_s2 + $0x18] sm:$0xff] %vm222_vm1, %v283_v21  ;;  %234 = vst.msk [vmem:[%s452_s2 + $0x58] sm:$0xff] %vm222_vm1, %v295_v22  ;;  %v153_v23 = vpop.f32.mrb[3].mxu0  ;;  %v193_v24 = vpop.f32.mrb[3].mxu1 }
  0xde   :  { %225 = vst.msk [vmem:[%s452_s2 + $0x10] sm:$0xff] %vm222_vm1, %v153_v23  ;;  %233 = vst.msk [vmem:[%s452_s2 + $0x50] sm:$0xff] %vm222_vm1, %v193_v24 }
  0xe0   :  { %v286_v25 = vpop.f32.mrb[4].mxu0  ;;  %v298_v26 = vpop.f32.mrb[4].mxu1 }
  0xe1   :  { %228 = vst.msk [vmem:[%s452_s2 + $0x28] sm:$0xff] %vm222_vm1, %v286_v25  ;;  %236 = vst.msk [vmem:[%s452_s2 + $0x68] sm:$0xff] %vm222_vm1, %v298_v26  ;;  %v163_v27 = vpop.f32.mrb[5].mxu0  ;;  %v203_v28 = vpop.f32.mrb[5].mxu1 }
  0xe2   :  { %227 = vst.msk [vmem:[%s452_s2 + $0x20] sm:$0xff] %vm222_vm1, %v163_v27  ;;  %235 = vst.msk [vmem:[%s452_s2 + $0x60] sm:$0xff] %vm222_vm1, %v203_v28 }
  0xe4   :  { %v289_v29 = vpop.f32.mrb[6].mxu0  ;;  %v301_v30 = vpop.f32.mrb[6].mxu1 }
  0xe5   :  { %230 = vst.msk [vmem:[%s452_s2 + $0x38] sm:$0xff] %vm222_vm1, %v289_v29  ;;  %238 = vst.msk [vmem:[%s452_s2 + $0x78] sm:$0xff] %vm222_vm1, %v301_v30  ;;  %v173_v31 = vpop.f32.mrb[7].mxu0  ;;  %v213_v32 = vpop.f32.mrb[7].mxu1 }
  0xe6   :  { %229 = vst.msk [vmem:[%s452_s2 + $0x30] sm:$0xff] %vm222_vm1, %v173_v31  ;;  %237 = vst.msk [vmem:[%s452_s2 + $0x70] sm:$0xff] %vm222_vm1, %v213_v32 }

// kernel: deco_convnet_forward.36
= control target key start
LH: loop header
LB: loop body
LE: loop exit
PB: predicated region body
PF: predicated region fallthrough
CT: control target
= control target key end

     0   :  { %s361_s12 = smov 0   ;;  %s397_s0 = inlined_call_operand.vmem [shape: f32[8,16,16], index: 0, kind: input, shape index: {}]   ;;  %s398_s1 = inlined_call_operand.vmem [shape: f32[4,16], index: 1, kind: input, shape index: {}]   ;;  %s399_s2 = inlined_call_operand.vmem [shape: f32[1,16], index: 2, kind: input, shape index: {}]   ;;  %s400_s3 = inlined_call_operand.vmem [shape: f32[8,16,16], index: 3, kind: output, shape index: {}]  }
   0x1 LB: > { %s301_s13 = sadd.s32 4294967295, %s338_s12   ;;  %p305_p0 = scmp.ge.s32.totalorder %s338_s12, 1  ;;  %s338_s12 = sphi %s361_s12, %s13_s12  }
   0x2   : > { %p137_p1 = scmp.lt.s32.totalorder %s338_s12, 9 }
   0x4   : > { %p138_p2 = pnand %p305_p0, %p137_p1 }
   0x5   : > { %vm173_vm0 = vcmask (!%p138_p2), 130048   ;;  %vm176_vm1 = vcmask (!%p138_p2), 124928   ;;  %p161_p3 = scmp.lt.s32.totalorder (!%p138_p2), %s301_s13, 7  ;;  %v183_v0 = vlaneseq (!%p138_p2)  ;;  %v340_v1 = vmov (!%p138_p2), 0.0   ;;  %v180_v7 = vld [vmem:[%s398_s1] sm:$0xf] (!%p138_p2) }
   0x6   : > { %141 = sbr.rel (%p138_p2) target bundleno = 68 (0x44), region = 32  ;;  %174 = vst.msk [vmem:[#allocation2] sm:$0xff] (!%p138_p2), %vm173_vm0, %v340_v1  ;;  %175 = vst.msk [vmem:[#allocation2 + $0x8] sm:$0xff] (!%p138_p2), %vm173_vm0, %v340_v1  ;;  %v310_v32 = vld [vmem:[%s399_s2] ss:$0 sm:$0xff] (!%p138_p2) }
   0x7   : > { %177 = vst.msk [vmem:[#allocation2 + $0x10] sm:$0x7] (!%p138_p2), %vm176_vm1, %v340_v1  ;;  %v184_v2 = vshrl.u32 (!%p138_p2), %v183_v0, 7 }
   0x9   : > { %v185_v5 = vsub.s32 (!%p138_p2), 0, %v184_v2  ;;  %v195_v6 = vsub.s32 (!%p138_p2), 1, %v184_v2  ;;  %v205_v8 = vsub.s32 (!%p138_p2), 2, %v184_v2  ;;  %v215_v11 = vsub.s32 (!%p138_p2), 3, %v184_v2 }
   0xb   : > { %v186_v9 = vrot.slane (!%p138_p2), %v180_v7, %v185_v5  ;;  %v196_v10 = vrot.slane (!%p138_p2), %v180_v7, %v195_v6  ;;  %v206_v12 = vrot.slane (!%p138_p2), %v180_v7, %v205_v8  ;;  %v216_v18 = vrot.slane (!%p138_p2), %v180_v7, %v215_v11 }
   0xd   : > { %s402_s13 = smov (!%p161_p3, %s301_s13), 7 }
   0xe   : > { %s313_s14 = sshll.u32 %s402_s13, 4 }
   0xf   : > { %s165_s17 = scalar_lea.vmem %s397_s0, %s313_s14  ;;  %s170_s24 = scalar_lea.vmem %s400_s3, %s313_s14 }
  0x10   : > { %v171_v3 = vld [vmem:[%s165_s17] sm:$0xff]  ;;  %v172_v4 = vld [vmem:[%s165_s17 + $0x8] sm:$0xff] }
  0x11   : > { %178 = vst.msk [vmem:[#allocation2 + $0x3] sm:$0xff] %vm173_vm0, %v171_v3  ;;  %179 = vst.msk [vmem:[#allocation2 + $0xb] sm:$0xff] %vm173_vm0, %v172_v4 }
  0x18   : > { %v181_v13 = vld [vmem:[#allocation2] sm:$0xff]  ;;  %v182_v19 = vld [vmem:[#allocation2 + $0x8] sm:$0xff] }
  0x19   : > { %v191_v14 = vld [vmem:[#allocation2 + $0x1] sm:$0xff]  ;;  %v187_v16 = vmul.f32 %v186_v9, %v181_v13  ;;  %v192_v20 = vld [vmem:[#allocation2 + $0x9] sm:$0xff]  ;;  %v188_v22 = vmul.f32 %v186_v9, %v182_v19 }
  0x1a   : > { %v201_v15 = vld [vmem:[#allocation2 + $0x2] sm:$0xff]  ;;  %v197_v17 = vmul.f32 %v196_v10, %v191_v14  ;;  %v198_v23 = vmul.f32 %v196_v10, %v192_v20  ;;  %v202_v24 = vld [vmem:[#allocation2 + $0xa] sm:$0xff] }
  0x1b   : > { %v211_v21 = vld [vmem:[#allocation2 + $0x3] sm:$0xff]  ;;  %v207_v26 = vmul.f32 %v206_v12, %v201_v15  ;;  %v212_v27 = vld [vmem:[#allocation2 + $0xb] sm:$0xff]  ;;  %v208_v29 = vmul.f32 %v206_v12, %v202_v24 }
  0x1c   : > { %v199_v25 = vadd.f32 %v197_v17, %v187_v16  ;;  %v200_v28 = vadd.f32 %v198_v23, %v188_v22  ;;  %v217_v31 = vmul.f32 %v216_v18, %v211_v21  ;;  %v218_v34 = vmul.f32 %v216_v18, %v212_v27 }
  0x1e   : > { %v209_v30 = vadd.f32 %v207_v26, %v199_v25  ;;  %v210_v33 = vadd.f32 %v208_v29, %v200_v28 }
  0x20   : > { %v219_v35 = vadd.f32 %v217_v31, %v209_v30  ;;  %v220_v36 = vadd.f32 %v218_v34, %v210_v33 }
  0x22   : > { %v228_v37 = vadd.f32 %v310_v32, %v219_v35  ;;  %v229_v38 = vadd.f32 %v310_v32, %v220_v36 }
  0x24   : > { %v230_v39 = vsub.f32 0.0, %v228_v37  ;;  %v231_v40 = vsub.f32 0.0, %v229_v38 }
  0x26   : > { %v232_v41 = vmul.f32 1.442695, %v230_v39  ;;  %v234_v42 = vmul.f32 1.442695, %v231_v40 }
  0x28   : > { %324 = vpow2.f32 %v232_v41 }
  0x29   : > { %326 = vpow2.f32 %v234_v42 }
  0x32   : > { %v325_v43 = vpop.eup %324 }
  0x33   : > { %v327_v44 = vpop.eup %326  ;;  %v236_v45 = vadd.f32 1.0, %v325_v43 }
  0x34   : > { %v237_v46 = vadd.f32 1.0, %v327_v44 }
  0x35   : > { %328 = vrcp.f32 %v236_v45 }
  0x36   : > { %330 = vrcp.f32 %v237_v46 }
  0x3f   : > { %v329_v47 = vpop.eup %328 }
  0x40   : > { %v331_v48 = vpop.eup %330  ;;  %v242_v49 = vmul.f32 %v329_v47, %v228_v37 }
  0x41   : > { %v243_v50 = vmul.f32 %v331_v48, %v229_v38 }
  0x42   : > { %244 = vst.msk [vmem:[%s170_s24] sm:$0xff] %vm173_vm0, %v242_v49 }
  0x43   : > { %245 = vst.msk [vmem:[%s170_s24 + $0x8] sm:$0xff] %vm173_vm0, %v243_v50 }
  0x44 PF: > { %s13_s12 = sadd.s32 1, %s338_s12  }
  0x45   : > { %p10_p4 = scmp.ge.s32.totalorder %s13_s12, 10  }
  0x47   :  { %12 = sbr.rel (!%p10_p4) target bundleno = 1 (0x1), region = 62 }

// kernel: deco_convnet_forward.38
= control target key start
LH: loop header
LB: loop body
LE: loop exit
PB: predicated region body
PF: predicated region fallthrough
CT: control target
= control target key end

     0   :  { %s335_s9 = smov 0   ;;  %s361_s0 = inlined_call_operand.vmem [shape: f32[8,16,16,16], index: 0, kind: input, shape index: {}]   ;;  %s362_s1 = inlined_call_operand.vmem [shape: f32[8,16,16,16], index: 1, kind: input, shape index: {}]   ;;  %s363_s2 = inlined_call_operand.vmem [shape: f32[8,16,16,16], index: 2, kind: output, shape index: {}]  }
   0x1 LB: > { %s269_s10 = sadd.s32 4294967295, %s313_s9   ;;  %p273_p0 = scmp.ge.s32.totalorder %s313_s9, 1  ;;  %s313_s9 = sphi %s335_s9, %s12_s9  }
   0x2   : > { %p122_p1 = scmp.lt.s32.totalorder %s313_s9, 9 }
   0x4   : > { %p123_p2 = pnand %p273_p0, %p122_p1 }
   0x5   : > { %p149_p3 = scmp.lt.s32.totalorder (!%p123_p2), %s269_s10, 7  ;;  %vm164_vm0 = vcmask (!%p123_p2), 130048   ;;  %v319_v0 = vmov (!%p123_p2), 0.0   ;;  %s315_s21 = smov (!%p123_p2), 0  }
   0x6   : > { %126 = sbr.rel (%p123_p2) target bundleno = 28 (0x1c), region = 28  ;;  %165 = vst.msk [vmem:[#allocation2] sm:$0xff] (!%p123_p2), %vm164_vm0, %v319_v0  ;;  %166 = vst.msk [vmem:[#allocation2 + $0x8] sm:$0xff] (!%p123_p2), %vm164_vm0, %v319_v0 }
   0xd   : > { %s365_s10 = smov (!%p149_p3, %s269_s10), 7 }
   0xe   : > { %s283_s11 = sshll.u32 %s365_s10, 8 }
   0xf   : > { %s153_s14 = scalar_lea.vmem %s361_s0, %s283_s11  ;;  %s158_s17 = scalar_lea.vmem %s362_s1, %s283_s11 }
  0x10   : > { %s163_s20 = scalar_lea.vmem %s363_s2, %s283_s11 }
  0x11 LB: >> { %v173_v1 = vld [vmem:[#allocation2] sm:$0xff]  ;;  %s280_s22 = sshll.u32 %s317_s21, 4  ;;  %v174_v2 = vld [vmem:[#allocation2 + $0x8] sm:$0xff]  ;;  %s172_s21 = sadd.s32 1, %s317_s21   ;;  %s317_s21 = sphi %s315_s21, %s172_s21  }
  0x12   : >> { %s176_s23 = scalar_lea.vmem %s153_s14, %s280_s22  ;;  %s181_s24 = scalar_lea.vmem %s158_s17, %s280_s22 }
  0x13   : >> { %v177_v3 = vld [vmem:[%s176_s23] sm:$0xff]  ;;  %v178_v5 = vld [vmem:[%s176_s23 + $0x8] sm:$0xff]  ;;  %s188_s25 = scalar_lea.vmem %s163_s20, %s280_s22  ;;  %p169_p4 = scmp.ge.s32.totalorder %s172_s21, 16  }
  0x14   : >> { %v182_v4 = vld [vmem:[%s181_s24] sm:$0xff]  ;;  %v179_v6 = vmul.f32 %v177_v3, %v173_v1  ;;  %v180_v7 = vmul.f32 %v178_v5, %v174_v2  ;;  %v183_v8 = vld [vmem:[%s181_s24 + $0x8] sm:$0xff] }
  0x15   : > { %171 = sbr.rel (!%p169_p4) target bundleno = 17 (0x11), region = 71 }
  0x16   : >> { %v184_v9 = vadd.f32 %v182_v4, %v179_v6  ;;  %v185_v10 = vadd.f32 %v183_v8, %v180_v7 }
  0x18   : >> { %186 = vst.msk [vmem:[#allocation2] sm:$0xff] %vm164_vm0, %v184_v9  ;;  %187 = vst.msk [vmem:[#allocation2 + $0x8] sm:$0xff] %vm164_vm0, %v185_v10 }
  0x19   : >> { %189 = vst.msk [vmem:[%s188_s25] sm:$0xff] %vm164_vm0, %v184_v9  ;;  %190 = vst.msk [vmem:[%s188_s25 + $0x8] sm:$0xff] %vm164_vm0, %v185_v10 }
  0x1c PF: > { %s12_s9 = sadd.s32 1, %s313_s9  }
  0x1d   : > { %p9_p5 = scmp.ge.s32.totalorder %s12_s9, 10  }
  0x1f   :  { %11 = sbr.rel (!%p9_p5) target bundleno = 1 (0x1), region = 82 }

// kernel: deco_convnet_forward.39
= control target key start
LH: loop header
LB: loop body
LE: loop exit
PB: predicated region body
PF: predicated region fallthrough
CT: control target
= control target key end

     0   :  { %vm29_vm0 = vcmask 130048   ;;  %vm223_vm1 = vcmask 64512   ;;  %s461_s1 = inlined_call_operand.vmem [shape: f32[16,8], index: 1, kind: input, shape index: {}]   ;;  %s462_s0 = inlined_call_operand.vmem [shape: f32[128,16], index: 0, kind: input, shape index: {}]   ;;  %s463_s2 = inlined_call_operand.vmem [shape: f32[128,8], index: 2, kind: output, shape index: {}]  }
   0x1   :  { %v27_v0 = vld [vmem:[%s461_s1] sm:$0xff]  ;;  %v28_v1 = vld [vmem:[%s461_s1 + $0x8] sm:$0xff]  ;;  %v13_v7 = vld [vmem:[%s462_s0 + $0x10] sm:$0xff] }
   0x2   :  { %v11_v2 = vld [vmem:[%s462_s0] sm:$0xff]  ;;  %v306_v3 = vpack.c.bf16 %v28_v1, %v27_v0  ;;  %v12_v5 = vld [vmem:[%s462_s0 + $0x8] sm:$0xff]  ;;  %v21_v8 = vld [vmem:[%s462_s0 + $0x50] sm:$0xff] }
   0x3   :  { %282 = vmatprep.mubr.msk.f32.mxu0 %vm29_vm0, %v11_v2  ;;  %v19_v4 = vld [vmem:[%s462_s0 + $0x40] sm:$0xff]  ;;  %v20_v6 = vld [vmem:[%s462_s0 + $0x48] sm:$0xff]  ;;  %v14_v9 = vld [vmem:[%s462_s0 + $0x18] sm:$0xff] }
   0x4   :  { %294 = vmatprep.mubr.msk.f32.mxu1 %vm29_vm0, %v19_v4  ;;  %307 = vmatprep.subr.bf16.mxu0 %v306_v3  ;;  %v22_v10 = vld [vmem:[%s462_s0 + $0x58] sm:$0xff]  ;;  %v15_v11 = vld [vmem:[%s462_s0 + $0x20] sm:$0xff]  ;;  %v16_v13 = vld [vmem:[%s462_s0 + $0x28] sm:$0xff] }
   0x5   :  { %310 = vmatprep.subr.bf16.mxu1 %v306_v3  ;;  %309 = vmatpush3.bf16.msra.mxu0 %v306_v3  ;;  %v23_v12 = vld [vmem:[%s462_s0 + $0x60] sm:$0xff]  ;;  %v24_v14 = vld [vmem:[%s462_s0 + $0x68] sm:$0xff]  ;;  %v17_v15 = vld [vmem:[%s462_s0 + $0x30] sm:$0xff] }
   0x6   :  { %311 = vmatpush3.bf16.msra.mxu1 %v306_v3  ;;  %v25_v16 = vld [vmem:[%s462_s0 + $0x70] sm:$0xff]  ;;  %v18_v17 = vld [vmem:[%s462_s0 + $0x38] sm:$0xff] }
   0x7   :  { %v26_v18 = vld [vmem:[%s462_s0 + $0x78] sm:$0xff] }
   0x8   :  { %283 = vmatmul.mubr.msk.f32.vlgmr.msra.gmra.mrb[0].mxu0 %vm29_vm0, %v12_v5 }
   0x9   :  { %295 = vmatmul.mubr.msk.f32.vlgmr.msra.gmra.mrb[0].mxu1 %vm29_vm0, %v20_v6  ;;  %285 = vmatprep.mubr.msk.f32.mxu0 %vm29_vm0, %v13_v7 }
   0xa   :  { %297 = vmatprep.mubr.msk.f32.mxu1 %vm29_vm0, %v21_v8 }
   0xc   :  { %286 = vmatmul.mubr.msk.f32.gmra.mrb[2].mxu0 %vm29_vm0, %v14_v9 }
   0xd   :  { %298 = vmatmul.mubr.msk.f32.gmra.mrb[2].mxu1 %vm29_vm0, %v22_v10  ;;  %288 = vmatprep.mubr.msk.f32.mxu0 %vm29_vm0, %v15_v11 }
   0xe   :  { %300 = vmatprep.mubr.msk.f32.mxu1 %vm29_vm0, %v23_v12 }
  0x10   :  { %289 = vmatmul.mubr.msk.f32.gmra.mrb[4].mxu0 %vm29_vm0, %v16_v13 }
  0x11   :  { %301 = vmatmul.mubr.msk.f32.gmra.mrb[4].mxu1 %vm29_vm0, %v24_v14  ;;  %291 = vmatprep.mubr.msk.f32.mxu0 %vm29_vm0, %v17_v15 }
  0x12   :  { %303 = vmatprep.mubr.msk.f32.mxu1 %vm29_vm0, %v25_v16 }
  0x14   :  { %292 = vmatmul.mubr.msk.f32.gmra.mrb[6].mxu0 %vm29_vm0, %v18_v17 }
  0x15   :  { %304 = vmatmul.mubr.msk.f32.gmra.mrb[6].mxu1 %vm29_vm0, %v26_v18 }
  0xdb   :  { %v284_v19 = vpop.f32.mrb[0].mxu0 }
  0xdc   :  { %v296_v20 = vpop.f32.mrb[0].mxu1  ;;  %225 = vst.msk [vmem:[%s463_s2 + $0x8] sm:$0xff] %vm223_vm1, %v284_v19  ;;  %v144_v21 = vpop.f32.mrb[1].mxu0 }
  0xdd   :  { %233 = vst.msk [vmem:[%s463_s2 + $0x48] sm:$0xff] %vm223_vm1, %v296_v20  ;;  %v184_v22 = vpop.f32.mrb[1].mxu1  ;;  %224 = vst.msk [vmem:[%s463_s2] sm:$0xff] %vm223_vm1, %v144_v21 }
  0xde   :  { %232 = vst.msk [vmem:[%s463_s2 + $0x40] sm:$0xff] %vm223_vm1, %v184_v22 }
  0xdf   :  { %v287_v23 = vpop.f32.mrb[2].mxu0 }
  0xe0   :  { %v299_v24 = vpop.f32.mrb[2].mxu1  ;;  %227 = vst.msk [vmem:[%s463_s2 + $0x18] sm:$0xff] %vm223_vm1, %v287_v23  ;;  %v154_v25 = vpop.f32.mrb[3].mxu0 }
  0xe1   :  { %235 = vst.msk [vmem:[%s463_s2 + $0x58] sm:$0xff] %vm223_vm1, %v299_v24  ;;  %v194_v26 = vpop.f32.mrb[3].mxu1  ;;  %226 = vst.msk [vmem:[%s463_s2 + $0x10] sm:$0xff] %vm223_vm1, %v154_v25 }
  0xe2   :  { %234 = vst.msk [vmem:[%s463_s2 + $0x50] sm:$0xff] %vm223_vm1, %v194_v26 }
  0xe3   :  { %v290_v27 = vpop.f32.mrb[4].mxu0 }
  0xe4   :  { %v302_v28 = vpop.f32.mrb[4].mxu1  ;;  %229 = vst.msk [vmem:[%s463_s2 + $0x28] sm:$0xff] %vm223_vm1, %v290_v27  ;;  %v164_v29 = vpop.f32.mrb[5].mxu0 }
  0xe5   :  { %237 = vst.msk [vmem:[%s463_s2 + $0x68] sm:$0xff] %vm223_vm1, %v302_v28  ;;  %v204_v30 = vpop.f32.mrb[5].mxu1  ;;  %228 = vst.msk [vmem:[%s463_s2 + $0x20] sm:$0xff] %vm223_vm1, %v164_v29 }
  0xe6   :  { %236 = vst.msk [vmem:[%s463_s2 + $0x60] sm:$0xff] %vm223_vm1, %v204_v30 }
  0xe7   :  { %v293_v31 = vpop.f32.mrb[6].mxu0 }
  0xe8   :  { %v305_v32 = vpop.f32.mrb[6].mxu1  ;;  %231 = vst.msk [vmem:[%s463_s2 + $0x38] sm:$0xff] %vm223_vm1, %v293_v31  ;;  %v174_v33 = vpop.f32.mrb[7].mxu0 }
  0xe9   :  { %239 = vst.msk [vmem:[%s463_s2 + $0x78] sm:$0xff] %vm223_vm1, %v305_v32  ;;  %v214_v34 = vpop.f32.mrb[7].mxu1  ;;  %230 = vst.msk [vmem:[%s463_s2 + $0x30] sm:$0xff] %vm223_vm1, %v174_v33 }
  0xea   :  { %238 = vst.msk [vmem:[%s463_s2 + $0x70] sm:$0xff] %vm223_vm1, %v214_v34 }

// kernel: mul.184
= control target key start
LH: loop header
LB: loop body
LE: loop exit
PB: predicated region body
PF: predicated region fallthrough
CT: control target
= control target key end

     0   :  { %s34_s0 = inlined_call_operand.vmem [shape: f32[1,32], index: 0, kind: input, shape index: {}]   ;;  %s35_s1 = inlined_call_operand.vmem [shape: f32[1,32], index: 1, kind: input, shape index: {}]   ;;  %s36_s2 = inlined_call_operand.vmem [shape: f32[1,32], index: 2, kind: output, shape index: {}]  }
   0x1   :  { %v3_v0 = vld [vmem:[%s34_s0] sm:$0x1] }
   0x2   :  { %v4_v1 = vld [vmem:[%s35_s1] sm:$0x1] }
   0x3   :  { %v7_v2 = vmul.f32 %v4_v1, %v3_v0 }
   0x5   :  { %9 = vst [vmem:[%s36_s2] sm:$0x1] %v7_v2 }

// kernel: deco_convnet_forward.30
= control target key start
LH: loop header
LB: loop body
LE: loop exit
PB: predicated region body
PF: predicated region fallthrough
CT: control target
= control target key end

     0   :  { %vm29_vm0 = vcmask 261120   ;;  %s241_s1 = inlined_call_operand.vmem [shape: f32[32,32], index: 1, kind: input, shape index: {}]   ;;  %s242_s0 = inlined_call_operand.vmem [shape: f32[32,32], index: 0, kind: input, shape index: {}]   ;;  %s243_s2 = inlined_call_operand.vmem [shape: f32[1,32], index: 2, kind: input, shape index: {}]   ;;  %s244_s3 = inlined_call_operand.vmem [shape: f32[32,32], index: 3, kind: output, shape index: {}]  }
   0x1   :  { %v18_v0 = vld [vmem:[%s241_s1] sm:$0xff]  ;;  %v19_v1 = vld [vmem:[%s241_s1 + $0x8] sm:$0xff]  ;;  %v20_v2 = vld [vmem:[%s241_s1 + $0x10] sm:$0xff] }
   0x2   :  { %v162_v3 = vpack.c.bf16 %v19_v1, %v18_v0  ;;  %v21_v4 = vld [vmem:[%s241_s1 + $0x18] sm:$0xff]  ;;  %v14_v5 = vld [vmem:[%s242_s0] sm:$0xff]  ;;  %v16_v6 = vld [vmem:[%s242_s0 + $0x10] sm:$0xff] }
   0x3   :  { %v166_v7 = vpack.c.bf16 %v21_v4, %v20_v2  ;;  %156 = vmatprep.mubr.msk.f32.mxu0 %vm29_vm0, %v14_v5  ;;  %159 = vmatprep.mubr.msk.f32.mxu1 %vm29_vm0, %v16_v6  ;;  %v15_v8 = vld [vmem:[%s242_s0 + $0x8] sm:$0xff]  ;;  %v17_v9 = vld [vmem:[%s242_s0 + $0x18] sm:$0xff]  ;;  %v135_v10 = vld [vmem:[%s243_s2] ss:$0 sm:$0xff] }
   0x4   :  { %163 = vmatprep.subr.bf16.mxu0 %v162_v3  ;;  %170 = vmatprep.subr.bf16.mxu1 %v162_v3 }
   0x5   :  { %165 = vmatpush3.bf16.msra.mxu0 %v162_v3  ;;  %172 = vmatpush3.bf16.msra.mxu1 %v162_v3 }
   0x6   :  { %167 = vmatprep.subr.bf16.mxu0 %v166_v7  ;;  %171 = vmatprep.subr.bf16.mxu1 %v166_v7 }
   0x9   :  { %169 = vmatpush3.bf16.msra.mxu0 %v166_v7  ;;  %173 = vmatpush3.bf16.msra.mxu1 %v166_v7 }
   0xc   :  { %157 = vmatmul.mubr.msk.f32.vlgmr.msra.gmra.mrb[0].mxu0 %vm29_vm0, %v15_v8  ;;  %160 = vmatmul.mubr.msk.f32.vlgmr.msra.gmra.mrb[0].mxu1 %vm29_vm0, %v17_v9 }
  0xdf   :  { %v158_v11 = vpop.f32.mrb[0].mxu0  ;;  %v161_v12 = vpop.f32.mrb[0].mxu1 }
  0xe0   :  { %v114_v13 = vadd.f32 %v158_v11, %v135_v10  ;;  %v124_v14 = vadd.f32 %v161_v12, %v135_v10  ;;  %v108_v15 = vpop.f32.mrb[1].mxu0  ;;  %v118_v16 = vpop.f32.mrb[1].mxu1 }
  0xe1   :  { %v109_v17 = vadd.f32 %v135_v10, %v108_v15  ;;  %v119_v18 = vadd.f32 %v135_v10, %v118_v16 }
  0xe2   :  { %128 = vst.msk [vmem:[%s244_s3 + $0x8] sm:$0xff] %vm29_vm0, %v114_v13  ;;  %130 = vst.msk [vmem:[%s244_s3 + $0x18] sm:$0xff] %vm29_vm0, %v124_v14 }
  0xe3   :  { %127 = vst.msk [vmem:[%s244_s3] sm:$0xff] %vm29_vm0, %v109_v17  ;;  %129 = vst.msk [vmem:[%s244_s3 + $0x10] sm:$0xff] %vm29_vm0, %v119_v18 }

// kernel: deco_convnet_forward.45
= control target key start
LH: loop header
LB: loop body
LE: loop exit
PB: predicated region body
PF: predicated region fallthrough
CT: control target
= control target key end

     0   :  { %s1115_s17 = smov 0   ;;  %s1246_s0 = inlined_call_operand.vmem [shape: f32[2,16,32], index: 0, kind: input, shape index: {}]   ;;  %s1247_s1 = inlined_call_operand.vmem [shape: f32[2,16,32], index: 1, kind: input, shape index: {}]   ;;  %s1248_s2 = inlined_call_operand.vmem [shape: f32[2,16,1], index: 2, kind: input, shape index: {}]   ;;  %s1249_s3 = inlined_call_operand.vmem [shape: f32[9,32], index: 3, kind: input, shape index: {}]   ;;  %s1250_s4 = inlined_call_operand.vmem [shape: f32[1,32], index: 4, kind: input, shape index: {}]   ;;  %s1251_s5 = inlined_call_operand.vmem [shape: f32[1,32], index: 5, kind: input, shape index: {}]   ;;  %s1252_s6 = inlined_call_operand.vmem [shape: f32[1,32], index: 6, kind: input, shape index: {}]   ;;  %s1253_s7 = inlined_call_operand.vmem [shape: f32[32,128], index: 7, kind: input, shape index: {}]   ;;  %s1254_s8 = inlined_call_operand.vmem [shape: f32[1,128], index: 8, kind: input, shape index: {}]   ;;  %s1255_s9 = inlined_call_operand.vmem [shape: f32[128,32], index: 9, kind: input, shape index: {}]   ;;  %s1256_s10 = inlined_call_operand.vmem [shape: f32[1,32], index: 10, kind: input, shape index: {}]   ;;  %s1257_s11 = inlined_call_operand.vmem [shape: f32[2,16,32], index: 11, kind: output, shape index: {}]  }
   0x1 LB: > { %s889_s18 = sadd.s32 4294967295, %s1051_s17   ;;  %p893_p0 = scmp.ge.s32.totalorder %s1051_s17, 1  ;;  %s1051_s17 = sphi %s1115_s17, %s21_s17  }
   0x2   : > { %p357_p1 = scmp.lt.s32.totalorder %s1051_s17, 3 }
   0x4   : > { %p358_p2 = pnand %p893_p0, %p357_p1 }
   0x5   : > { %p407_p3 = scmp.lt.s32.totalorder (!%p358_p2), %s889_s18, 1  ;;  %vm433_vm0 = vcmask (!%p358_p2), 261120   ;;  %v1053_v0 = vmov (!%p358_p2), 0   ;;  %v1054_v1 = vmov (!%p358_p2), 0.0   ;;  %v443_v10 = vlaneseq (!%p358_p2)  ;;  %v439_v14 = vld [vmem:[%s1249_s3] sm:$0xff] (!%p358_p2) }
   0x6   : > { %361 = sbr.rel (%p358_p2) target bundleno = 925 (0x39d), region = 64  ;;  %1036 = vset.pattern.permute.xlu0 (!%p358_p2), %v1053_v0  ;;  %434 = vst.msk [vmem:[#allocation2] sm:$0xff] (!%p358_p2), %vm433_vm0, %v1054_v1  ;;  %435 = vst.msk [vmem:[#allocation2 + $0x8] sm:$0xff] (!%p358_p2), %vm433_vm0, %v1054_v1 }
   0x7   : > { %436 = vst.msk [vmem:[#allocation2 + $0x10] sm:$0xff] (!%p358_p2), %vm433_vm0, %v1054_v1  ;;  %v444_v11 = vshrl.u32 (!%p358_p2), %v443_v10, 7 }
   0x9   : > { %v445_v12 = vsub.s32 (!%p358_p2), 0, %v444_v11  ;;  %v455_v13 = vsub.s32 (!%p358_p2), 1, %v444_v11  ;;  %v465_v17 = vsub.s32 (!%p358_p2), 2, %v444_v11  ;;  %v475_v20 = vsub.s32 (!%p358_p2), 3, %v444_v11 }
   0xa   : > { %v485_v28 = vsub.s32 (!%p358_p2), 4, %v444_v11  ;;  %v495_v36 = vsub.s32 (!%p358_p2), 5, %v444_v11  ;;  %v505_v44 = vsub.s32 (!%p358_p2), 6, %v444_v11  ;;  %v515_v52 = vsub.s32 (!%p358_p2), 7, %v444_v11 }
   0xb   : > { %v446_v15 = vrot.slane (!%p358_p2), %v439_v14, %v445_v12  ;;  %v456_v16 = vrot.slane (!%p358_p2), %v439_v14, %v455_v13  ;;  %v466_v21 = vrot.slane (!%p358_p2), %v439_v14, %v465_v17  ;;  %v476_v27 = vrot.slane (!%p358_p2), %v439_v14, %v475_v20 }
   0xc   : > { %v486_v35 = vrot.slane (!%p358_p2), %v439_v14, %v485_v28  ;;  %v496_v43 = vrot.slane (!%p358_p2), %v439_v14, %v495_v36  ;;  %v506_v51 = vrot.slane (!%p358_p2), %v439_v14, %v505_v44  ;;  %v516_v59 = vrot.slane (!%p358_p2), %v439_v14, %v515_v52 }
   0xd   : > { %s1259_s18 = smov (!%p407_p3, %s889_s18), 1 }
   0xe   : > { %s1126_s19 = sshll.u32 %s1259_s18, 4 }
   0xf   : > { %s421_s22 = scalar_lea.vmem %s1248_s2, %s1126_s19  ;;  %s411_s25 = scalar_lea.vmem %s1246_s0, %s1126_s19 }
  0x10   : > { %v539_v2 = vld [vmem:[%s421_s22] sm:$0xff]  ;;  %s416_s28 = scalar_lea.vmem %s1247_s1, %s1126_s19  ;;  %v1142_v4 = vld [vmem:[%s411_s25 + $0x8] sm:$0xff]  ;;  %s426_s15 = scalar_lea.vmem %s1257_s11, %s1126_s19 }
  0x11   : > { %v1140_v3 = vld [vmem:[%s411_s25] sm:$0xff]  ;;  %543 = vperm.xlu0 %1036, %v539_v2   ;;  %v430_v6 = vld [vmem:[%s416_s28 + $0x8] sm:$0xff] }
  0x12   : > { %v429_v5 = vld [vmem:[%s416_s28] sm:$0xff]  ;;  %v432_v8 = vadd.f32 %v430_v6, %v1142_v4  ;;  %v540_v9 = vld [vmem:[%s421_s22 + $0x8] sm:$0xff] }
  0x13   : > { %v431_v7 = vadd.f32 %v429_v5, %v1140_v3 }
  0x14   : > { %438 = vst.msk [vmem:[#allocation2 + $0xc] sm:$0xff] %vm433_vm0, %v432_v8  ;;  %v902_v8 = vld [vmem:[%s1249_s3 + $0x8] ss:$0 sm:$0xff] }
  0x15   : > { %437 = vst.msk [vmem:[#allocation2 + $0x4] sm:$0xff] %vm433_vm0, %v431_v7  ;;  %548 = vperm.xlu0 %1036, %v540_v9  }
  0x1b   : > { %v482_v50 = vld [vmem:[#allocation2 + $0xc] sm:$0xff] }
  0x1c   : > { %v441_v18 = vld [vmem:[#allocation2] sm:$0xff]  ;;  %v442_v24 = vld [vmem:[#allocation2 + $0x8] sm:$0xff]  ;;  %v488_v56 = vmul.f32 %v486_v35, %v482_v50  ;;  %v521_v14 = vld [vmem:[#allocation2 + $0x10] sm:$0xff] }
  0x1d   : > { %v451_v19 = vld [vmem:[#allocation2 + $0x1] sm:$0xff]  ;;  %v447_v22 = vmul.f32 %v446_v15, %v441_v18  ;;  %v452_v25 = vld [vmem:[#allocation2 + $0x9] sm:$0xff]  ;;  %v448_v29 = vmul.f32 %v446_v15, %v442_v24  ;;  %v526_v11 = vmul.f32 %v902_v8, %v442_v24  ;;  %v527_v17 = vmul.f32 %v902_v8, %v521_v14  ;;  %v903_v18 = vld [vmem:[%s1250_s4] ss:$0 sm:$0xff] }
  0x1e   : > { %v457_v23 = vmul.f32 %v456_v16, %v451_v19  ;;  %v461_v26 = vld [vmem:[#allocation2 + $0x2] sm:$0xff]  ;;  %v458_v30 = vmul.f32 %v456_v16, %v452_v25  ;;  %v462_v33 = vld [vmem:[#allocation2 + $0xa] sm:$0xff]  ;;  %v715_v8 = vld [vmem:[%s1255_s9 + $0x38] sm:$0xff] }
  0x1f   : > { %v467_v32 = vmul.f32 %v466_v21, %v461_v26  ;;  %v471_v34 = vld [vmem:[#allocation2 + $0x3] sm:$0xff]  ;;  %v468_v38 = vmul.f32 %v466_v21, %v462_v33  ;;  %v472_v42 = vld [vmem:[#allocation2 + $0xb] sm:$0xff]  ;;  %v719_v14 = vld [vmem:[%s1255_s9 + $0x58] sm:$0xff] }
  0x20   : > { %v459_v31 = vadd.f32 %v457_v23, %v447_v22  ;;  %v460_v37 = vadd.f32 %v458_v30, %v448_v29  ;;  %v477_v40 = vmul.f32 %v476_v27, %v471_v34  ;;  %v481_v41 = vld [vmem:[#allocation2 + $0x4] sm:$0xff]  ;;  %v478_v48 = vmul.f32 %v476_v27, %v472_v42  ;;  %v492_v58 = vld [vmem:[#allocation2 + $0xd] sm:$0xff]  ;;  %v601_v42 = vld [vmem:[%s1253_s7 + $0x18] sm:$0xff] }
  0x21   : > { %v487_v47 = vmul.f32 %v486_v35, %v481_v41  ;;  %v491_v49 = vld [vmem:[#allocation2 + $0x5] sm:$0xff]  ;;  %v498_v63 = vmul.f32 %v496_v43, %v492_v58  ;;  %v502_v1 = vld [vmem:[#allocation2 + $0xe] sm:$0xff] }
  0x22   : > { %v469_v39 = vadd.f32 %v467_v32, %v459_v31  ;;  %v470_v45 = vadd.f32 %v468_v38, %v460_v37  ;;  %v497_v54 = vmul.f32 %v496_v43, %v491_v49  ;;  %v501_v57 = vld [vmem:[#allocation2 + $0x6] sm:$0xff]  ;;  %v508_v7 = vmul.f32 %v506_v51, %v502_v1  ;;  %v512_v9 = vld [vmem:[#allocation2 + $0xf] sm:$0xff] }
  0x23   : > { %v507_v61 = vmul.f32 %v506_v51, %v501_v57  ;;  %v511_v0 = vld [vmem:[#allocation2 + $0x7] sm:$0xff]  ;;  %v518_v13 = vmul.f32 %v516_v59, %v512_v9  ;;  %v904_v51 = vld [vmem:[%s1251_s5] ss:$0 sm:$0xff] }
  0x24   : > { %v479_v46 = vadd.f32 %v477_v40, %v469_v39  ;;  %v480_v55 = vadd.f32 %v478_v48, %v470_v45  ;;  %v517_v5 = vmul.f32 %v516_v59, %v511_v0  ;;  %v598_v38 = vld [vmem:[%s1253_s7] sm:$0xff]  ;;  %v599_v39 = vld [vmem:[%s1253_s7 + $0x8] sm:$0xff]  ;;  %v600_v40 = vld [vmem:[%s1253_s7 + $0x10] sm:$0xff] }
  0x25   : > { %v986_v41 = vpack.c.bf16 %v599_v39, %v598_v38  ;;  %v990_v43 = vpack.c.bf16 %v601_v42, %v600_v40  ;;  %v711_v0 = vld [vmem:[%s1255_s9 + $0x18] sm:$0xff] }
  0x26   : > { %v489_v53 = vadd.f32 %v487_v47, %v479_v46  ;;  %v490_v62 = vadd.f32 %v488_v56, %v480_v55 }
  0x27   : > { %987 = vmatprep.subr.bf16.mxu0 %v986_v41 }
  0x28   : > { %v499_v60 = vadd.f32 %v497_v54, %v489_v53  ;;  %v500_v6 = vadd.f32 %v498_v63, %v490_v62  ;;  %989 = vmatpush3.bf16.msra.mxu0 %v986_v41  ;;  %v905_v53 = vld [vmem:[%s1252_s6] ss:$0 sm:$0xff]  ;;  %v710_v63 = vld [vmem:[%s1255_s9 + $0x10] sm:$0xff] }
  0x29   : > { %991 = vmatprep.subr.bf16.mxu0 %v990_v43  ;;  %v998_v1 = vpack.c.bf16 %v711_v0, %v710_v63 }
  0x2a   : > { %v509_v2 = vadd.f32 %v507_v61, %v499_v60  ;;  %v510_v12 = vadd.f32 %v508_v7, %v500_v6  ;;  %v708_v60 = vld [vmem:[%s1255_s9] sm:$0xff]  ;;  %v709_v61 = vld [vmem:[%s1255_s9 + $0x8] sm:$0xff]  ;;  %v714_v7 = vld [vmem:[%s1255_s9 + $0x30] sm:$0xff] }
  0x2b   : > { %v994_v62 = vpack.c.bf16 %v709_v61, %v708_v60  ;;  %v1006_v9 = vpack.c.bf16 %v715_v8, %v714_v7 }
  0x2c   : > { %v519_v10 = vadd.f32 %v517_v5, %v509_v2  ;;  %v520_v16 = vadd.f32 %v518_v13, %v510_v12  ;;  %993 = vmatpush3.bf16.msra.mxu0 %v990_v43  ;;  %v712_v2 = vld [vmem:[%s1255_s9 + $0x20] sm:$0xff]  ;;  %v713_v5 = vld [vmem:[%s1255_s9 + $0x28] sm:$0xff]  ;;  %v718_v12 = vld [vmem:[%s1255_s9 + $0x50] sm:$0xff] }
  0x2d   : > { %995 = vmatprep.subr.bf16.mxu1 %v994_v62  ;;  %v1002_v6 = vpack.c.bf16 %v713_v5, %v712_v2 }
  0x2e   : > { %v528_v15 = vadd.f32 %v526_v11, %v519_v10  ;;  %v529_v20 = vadd.f32 %v527_v17, %v520_v16  ;;  %997 = vmatpush3.bf16.msra.mxu1 %v994_v62  ;;  %v716_v10 = vld [vmem:[%s1255_s9 + $0x40] sm:$0xff]  ;;  %v717_v11 = vld [vmem:[%s1255_s9 + $0x48] sm:$0xff] }
  0x2f   : > { %999 = vmatprep.subr.bf16.mxu1 %v998_v1  ;;  %v1010_v13 = vpack.c.bf16 %v717_v11, %v716_v10  ;;  %v720_v16 = vld [vmem:[%s1255_s9 + $0x60] sm:$0xff]  ;;  %v721_v17 = vld [vmem:[%s1255_s9 + $0x68] sm:$0xff] }
  0x30   : > { %v537_v19 = vadd.f32 %v903_v18, %v528_v15  ;;  %v538_v23 = vadd.f32 %v903_v18, %v529_v20  ;;  %v1014_v15 = vpack.c.bf16 %v719_v14, %v718_v12  ;;  %v1018_v18 = vpack.c.bf16 %v721_v17, %v720_v16  ;;  %v723_v20 = vld [vmem:[%s1255_s9 + $0x78] sm:$0xff] }
  0x32   : > { %1001 = vmatpush3.bf16.msra.mxu1 %v998_v1 }
  0x33   : > { %1003 = vmatprep.subr.bf16.mxu1 %v1002_v6 }
  0x36   : > { %1005 = vmatpush3.bf16.msra.mxu1 %v1002_v6 }
  0x37   : > { %1007 = vmatprep.subr.bf16.mxu1 %v1006_v9 }
  0x3a   : > { %1009 = vmatpush3.bf16.msra.mxu1 %v1006_v9 }
  0x3b   : > { %1011 = vmatprep.subr.bf16.mxu1 %v1010_v13 }
  0x3e   : > { %1013 = vmatpush3.bf16.msra.mxu1 %v1010_v13 }
  0x3f   : > { %1015 = vmatprep.subr.bf16.mxu1 %v1014_v15 }
  0x42   : > { %1017 = vmatpush3.bf16.msra.mxu1 %v1014_v15 }
  0x43   : > { %1019 = vmatprep.subr.bf16.mxu1 %v1018_v18 }
  0x46   : > { %1021 = vmatpush3.bf16.msra.mxu1 %v1018_v18 }
  0x90   : > { %v544_v21 = vpop.permute.xlu0 %543 }
  0x91   : > { %v551_v22 = vmul.f32 %v544_v21, %v537_v19  ;;  %v722_v19 = vld [vmem:[%s1255_s9 + $0x70] sm:$0xff] }
  0x92   : > { %v1022_v21 = vpack.c.bf16 %v723_v20, %v722_v19 }
  0x93   : > { %v553_v25 = vsel %vm433_vm0, %v551_v22, 0.0 }
  0x94   : > { %v549_v26 = vpop.permute.xlu0 %548  ;;  %554 = vadd.xlane.f32.xlu1 %v553_v25  ;;  %1023 = vmatprep.subr.bf16.mxu1 %v1022_v21 }
  0x95   : > { %v552_v24 = vmul.f32 %v549_v26, %v538_v23  ;;  %1025 = vmatpush3.bf16.msra.mxu1 %v1022_v21 }
  0x97   : > { %v556_v27 = vsel %vm433_vm0, %v552_v24, 0.0 }
  0x98   : > { %557 = vadd.xlane.f32.xlu1 %v556_v27 }
 0x121   : > { %v555_v28 = vpop.xlane.xlu1 %554 }
 0x122   : > { %v560_v29 = vmul.f32 0.03125, %v555_v28 }
 0x124   : > { %v562_v30 = vsub.f32 %v551_v22, %v560_v29  ;;  %v906_v22 = vld [vmem:[%s1254_s8] ss:$0 sm:$0xff] }
 0x125   : > { %v558_v31 = vpop.xlane.xlu1 %557 }
 0x126   : > { %v561_v32 = vmul.f32 0.03125, %v558_v31  ;;  %v564_v33 = vmul.f32 %v562_v30, %v562_v30 }
 0x128   : > { %v563_v34 = vsub.f32 %v552_v24, %v561_v32  ;;  %v566_v35 = vsel %vm433_vm0, %v564_v33, 0.0 }
 0x129   : > { %567 = vadd.xlane.f32.xlu0 %v566_v35 }
 0x12a   : > { %v565_v36 = vmul.f32 %v563_v34, %v563_v34 }
 0x12c   : > { %v569_v37 = vsel %vm433_vm0, %v565_v36, 0.0 }
 0x12d   : > { %570 = vadd.xlane.f32.xlu1 %v569_v37 }
 0x1b6   : > { %v568_v44 = vpop.xlane.xlu0 %567 }
 0x1b7   : > { %v572_v45 = vmul.f32 0.03125, %v568_v44 }
 0x1b9   : > { %v574_v46 = vadd.f32 1e-06, %v572_v45  ;;  %v909_v45 = vld [vmem:[%s1256_s10] ss:$0 sm:$0xff] }
 0x1ba   : > { %v571_v47 = vpop.xlane.xlu1 %570 }
 0x1bb   : > { %1037 = vrsqrt.f32 %v574_v46  ;;  %v573_v48 = vmul.f32 0.03125, %v571_v47 }
 0x1bd   : > { %v575_v49 = vadd.f32 1e-06, %v573_v48 }
 0x1bf   : > { %1039 = vrsqrt.f32 %v575_v49 }
 0x1c5   : > { %v1038_v50 = vpop.eup %1037 }
 0x1c6   : > { %v578_v52 = vmul.f32 %v1038_v50, %v562_v30 }
 0x1c8   : > { %v587_v54 = vmul.f32 %v904_v51, %v578_v52 }
 0x1c9   : > { %v1040_v55 = vpop.eup %1039 }
 0x1ca   : > { %v579_v56 = vmul.f32 %v1040_v55, %v563_v34  ;;  %v596_v57 = vadd.f32 %v905_v53, %v587_v54 }
 0x1cc   : > { %v588_v58 = vmul.f32 %v904_v51, %v579_v56  ;;  %948 = vmatprep.mubr.msk.f32.mxu0 %vm433_vm0, %v596_v57 }
 0x1ce   : > { %v597_v59 = vadd.f32 %v905_v53, %v588_v58 }
 0x1d0   : > { %949 = vmatmul.mubr.msk.f32.vlgmr.msra.gmra.mrb[0].mxu0 %vm433_vm0, %v597_v59 }
 0x2a3   : > { %v950_v23 = vpop.f32.mrb[0].mxu0 }
 0x2a4   : > { %v687_v25 = vadd.f32 %v950_v23, %v906_v22  ;;  %v681_v26 = vpop.f32.mrb[1].mxu0 }
 0x2a5   : > { %v682_v24 = vadd.f32 %v906_v22, %v681_v26 }
 0x2a6   : > { %v691_v27 = vmul.f32 %v687_v25, %v687_v25 }
 0x2a7   : > { %v690_v28 = vmul.f32 %v682_v24, %v682_v24 }
 0x2a8   : > { %v693_v29 = vmul.f32 %v691_v27, %v687_v25 }
 0x2a9   : > { %v692_v30 = vmul.f32 %v690_v28, %v682_v24 }
 0x2aa   : > { %v695_v31 = vmul.f32 0.044715, %v693_v29 }
 0x2ab   : > { %v694_v32 = vmul.f32 0.044715, %v692_v30 }
 0x2ac   : > { %v697_v33 = vadd.f32 %v695_v31, %v687_v25 }
 0x2ad   : > { %v696_v34 = vadd.f32 %v694_v32, %v682_v24 }
 0x2ae   : > { %v699_v35 = vmul.f32 0.7978846, %v697_v33 }
 0x2af   : > { %v698_v36 = vmul.f32 0.7978846, %v696_v34 }
 0x2b0   : > { %1041 = vtanh.f32 %v699_v35 }
 0x2b1   : > { %1043 = vtanh.f32 %v698_v36 }
 0x2ba   : > { %v1042_v37 = vpop.eup %1041 }
 0x2bb   : > { %v1044_v38 = vpop.eup %1043  ;;  %v703_v39 = vadd.f32 1.0, %v1042_v37 }
 0x2bc   : > { %v702_v40 = vadd.f32 1.0, %v1044_v38 }
 0x2bd   : > { %v705_v41 = vmul.f32 0.5, %v703_v39 }
 0x2be   : > { %v704_v42 = vmul.f32 0.5, %v702_v40 }
 0x2bf   : > { %v707_v44 = vmul.f32 %v705_v41, %v687_v25 }
 0x2c0   : > { %v706_v43 = vmul.f32 %v704_v42, %v682_v24 }
 0x2c2   : > { %983 = vmatprep.mubr.f32.mxu1 %v706_v43 }
 0x2c3   : > { %984 = vmatmul.mubr.f32.vlgmr.msra.gmra.mrb[0].mxu1 %v707_v44 }
 0x396   : > { %v985_v46 = vpop.f32.mrb[0].mxu1 }
 0x397   : > { %v803_v47 = vadd.f32 %v985_v46, %v909_v45  ;;  %v797_v48 = vpop.f32.mrb[1].mxu1 }
 0x398   : > { %v798_v49 = vadd.f32 %v909_v45, %v797_v48 }
 0x399   : > { %v807_v50 = vadd.f32 %v803_v47, %v1142_v4 }
 0x39a   : > { %v806_v51 = vadd.f32 %v798_v49, %v1140_v3 }
 0x39b   : > { %809 = vst.msk [vmem:[%s426_s15 + $0x8] sm:$0xff] %vm433_vm0, %v807_v50 }
 0x39c   : > { %808 = vst.msk [vmem:[%s426_s15] sm:$0xff] %vm433_vm0, %v806_v51 }
 0x39d PF: > { %s21_s17 = sadd.s32 1, %s1051_s17  }
 0x39e   : > { %p18_p4 = scmp.ge.s32.totalorder %s21_s17, 4  }
 0x3a0   :  { %20 = sbr.rel (!%p18_p4) target bundleno = 1 (0x1), region = 100 }

// kernel: deco_convnet_forward.31
= control target key start
LH: loop header
LB: loop body
LE: loop exit
PB: predicated region body
PF: predicated region fallthrough
CT: control target
= control target key end

     0   :  { %vm18_vm0 = vcmask 261120   ;;  %s174_s0 = inlined_call_operand.vmem [shape: f32[32,32], index: 0, kind: input, shape index: {}]   ;;  %s175_s1 = inlined_call_operand.vmem [shape: f32[1,32], index: 1, kind: input, shape index: {}]   ;;  %s176_s2 = inlined_call_operand.vmem [shape: f32[1,32], index: 2, kind: input, shape index: {}]   ;;  %s177_s3 = inlined_call_operand.vmem [shape: f32[32,32], index: 3, kind: output, shape index: {}]  }
   0x1   :  { %v14_v0 = vld [vmem:[%s174_s0] sm:$0xff]  ;;  %v16_v1 = vld [vmem:[%s174_s0 + $0x10] sm:$0xff]  ;;  %v15_v2 = vld [vmem:[%s174_s0 + $0x8] sm:$0xff] }
   0x2   :  { %v19_v3 = vsel %vm18_vm0, %v14_v0, 0.0  ;;  %v25_v4 = vsel %vm18_vm0, %v16_v1, 0.0  ;;  %v17_v5 = vld [vmem:[%s174_s0 + $0x18] sm:$0xff]  ;;  %v22_v6 = vsel %vm18_vm0, %v15_v2, 0.0  ;;  %v102_v41 = vld [vmem:[%s175_s1] ss:$0 sm:$0xff] }
   0x3   :  { %20 = vadd.xlane.f32.xlu0 %v19_v3  ;;  %26 = vadd.xlane.f32.xlu1 %v25_v4  ;;  %v28_v7 = vsel %vm18_vm0, %v17_v5, 0.0  ;;  %v103_v43 = vld [vmem:[%s176_s2] ss:$0 sm:$0xff] }
   0x7   :  { %23 = vadd.xlane.f32.xlu0 %v22_v6  ;;  %29 = vadd.xlane.f32.xlu1 %v28_v7 }
  0x90   :  { %v21_v8 = vpop.xlane.xlu0 %20  ;;  %v27_v9 = vpop.xlane.xlu1 %26 }
  0x91   :  { %v32_v10 = vmul.f32 0.03125, %v21_v8  ;;  %v34_v11 = vmul.f32 0.03125, %v27_v9 }
  0x93   :  { %v36_v12 = vsub.f32 %v14_v0, %v32_v10  ;;  %v38_v13 = vsub.f32 %v16_v1, %v34_v11 }
  0x94   :  { %v24_v14 = vpop.xlane.xlu0 %23  ;;  %v30_v15 = vpop.xlane.xlu1 %29 }
  0x95   :  { %v33_v16 = vmul.f32 0.03125, %v24_v14  ;;  %v35_v17 = vmul.f32 0.03125, %v30_v15  ;;  %v40_v18 = vmul.f32 %v36_v12, %v36_v12  ;;  %v42_v19 = vmul.f32 %v38_v13, %v38_v13 }
  0x97   :  { %v37_v20 = vsub.f32 %v15_v2, %v33_v16  ;;  %v39_v21 = vsub.f32 %v17_v5, %v35_v17  ;;  %v44_v22 = vsel %vm18_vm0, %v40_v18, 0.0  ;;  %v50_v23 = vsel %vm18_vm0, %v42_v19, 0.0 }
  0x98   :  { %45 = vadd.xlane.f32.xlu0 %v44_v22 }
  0x99   :  { %v41_v24 = vmul.f32 %v37_v20, %v37_v20  ;;  %v43_v25 = vmul.f32 %v39_v21, %v39_v21 }
  0x9b   :  { %v47_v26 = vsel %vm18_vm0, %v41_v24, 0.0  ;;  %v53_v27 = vsel %vm18_vm0, %v43_v25, 0.0 }
  0x9c   :  { %51 = vadd.xlane.f32.xlu0 %v50_v23  ;;  %48 = vadd.xlane.f32.xlu1 %v47_v26 }
  0xa0   :  { %54 = vadd.xlane.f32.xlu1 %v53_v27 }
 0x125   :  { %v46_v28 = vpop.xlane.xlu0 %45 }
 0x126   :  { %v56_v29 = vmul.f32 0.03125, %v46_v28 }
 0x128   :  { %v60_v30 = vadd.f32 1e-06, %v56_v29 }
 0x129   :  { %v49_v31 = vpop.xlane.xlu1 %48  ;;  %v52_v32 = vpop.xlane.xlu0 %51 }
 0x12a   :  { %104 = vrsqrt.f32 %v60_v30  ;;  %v57_v33 = vmul.f32 0.03125, %v49_v31  ;;  %v58_v34 = vmul.f32 0.03125, %v52_v32 }
 0x12c   :  { %v61_v35 = vadd.f32 1e-06, %v57_v33  ;;  %v62_v36 = vadd.f32 1e-06, %v58_v34 }
 0x12d   :  { %v55_v37 = vpop.xlane.xlu1 %54 }
 0x12e   :  { %106 = vrsqrt.f32 %v61_v35  ;;  %v59_v38 = vmul.f32 0.03125, %v55_v37 }
 0x12f   :  { %108 = vrsqrt.f32 %v62_v36 }
 0x130   :  { %v63_v39 = vadd.f32 1e-06, %v59_v38 }
 0x132   :  { %110 = vrsqrt.f32 %v63_v39 }
 0x134   :  { %v105_v40 = vpop.eup %104 }
 0x135   :  { %v68_v42 = vmul.f32 %v105_v40, %v36_v12 }
 0x137   :  { %v79_v44 = vmul.f32 %v102_v41, %v68_v42 }
 0x138   :  { %v107_v45 = vpop.eup %106 }
 0x139   :  { %v109_v46 = vpop.eup %108  ;;  %v90_v47 = vadd.f32 %v103_v43, %v79_v44  ;;  %v69_v48 = vmul.f32 %v107_v45, %v37_v20 }
 0x13a   :  { %v70_v49 = vmul.f32 %v109_v46, %v38_v13 }
 0x13b   :  { %94 = vst.msk [vmem:[%s177_s3] sm:$0xff] %vm18_vm0, %v90_v47  ;;  %v80_v50 = vmul.f32 %v102_v41, %v69_v48 }
 0x13c   :  { %v111_v51 = vpop.eup %110  ;;  %v81_v52 = vmul.f32 %v102_v41, %v70_v49 }
 0x13d   :  { %v91_v53 = vadd.f32 %v103_v43, %v80_v50  ;;  %v71_v54 = vmul.f32 %v111_v51, %v39_v21 }
 0x13e   :  { %v92_v55 = vadd.f32 %v103_v43, %v81_v52 }
 0x13f   :  { %95 = vst.msk [vmem:[%s177_s3 + $0x8] sm:$0xff] %vm18_vm0, %v91_v53  ;;  %v82_v56 = vmul.f32 %v102_v41, %v71_v54 }
 0x140   :  { %96 = vst.msk [vmem:[%s177_s3 + $0x10] sm:$0xff] %vm18_vm0, %v92_v55 }
 0x141   :  { %v93_v57 = vadd.f32 %v103_v43, %v82_v56 }
 0x143   :  { %97 = vst.msk [vmem:[%s177_s3 + $0x18] sm:$0xff] %vm18_vm0, %v93_v57 }

// kernel: deco_convnet_forward.32
= control target key start
LH: loop header
LB: loop body
LE: loop exit
PB: predicated region body
PF: predicated region fallthrough
CT: control target
= control target key end

     0   :  { %s1024_s13 = smov 0   ;;  %s1147_s0 = inlined_call_operand.vmem [shape: f32[2,16,32], index: 0, kind: input, shape index: {}]   ;;  %s1148_s1 = inlined_call_operand.vmem [shape: f32[2,16,1], index: 1, kind: input, shape index: {}]   ;;  %s1149_s2 = inlined_call_operand.vmem [shape: f32[7,32], index: 2, kind: input, shape index: {}]   ;;  %s1150_s3 = inlined_call_operand.vmem [shape: f32[1,32], index: 3, kind: input, shape index: {}]   ;;  %s1151_s4 = inlined_call_operand.vmem [shape: f32[1,32], index: 4, kind: input, shape index: {}]   ;;  %s1152_s5 = inlined_call_operand.vmem [shape: f32[1,32], index: 5, kind: input, shape index: {}]   ;;  %s1153_s6 = inlined_call_operand.vmem [shape: f32[32,128], index: 6, kind: input, shape index: {}]   ;;  %s1154_s7 = inlined_call_operand.vmem [shape: f32[1,128], index: 7, kind: input, shape index: {}]   ;;  %s1155_s8 = inlined_call_operand.vmem [shape: f32[128,32], index: 8, kind: input, shape index: {}]   ;;  %s1156_s9 = inlined_call_operand.vmem [shape: f32[1,32], index: 9, kind: input, shape index: {}]   ;;  %s1157_s10 = inlined_call_operand.vmem [shape: f32[2,16,32], index: 10, kind: output, shape index: {}]  }
   0x1 LB: > { %s807_s14 = sadd.s32 4294967295, %s965_s13   ;;  %p811_p0 = scmp.ge.s32.totalorder %s965_s13, 1  ;;  %s965_s13 = sphi %s1024_s13, %s20_s13  }
   0x2   : > { %p322_p1 = scmp.lt.s32.totalorder %s965_s13, 3 }
   0x4   : > { %p323_p2 = pnand %p811_p0, %p322_p1 }
   0x5   : > { %p365_p3 = scmp.lt.s32.totalorder (!%p323_p2), %s807_s14, 1  ;;  %vm382_vm0 = vcmask (!%p323_p2), 261120   ;;  %vm385_vm1 = vcmask (!%p323_p2), 259072   ;;  %v967_v0 = vmov (!%p323_p2), 0   ;;  %v968_v1 = vmov (!%p323_p2), 0.0  }
   0x6   : > { %326 = sbr.rel (%p323_p2) target bundleno = 925 (0x39d), region = 60  ;;  %950 = vset.pattern.permute.xlu0 (!%p323_p2), %v967_v0  ;;  %383 = vst.msk [vmem:[#allocation2] sm:$0xff] (!%p323_p2), %vm382_vm0, %v968_v1  ;;  %384 = vst.msk [vmem:[#allocation2 + $0x8] sm:$0xff] (!%p323_p2), %vm382_vm0, %v968_v1  ;;  %v392_v6 = vlaneseq (!%p323_p2)  ;;  %v389_v10 = vld [vmem:[%s1149_s2] sm:$0x7f] (!%p323_p2) }
   0x7   : > { %386 = vst.msk [vmem:[#allocation2 + $0x10] sm:$0x3f] (!%p323_p2), %vm385_vm1, %v968_v1  ;;  %v818_v62 = vld [vmem:[%s1150_s3] ss:$0 sm:$0xff] (!%p323_p2) }
   0x8   : > { %v393_v7 = vshrl.u32 (!%p323_p2), %v392_v6, 7 }
   0xa   : > { %v394_v8 = vsub.s32 (!%p323_p2), 0, %v393_v7  ;;  %v404_v9 = vsub.s32 (!%p323_p2), 1, %v393_v7  ;;  %v414_v13 = vsub.s32 (!%p323_p2), 2, %v393_v7  ;;  %v424_v16 = vsub.s32 (!%p323_p2), 3, %v393_v7 }
   0xb   : > { %v434_v24 = vsub.s32 (!%p323_p2), 4, %v393_v7  ;;  %v444_v32 = vsub.s32 (!%p323_p2), 5, %v393_v7  ;;  %v454_v40 = vsub.s32 (!%p323_p2), 6, %v393_v7 }
   0xc   : > { %v395_v11 = vrot.slane (!%p323_p2), %v389_v10, %v394_v8  ;;  %v405_v12 = vrot.slane (!%p323_p2), %v389_v10, %v404_v9  ;;  %v415_v17 = vrot.slane (!%p323_p2), %v389_v10, %v414_v13  ;;  %v425_v23 = vrot.slane (!%p323_p2), %v389_v10, %v424_v16 }
   0xd   : > { %s1159_s14 = smov (!%p365_p3, %s807_s14), 1  ;;  %v435_v31 = vrot.slane %v389_v10, %v434_v24  ;;  %v445_v39 = vrot.slane %v389_v10, %v444_v32  ;;  %v455_v47 = vrot.slane %v389_v10, %v454_v40  ;;  %v531_v24 = vld [vmem:[%s1153_s6 + $0x18] sm:$0xff] }
   0xe   : > { %s1034_s15 = sshll.u32 %s1159_s14, 4 }
   0xf   : > { %s374_s18 = scalar_lea.vmem %s1148_s1, %s1034_s15  ;;  %s369_s21 = scalar_lea.vmem %s1147_s0, %s1034_s15 }
  0x10   : > { %v469_v2 = vld [vmem:[%s374_s18] sm:$0xff]  ;;  %v1046_v4 = vld [vmem:[%s369_s21 + $0x8] sm:$0xff]  ;;  %s379_s22 = scalar_lea.vmem %s1157_s10, %s1034_s15 }
  0x11   : > { %473 = vperm.xlu0 %950, %v469_v2   ;;  %v1044_v3 = vld [vmem:[%s369_s21] sm:$0xff]  ;;  %388 = vst.msk [vmem:[#allocation2 + $0xb] sm:$0xff] %vm382_vm0, %v1046_v4  ;;  %v470_v5 = vld [vmem:[%s374_s18 + $0x8] sm:$0xff] }
  0x12   : > { %387 = vst.msk [vmem:[#allocation2 + $0x3] sm:$0xff] %vm382_vm0, %v1044_v3 }
  0x15   : > { %478 = vperm.xlu0 %950, %v470_v5  }
  0x18   : > { %v421_v38 = vld [vmem:[#allocation2 + $0xb] sm:$0xff] }
  0x19   : > { %v390_v14 = vld [vmem:[#allocation2] sm:$0xff]  ;;  %v391_v21 = vld [vmem:[#allocation2 + $0x8] sm:$0xff]  ;;  %v427_v44 = vmul.f32 %v425_v23, %v421_v38 }
  0x1a   : > { %v400_v15 = vld [vmem:[#allocation2 + $0x1] sm:$0xff]  ;;  %v396_v18 = vmul.f32 %v395_v11, %v390_v14  ;;  %v401_v22 = vld [vmem:[#allocation2 + $0x9] sm:$0xff]  ;;  %v397_v27 = vmul.f32 %v395_v11, %v391_v21 }
  0x1b   : > { %v406_v19 = vmul.f32 %v405_v12, %v400_v15  ;;  %v410_v20 = vld [vmem:[#allocation2 + $0x2] sm:$0xff]  ;;  %v407_v28 = vmul.f32 %v405_v12, %v401_v22  ;;  %v411_v30 = vld [vmem:[#allocation2 + $0xa] sm:$0xff] }
  0x1c   : > { %v416_v26 = vmul.f32 %v415_v17, %v410_v20  ;;  %v420_v29 = vld [vmem:[#allocation2 + $0x3] sm:$0xff]  ;;  %v417_v36 = vmul.f32 %v415_v17, %v411_v30  ;;  %v431_v46 = vld [vmem:[#allocation2 + $0xc] sm:$0xff] }
  0x1d   : > { %v408_v25 = vadd.f32 %v406_v19, %v396_v18  ;;  %v426_v34 = vmul.f32 %v425_v23, %v420_v29  ;;  %v409_v35 = vadd.f32 %v407_v28, %v397_v27  ;;  %v430_v37 = vld [vmem:[#allocation2 + $0x4] sm:$0xff]  ;;  %v437_v51 = vmul.f32 %v435_v31, %v431_v46  ;;  %v441_v53 = vld [vmem:[#allocation2 + $0xd] sm:$0xff]  ;;  %v641_v46 = vld [vmem:[%s1155_s8 + $0x18] sm:$0xff] }
  0x1e   : > { %v436_v42 = vmul.f32 %v435_v31, %v430_v37  ;;  %v440_v45 = vld [vmem:[#allocation2 + $0x5] sm:$0xff]  ;;  %v447_v57 = vmul.f32 %v445_v39, %v441_v53  ;;  %v451_v58 = vld [vmem:[#allocation2 + $0xe] sm:$0xff] }
  0x1f   : > { %v418_v33 = vadd.f32 %v416_v26, %v408_v25  ;;  %v419_v43 = vadd.f32 %v417_v36, %v409_v35  ;;  %v446_v49 = vmul.f32 %v445_v39, %v440_v45  ;;  %v450_v52 = vld [vmem:[#allocation2 + $0x6] sm:$0xff]  ;;  %v457_v61 = vmul.f32 %v455_v47, %v451_v58  ;;  %v530_v22 = vld [vmem:[%s1153_s6 + $0x10] sm:$0xff]  ;;  %v820_v35 = vld [vmem:[%s1152_s5] ss:$0 sm:$0xff] }
  0x20   : > { %v456_v55 = vmul.f32 %v455_v47, %v450_v52  ;;  %v528_v20 = vld [vmem:[%s1153_s6] sm:$0xff]  ;;  %v529_v21 = vld [vmem:[%s1153_s6 + $0x8] sm:$0xff]  ;;  %v904_v25 = vpack.c.bf16 %v531_v24, %v530_v22  ;;  %v640_v45 = vld [vmem:[%s1155_s8 + $0x10] sm:$0xff] }
  0x21   : > { %v428_v41 = vadd.f32 %v426_v34, %v418_v33  ;;  %v429_v50 = vadd.f32 %v427_v44, %v419_v43  ;;  %v900_v23 = vpack.c.bf16 %v529_v21, %v528_v20  ;;  %v819_v33 = vld [vmem:[%s1151_s4] ss:$0 sm:$0xff]  ;;  %v639_v43 = vld [vmem:[%s1155_s8 + $0x8] sm:$0xff]  ;;  %v912_v47 = vpack.c.bf16 %v641_v46, %v640_v45  ;;  %v645_v52 = vld [vmem:[%s1155_s8 + $0x38] sm:$0xff] }
  0x22   : > { %v649_v58 = vld [vmem:[%s1155_s8 + $0x58] sm:$0xff] }
  0x23   : > { %v438_v48 = vadd.f32 %v436_v42, %v428_v41  ;;  %v439_v56 = vadd.f32 %v437_v51, %v429_v50  ;;  %901 = vmatprep.subr.bf16.mxu0 %v900_v23  ;;  %v638_v42 = vld [vmem:[%s1155_s8] sm:$0xff]  ;;  %v644_v51 = vld [vmem:[%s1155_s8 + $0x30] sm:$0xff] }
  0x24   : > { %903 = vmatpush3.bf16.msra.mxu0 %v900_v23  ;;  %v908_v44 = vpack.c.bf16 %v639_v43, %v638_v42  ;;  %v920_v53 = vpack.c.bf16 %v645_v52, %v644_v51 }
  0x25   : > { %v448_v54 = vadd.f32 %v446_v49, %v438_v48  ;;  %v449_v60 = vadd.f32 %v447_v57, %v439_v56  ;;  %905 = vmatprep.subr.bf16.mxu0 %v904_v25  ;;  %v642_v48 = vld [vmem:[%s1155_s8 + $0x20] sm:$0xff]  ;;  %v643_v49 = vld [vmem:[%s1155_s8 + $0x28] sm:$0xff]  ;;  %v648_v56 = vld [vmem:[%s1155_s8 + $0x50] sm:$0xff] }
  0x26   : > { %909 = vmatprep.subr.bf16.mxu1 %v908_v44  ;;  %v916_v50 = vpack.c.bf16 %v643_v49, %v642_v48 }
  0x27   : > { %v458_v59 = vadd.f32 %v456_v55, %v448_v54  ;;  %v459_v0 = vadd.f32 %v457_v61, %v449_v60  ;;  %911 = vmatpush3.bf16.msra.mxu1 %v908_v44  ;;  %v646_v54 = vld [vmem:[%s1155_s8 + $0x40] sm:$0xff]  ;;  %v647_v55 = vld [vmem:[%s1155_s8 + $0x48] sm:$0xff] }
  0x28   : > { %907 = vmatpush3.bf16.msra.mxu0 %v904_v25  ;;  %913 = vmatprep.subr.bf16.mxu1 %v912_v47  ;;  %v924_v57 = vpack.c.bf16 %v647_v55, %v646_v54  ;;  %v650_v60 = vld [vmem:[%s1155_s8 + $0x60] sm:$0xff]  ;;  %v651_v61 = vld [vmem:[%s1155_s8 + $0x68] sm:$0xff] }
  0x29   : > { %v467_v63 = vadd.f32 %v818_v62, %v458_v59  ;;  %v468_v5 = vadd.f32 %v818_v62, %v459_v0  ;;  %v928_v59 = vpack.c.bf16 %v649_v58, %v648_v56  ;;  %v932_v62 = vpack.c.bf16 %v651_v61, %v650_v60  ;;  %v653_v0 = vld [vmem:[%s1155_s8 + $0x78] sm:$0xff] }
  0x2b   : > { %915 = vmatpush3.bf16.msra.mxu1 %v912_v47 }
  0x2c   : > { %917 = vmatprep.subr.bf16.mxu1 %v916_v50 }
  0x2f   : > { %919 = vmatpush3.bf16.msra.mxu1 %v916_v50 }
  0x30   : > { %921 = vmatprep.subr.bf16.mxu1 %v920_v53 }
  0x33   : > { %923 = vmatpush3.bf16.msra.mxu1 %v920_v53 }
  0x34   : > { %925 = vmatprep.subr.bf16.mxu1 %v924_v57 }
  0x37   : > { %927 = vmatpush3.bf16.msra.mxu1 %v924_v57 }
  0x38   : > { %929 = vmatprep.subr.bf16.mxu1 %v928_v59 }
  0x3b   : > { %931 = vmatpush3.bf16.msra.mxu1 %v928_v59 }
  0x3c   : > { %933 = vmatprep.subr.bf16.mxu1 %v932_v62 }
  0x3f   : > { %935 = vmatpush3.bf16.msra.mxu1 %v932_v62 }
  0x90   : > { %v474_v1 = vpop.permute.xlu0 %473 }
  0x91   : > { %v481_v2 = vmul.f32 %v474_v1, %v467_v63  ;;  %v652_v63 = vld [vmem:[%s1155_s8 + $0x70] sm:$0xff] }
  0x92   : > { %v936_v1 = vpack.c.bf16 %v653_v0, %v652_v63 }
  0x93   : > { %v483_v6 = vsel %vm382_vm0, %v481_v2, 0.0 }
  0x94   : > { %v479_v7 = vpop.permute.xlu0 %478  ;;  %484 = vadd.xlane.f32.xlu1 %v483_v6  ;;  %937 = vmatprep.subr.bf16.mxu1 %v936_v1 }
  0x95   : > { %v482_v8 = vmul.f32 %v479_v7, %v468_v5  ;;  %939 = vmatpush3.bf16.msra.mxu1 %v936_v1 }
  0x97   : > { %v486_v9 = vsel %vm382_vm0, %v482_v8, 0.0 }
  0x98   : > { %487 = vadd.xlane.f32.xlu1 %v486_v9 }
 0x121   : > { %v485_v10 = vpop.xlane.xlu1 %484 }
 0x122   : > { %v490_v11 = vmul.f32 0.03125, %v485_v10 }
 0x124   : > { %v492_v12 = vsub.f32 %v481_v2, %v490_v11  ;;  %v821_v2 = vld [vmem:[%s1154_s7] ss:$0 sm:$0xff] }
 0x125   : > { %v488_v13 = vpop.xlane.xlu1 %487 }
 0x126   : > { %v491_v14 = vmul.f32 0.03125, %v488_v13  ;;  %v494_v15 = vmul.f32 %v492_v12, %v492_v12 }
 0x128   : > { %v493_v16 = vsub.f32 %v482_v8, %v491_v14  ;;  %v496_v17 = vsel %vm382_vm0, %v494_v15, 0.0 }
 0x129   : > { %497 = vadd.xlane.f32.xlu0 %v496_v17 }
 0x12a   : > { %v495_v18 = vmul.f32 %v493_v16, %v493_v16 }
 0x12c   : > { %v499_v19 = vsel %vm382_vm0, %v495_v18, 0.0 }
 0x12d   : > { %500 = vadd.xlane.f32.xlu1 %v499_v19 }
 0x1b6   : > { %v498_v26 = vpop.xlane.xlu0 %497 }
 0x1b7   : > { %v502_v27 = vmul.f32 0.03125, %v498_v26 }
 0x1b9   : > { %v504_v28 = vadd.f32 1e-06, %v502_v27  ;;  %v824_v27 = vld [vmem:[%s1156_s9] ss:$0 sm:$0xff] }
 0x1ba   : > { %v501_v29 = vpop.xlane.xlu1 %500 }
 0x1bb   : > { %951 = vrsqrt.f32 %v504_v28  ;;  %v503_v30 = vmul.f32 0.03125, %v501_v29 }
 0x1bd   : > { %v505_v31 = vadd.f32 1e-06, %v503_v30 }
 0x1bf   : > { %953 = vrsqrt.f32 %v505_v31 }
 0x1c5   : > { %v952_v32 = vpop.eup %951 }
 0x1c6   : > { %v508_v34 = vmul.f32 %v952_v32, %v492_v12 }
 0x1c8   : > { %v517_v36 = vmul.f32 %v819_v33, %v508_v34 }
 0x1c9   : > { %v954_v37 = vpop.eup %953 }
 0x1ca   : > { %v509_v38 = vmul.f32 %v954_v37, %v493_v16  ;;  %v526_v39 = vadd.f32 %v820_v35, %v517_v36 }
 0x1cc   : > { %v518_v40 = vmul.f32 %v819_v33, %v509_v38  ;;  %862 = vmatprep.mubr.msk.f32.mxu0 %vm382_vm0, %v526_v39 }
 0x1ce   : > { %v527_v41 = vadd.f32 %v820_v35, %v518_v40 }
 0x1d0   : > { %863 = vmatmul.mubr.msk.f32.vlgmr.msra.gmra.mrb[0].mxu0 %vm382_vm0, %v527_v41 }
 0x2a3   : > { %v864_v5 = vpop.f32.mrb[0].mxu0 }
 0x2a4   : > { %v617_v6 = vadd.f32 %v864_v5, %v821_v2  ;;  %v611_v7 = vpop.f32.mrb[1].mxu0 }
 0x2a5   : > { %v612_v8 = vadd.f32 %v821_v2, %v611_v7 }
 0x2a6   : > { %v621_v9 = vmul.f32 %v617_v6, %v617_v6 }
 0x2a7   : > { %v620_v10 = vmul.f32 %v612_v8, %v612_v8 }
 0x2a8   : > { %v623_v11 = vmul.f32 %v621_v9, %v617_v6 }
 0x2a9   : > { %v622_v12 = vmul.f32 %v620_v10, %v612_v8 }
 0x2aa   : > { %v625_v13 = vmul.f32 0.044715, %v623_v11 }
 0x2ab   : > { %v624_v14 = vmul.f32 0.044715, %v622_v12 }
 0x2ac   : > { %v627_v15 = vadd.f32 %v625_v13, %v617_v6 }
 0x2ad   : > { %v626_v16 = vadd.f32 %v624_v14, %v612_v8 }
 0x2ae   : > { %v629_v17 = vmul.f32 0.7978846, %v627_v15 }
 0x2af   : > { %v628_v18 = vmul.f32 0.7978846, %v626_v16 }
 0x2b0   : > { %955 = vtanh.f32 %v629_v17 }
 0x2b1   : > { %957 = vtanh.f32 %v628_v18 }
 0x2ba   : > { %v956_v19 = vpop.eup %955 }
 0x2bb   : > { %v958_v20 = vpop.eup %957  ;;  %v633_v21 = vadd.f32 1.0, %v956_v19 }
 0x2bc   : > { %v632_v22 = vadd.f32 1.0, %v958_v20 }
 0x2bd   : > { %v635_v23 = vmul.f32 0.5, %v633_v21 }
 0x2be   : > { %v634_v24 = vmul.f32 0.5, %v632_v22 }
 0x2bf   : > { %v637_v26 = vmul.f32 %v635_v23, %v617_v6 }
 0x2c0   : > { %v636_v25 = vmul.f32 %v634_v24, %v612_v8 }
 0x2c2   : > { %897 = vmatprep.mubr.f32.mxu1 %v636_v25 }
 0x2c3   : > { %898 = vmatmul.mubr.f32.vlgmr.msra.gmra.mrb[0].mxu1 %v637_v26 }
 0x396   : > { %v899_v28 = vpop.f32.mrb[0].mxu1 }
 0x397   : > { %v733_v29 = vadd.f32 %v899_v28, %v824_v27  ;;  %v727_v30 = vpop.f32.mrb[1].mxu1 }
 0x398   : > { %v728_v31 = vadd.f32 %v824_v27, %v727_v30 }
 0x399   : > { %v737_v32 = vadd.f32 %v733_v29, %v1046_v4 }
 0x39a   : > { %v736_v33 = vadd.f32 %v728_v31, %v1044_v3 }
 0x39b   : > { %739 = vst.msk [vmem:[%s379_s22 + $0x8] sm:$0xff] %vm382_vm0, %v737_v32 }
 0x39c   : > { %738 = vst.msk [vmem:[%s379_s22] sm:$0xff] %vm382_vm0, %v736_v33 }
 0x39d PF: > { %s20_s13 = sadd.s32 1, %s965_s13  }
 0x39e   : > { %p17_p4 = scmp.ge.s32.totalorder %s20_s13, 4  }
 0x3a0   :  { %19 = sbr.rel (!%p17_p4) target bundleno = 1 (0x1), region = 93 }

// kernel: deco_convnet_forward.46
= control target key start
LH: loop header
LB: loop body
LE: loop exit
PB: predicated region body
PF: predicated region fallthrough
CT: control target
= control target key end

     0   :  { %s1117_s17 = smov 0   ;;  %s1256_s0 = inlined_call_operand.vmem [shape: f32[2,16,32], index: 0, kind: input, shape index: {}]   ;;  %s1257_s1 = inlined_call_operand.vmem [shape: f32[2,16,32], index: 1, kind: input, shape index: {}]   ;;  %s1258_s2 = inlined_call_operand.vmem [shape: f32[2,16,1], index: 2, kind: input, shape index: {}]   ;;  %s1259_s3 = inlined_call_operand.vmem [shape: f32[9,32], index: 3, kind: input, shape index: {}]   ;;  %s1260_s4 = inlined_call_operand.vmem [shape: f32[1,32], index: 4, kind: input, shape index: {}]   ;;  %s1261_s5 = inlined_call_operand.vmem [shape: f32[1,32], index: 5, kind: input, shape index: {}]   ;;  %s1262_s6 = inlined_call_operand.vmem [shape: f32[1,32], index: 6, kind: input, shape index: {}]   ;;  %s1263_s7 = inlined_call_operand.vmem [shape: f32[32,128], index: 7, kind: input, shape index: {}]   ;;  %s1264_s8 = inlined_call_operand.vmem [shape: f32[1,128], index: 8, kind: input, shape index: {}]   ;;  %s1265_s9 = inlined_call_operand.vmem [shape: f32[128,32], index: 9, kind: input, shape index: {}]   ;;  %s1266_s10 = inlined_call_operand.vmem [shape: f32[1,32], index: 10, kind: input, shape index: {}]   ;;  %s1267_s11 = inlined_call_operand.vmem [shape: f32[2,16,32], index: 11, kind: output, shape index: {}]  }
   0x1 LB: > { %s891_s18 = sadd.s32 4294967295, %s1053_s17   ;;  %p895_p0 = scmp.ge.s32.totalorder %s1053_s17, 1  ;;  %s1053_s17 = sphi %s1117_s17, %s21_s17  }
   0x2   : > { %p357_p1 = scmp.lt.s32.totalorder %s1053_s17, 3 }
   0x4   : > { %p358_p2 = pnand %p895_p0, %p357_p1 }
   0x5   : > { %p407_p3 = scmp.lt.s32.totalorder (!%p358_p2), %s891_s18, 1  ;;  %vm433_vm0 = vcmask (!%p358_p2), 261120   ;;  %v1055_v0 = vmov (!%p358_p2), 0   ;;  %v1056_v1 = vmov (!%p358_p2), 0.0   ;;  %v443_v10 = vlaneseq (!%p358_p2)  ;;  %v439_v14 = vld [vmem:[%s1259_s3] sm:$0xff] (!%p358_p2) }
   0x6   : > { %361 = sbr.rel (%p358_p2) target bundleno = 927 (0x39f), region = 64  ;;  %1038 = vset.pattern.permute.xlu0 (!%p358_p2), %v1055_v0  ;;  %434 = vst.msk [vmem:[#allocation2] sm:$0xff] (!%p358_p2), %vm433_vm0, %v1056_v1  ;;  %435 = vst.msk [vmem:[#allocation2 + $0x8] sm:$0xff] (!%p358_p2), %vm433_vm0, %v1056_v1 }
   0x7   : > { %436 = vst.msk [vmem:[#allocation2 + $0x10] sm:$0xff] (!%p358_p2), %vm433_vm0, %v1056_v1  ;;  %v444_v11 = vshrl.u32 (!%p358_p2), %v443_v10, 7 }
   0x9   : > { %v445_v12 = vsub.s32 (!%p358_p2), 0, %v444_v11  ;;  %v455_v13 = vsub.s32 (!%p358_p2), 1, %v444_v11  ;;  %v465_v17 = vsub.s32 (!%p358_p2), 2, %v444_v11  ;;  %v475_v20 = vsub.s32 (!%p358_p2), 3, %v444_v11 }
   0xa   : > { %v485_v28 = vsub.s32 (!%p358_p2), 4, %v444_v11  ;;  %v495_v36 = vsub.s32 (!%p358_p2), 5, %v444_v11  ;;  %v505_v44 = vsub.s32 (!%p358_p2), 6, %v444_v11  ;;  %v515_v52 = vsub.s32 (!%p358_p2), 7, %v444_v11 }
   0xb   : > { %v446_v15 = vrot.slane (!%p358_p2), %v439_v14, %v445_v12  ;;  %v456_v16 = vrot.slane (!%p358_p2), %v439_v14, %v455_v13  ;;  %v466_v21 = vrot.slane (!%p358_p2), %v439_v14, %v465_v17  ;;  %v476_v27 = vrot.slane (!%p358_p2), %v439_v14, %v475_v20 }
   0xc   : > { %v486_v35 = vrot.slane (!%p358_p2), %v439_v14, %v485_v28  ;;  %v496_v43 = vrot.slane (!%p358_p2), %v439_v14, %v495_v36  ;;  %v506_v51 = vrot.slane (!%p358_p2), %v439_v14, %v505_v44  ;;  %v516_v59 = vrot.slane (!%p358_p2), %v439_v14, %v515_v52 }
   0xd   : > { %s1269_s18 = smov (!%p407_p3, %s891_s18), 1 }
   0xe   : > { %s1128_s19 = sshll.u32 %s1269_s18, 4 }
   0xf   : > { %s421_s22 = scalar_lea.vmem %s1258_s2, %s1128_s19  ;;  %s416_s25 = scalar_lea.vmem %s1257_s1, %s1128_s19 }
  0x10   : > { %v539_v2 = vld [vmem:[%s421_s22] sm:$0xff]  ;;  %v430_v4 = vld [vmem:[%s416_s25 + $0x8] sm:$0xff]  ;;  %s411_s28 = scalar_lea.vmem %s1256_s0, %s1128_s19  ;;  %s426_s15 = scalar_lea.vmem %s1267_s11, %s1128_s19 }
  0x11   : > { %v429_v3 = vld [vmem:[%s416_s25] sm:$0xff]  ;;  %543 = vperm.xlu0 %1038, %v539_v2   ;;  %v1144_v6 = vld [vmem:[%s411_s28 + $0x8] sm:$0xff] }
  0x12   : > { %v1142_v5 = vld [vmem:[%s411_s28] sm:$0xff]  ;;  %v540_v7 = vld [vmem:[%s421_s22 + $0x8] sm:$0xff]  ;;  %v432_v9 = vadd.f32 %v430_v4, %v1144_v6 }
  0x13   : > { %v431_v8 = vadd.f32 %v429_v3, %v1142_v5 }
  0x14   : > { %438 = vst.msk [vmem:[#allocation2 + $0xc] sm:$0xff] %vm433_vm0, %v432_v9 }
  0x15   : > { %437 = vst.msk [vmem:[#allocation2 + $0x4] sm:$0xff] %vm433_vm0, %v431_v8  ;;  %548 = vperm.xlu0 %1038, %v540_v7   ;;  %v904_v8 = vld [vmem:[%s1259_s3 + $0x8] ss:$0 sm:$0xff] }
  0x1b   : > { %v482_v50 = vld [vmem:[#allocation2 + $0xc] sm:$0xff] }
  0x1c   : > { %v441_v18 = vld [vmem:[#allocation2] sm:$0xff]  ;;  %v442_v24 = vld [vmem:[#allocation2 + $0x8] sm:$0xff]  ;;  %v488_v56 = vmul.f32 %v486_v35, %v482_v50  ;;  %v521_v14 = vld [vmem:[#allocation2 + $0x10] sm:$0xff] }
  0x1d   : > { %v451_v19 = vld [vmem:[#allocation2 + $0x1] sm:$0xff]  ;;  %v447_v22 = vmul.f32 %v446_v15, %v441_v18  ;;  %v452_v25 = vld [vmem:[#allocation2 + $0x9] sm:$0xff]  ;;  %v448_v29 = vmul.f32 %v446_v15, %v442_v24  ;;  %v526_v11 = vmul.f32 %v904_v8, %v442_v24  ;;  %v527_v17 = vmul.f32 %v904_v8, %v521_v14  ;;  %v905_v18 = vld [vmem:[%s1260_s4] ss:$0 sm:$0xff] }
  0x1e   : > { %v457_v23 = vmul.f32 %v456_v16, %v451_v19  ;;  %v461_v26 = vld [vmem:[#allocation2 + $0x2] sm:$0xff]  ;;  %v458_v30 = vmul.f32 %v456_v16, %v452_v25  ;;  %v462_v33 = vld [vmem:[#allocation2 + $0xa] sm:$0xff]  ;;  %v717_v8 = vld [vmem:[%s1265_s9 + $0x38] sm:$0xff] }
  0x1f   : > { %v467_v32 = vmul.f32 %v466_v21, %v461_v26  ;;  %v471_v34 = vld [vmem:[#allocation2 + $0x3] sm:$0xff]  ;;  %v468_v38 = vmul.f32 %v466_v21, %v462_v33  ;;  %v472_v42 = vld [vmem:[#allocation2 + $0xb] sm:$0xff]  ;;  %v721_v14 = vld [vmem:[%s1265_s9 + $0x58] sm:$0xff] }
  0x20   : > { %v459_v31 = vadd.f32 %v457_v23, %v447_v22  ;;  %v460_v37 = vadd.f32 %v458_v30, %v448_v29  ;;  %v477_v40 = vmul.f32 %v476_v27, %v471_v34  ;;  %v481_v41 = vld [vmem:[#allocation2 + $0x4] sm:$0xff]  ;;  %v478_v48 = vmul.f32 %v476_v27, %v472_v42  ;;  %v492_v58 = vld [vmem:[#allocation2 + $0xd] sm:$0xff]  ;;  %v603_v42 = vld [vmem:[%s1263_s7 + $0x18] sm:$0xff] }
  0x21   : > { %v487_v47 = vmul.f32 %v486_v35, %v481_v41  ;;  %v491_v49 = vld [vmem:[#allocation2 + $0x5] sm:$0xff]  ;;  %v498_v63 = vmul.f32 %v496_v43, %v492_v58  ;;  %v502_v1 = vld [vmem:[#allocation2 + $0xe] sm:$0xff] }
  0x22   : > { %v469_v39 = vadd.f32 %v467_v32, %v459_v31  ;;  %v470_v45 = vadd.f32 %v468_v38, %v460_v37  ;;  %v497_v54 = vmul.f32 %v496_v43, %v491_v49  ;;  %v501_v57 = vld [vmem:[#allocation2 + $0x6] sm:$0xff]  ;;  %v508_v7 = vmul.f32 %v506_v51, %v502_v1  ;;  %v512_v9 = vld [vmem:[#allocation2 + $0xf] sm:$0xff] }
  0x23   : > { %v507_v61 = vmul.f32 %v506_v51, %v501_v57  ;;  %v511_v0 = vld [vmem:[#allocation2 + $0x7] sm:$0xff]  ;;  %v518_v13 = vmul.f32 %v516_v59, %v512_v9  ;;  %v906_v51 = vld [vmem:[%s1261_s5] ss:$0 sm:$0xff] }
  0x24   : > { %v479_v46 = vadd.f32 %v477_v40, %v469_v39  ;;  %v480_v55 = vadd.f32 %v478_v48, %v470_v45  ;;  %v517_v3 = vmul.f32 %v516_v59, %v511_v0  ;;  %v601_v39 = vld [vmem:[%s1263_s7 + $0x8] sm:$0xff]  ;;  %v602_v40 = vld [vmem:[%s1263_s7 + $0x10] sm:$0xff]  ;;  %v713_v0 = vld [vmem:[%s1265_s9 + $0x18] sm:$0xff] }
  0x25   : > { %v992_v43 = vpack.c.bf16 %v603_v42, %v602_v40 }
  0x26   : > { %v489_v53 = vadd.f32 %v487_v47, %v479_v46  ;;  %v490_v62 = vadd.f32 %v488_v56, %v480_v55 }
  0x28   : > { %v499_v60 = vadd.f32 %v497_v54, %v489_v53  ;;  %v500_v4 = vadd.f32 %v498_v63, %v490_v62  ;;  %v907_v53 = vld [vmem:[%s1262_s6] ss:$0 sm:$0xff]  ;;  %v712_v63 = vld [vmem:[%s1265_s9 + $0x10] sm:$0xff] }
  0x29   : > { %v1000_v1 = vpack.c.bf16 %v713_v0, %v712_v63 }
  0x2a   : > { %v509_v2 = vadd.f32 %v507_v61, %v499_v60  ;;  %v510_v12 = vadd.f32 %v508_v7, %v500_v4  ;;  %v710_v60 = vld [vmem:[%s1265_s9] sm:$0xff]  ;;  %v711_v61 = vld [vmem:[%s1265_s9 + $0x8] sm:$0xff]  ;;  %v716_v7 = vld [vmem:[%s1265_s9 + $0x30] sm:$0xff] }
  0x2b   : > { %v996_v62 = vpack.c.bf16 %v711_v61, %v710_v60  ;;  %v1008_v9 = vpack.c.bf16 %v717_v8, %v716_v7 }
  0x2c   : > { %v519_v10 = vadd.f32 %v517_v3, %v509_v2  ;;  %v520_v16 = vadd.f32 %v518_v13, %v510_v12  ;;  %v714_v2 = vld [vmem:[%s1265_s9 + $0x20] sm:$0xff]  ;;  %v715_v3 = vld [vmem:[%s1265_s9 + $0x28] sm:$0xff]  ;;  %v720_v12 = vld [vmem:[%s1265_s9 + $0x50] sm:$0xff] }
  0x2d   : > { %997 = vmatprep.subr.bf16.mxu1 %v996_v62  ;;  %v1004_v4 = vpack.c.bf16 %v715_v3, %v714_v2 }
  0x2e   : > { %v528_v15 = vadd.f32 %v526_v11, %v519_v10  ;;  %v529_v20 = vadd.f32 %v527_v17, %v520_v16  ;;  %999 = vmatpush3.bf16.msra.mxu1 %v996_v62  ;;  %v718_v10 = vld [vmem:[%s1265_s9 + $0x40] sm:$0xff]  ;;  %v719_v11 = vld [vmem:[%s1265_s9 + $0x48] sm:$0xff] }
  0x2f   : > { %1001 = vmatprep.subr.bf16.mxu1 %v1000_v1  ;;  %v1012_v13 = vpack.c.bf16 %v719_v11, %v718_v10  ;;  %v722_v16 = vld [vmem:[%s1265_s9 + $0x60] sm:$0xff]  ;;  %v723_v17 = vld [vmem:[%s1265_s9 + $0x68] sm:$0xff] }
  0x30   : > { %v537_v19 = vadd.f32 %v905_v18, %v528_v15  ;;  %v538_v23 = vadd.f32 %v905_v18, %v529_v20  ;;  %v1016_v15 = vpack.c.bf16 %v721_v14, %v720_v12  ;;  %v1020_v18 = vpack.c.bf16 %v723_v17, %v722_v16  ;;  %v725_v20 = vld [vmem:[%s1265_s9 + $0x78] sm:$0xff] }
  0x32   : > { %1003 = vmatpush3.bf16.msra.mxu1 %v1000_v1 }
  0x33   : > { %1005 = vmatprep.subr.bf16.mxu1 %v1004_v4 }
  0x36   : > { %1007 = vmatpush3.bf16.msra.mxu1 %v1004_v4 }
  0x37   : > { %1009 = vmatprep.subr.bf16.mxu1 %v1008_v9 }
  0x3a   : > { %1011 = vmatpush3.bf16.msra.mxu1 %v1008_v9 }
  0x3b   : > { %1013 = vmatprep.subr.bf16.mxu1 %v1012_v13 }
  0x3e   : > { %1015 = vmatpush3.bf16.msra.mxu1 %v1012_v13 }
  0x3f   : > { %1017 = vmatprep.subr.bf16.mxu1 %v1016_v15 }
  0x42   : > { %1019 = vmatpush3.bf16.msra.mxu1 %v1016_v15 }
  0x43   : > { %1021 = vmatprep.subr.bf16.mxu1 %v1020_v18 }
  0x46   : > { %1023 = vmatpush3.bf16.msra.mxu1 %v1020_v18 }
  0x90   : > { %v544_v21 = vpop.permute.xlu0 %543 }
  0x91   : > { %v551_v22 = vmul.f32 %v544_v21, %v537_v19  ;;  %v724_v19 = vld [vmem:[%s1265_s9 + $0x70] sm:$0xff] }
  0x92   : > { %v1024_v21 = vpack.c.bf16 %v725_v20, %v724_v19 }
  0x93   : > { %v553_v25 = vadd.f32 %v551_v22, %v1142_v5  ;;  %v908_v22 = vld [vmem:[%s1264_s8] ss:$0 sm:$0xff] }
  0x94   : > { %v549_v26 = vpop.permute.xlu0 %548  ;;  %1025 = vmatprep.subr.bf16.mxu1 %v1024_v21 }
  0x95   : > { %v552_v27 = vmul.f32 %v549_v26, %v538_v23  ;;  %v555_v24 = vsel %vm433_vm0, %v553_v25, 0.0  ;;  %1027 = vmatpush3.bf16.msra.mxu1 %v1024_v21 }
  0x96   : > { %556 = vadd.xlane.f32.xlu1 %v555_v24 }
  0x97   : > { %v554_v28 = vadd.f32 %v552_v27, %v1144_v6  ;;  %v600_v6 = vld [vmem:[%s1263_s7] sm:$0xff] }
  0x98   : > { %v988_v41 = vpack.c.bf16 %v601_v39, %v600_v6 }
  0x99   : > { %v558_v29 = vsel %vm433_vm0, %v554_v28, 0.0 }
  0x9a   : > { %559 = vadd.xlane.f32.xlu1 %v558_v29  ;;  %989 = vmatprep.subr.bf16.mxu0 %v988_v41 }
  0x9b   : > { %991 = vmatpush3.bf16.msra.mxu0 %v988_v41 }
  0x9c   : > { %993 = vmatprep.subr.bf16.mxu0 %v992_v43 }
  0x9f   : > { %995 = vmatpush3.bf16.msra.mxu0 %v992_v43  ;;  %v911_v43 = vld [vmem:[%s1266_s10] ss:$0 sm:$0xff] }
 0x123   : > { %v557_v30 = vpop.xlane.xlu1 %556 }
 0x124   : > { %v562_v31 = vmul.f32 0.03125, %v557_v30 }
 0x126   : > { %v564_v32 = vsub.f32 %v553_v25, %v562_v31 }
 0x127   : > { %v560_v33 = vpop.xlane.xlu1 %559 }
 0x128   : > { %v563_v34 = vmul.f32 0.03125, %v560_v33  ;;  %v566_v35 = vmul.f32 %v564_v32, %v564_v32 }
 0x12a   : > { %v565_v36 = vsub.f32 %v554_v28, %v563_v34  ;;  %v568_v37 = vsel %vm433_vm0, %v566_v35, 0.0 }
 0x12b   : > { %569 = vadd.xlane.f32.xlu0 %v568_v37 }
 0x12c   : > { %v567_v5 = vmul.f32 %v565_v36, %v565_v36 }
 0x12e   : > { %v571_v38 = vsel %vm433_vm0, %v567_v5, 0.0 }
 0x12f   : > { %572 = vadd.xlane.f32.xlu1 %v571_v38 }
 0x1b8   : > { %v570_v44 = vpop.xlane.xlu0 %569 }
 0x1b9   : > { %v574_v45 = vmul.f32 0.03125, %v570_v44 }
 0x1bb   : > { %v576_v46 = vadd.f32 1e-06, %v574_v45 }
 0x1bc   : > { %v573_v47 = vpop.xlane.xlu1 %572 }
 0x1bd   : > { %1039 = vrsqrt.f32 %v576_v46  ;;  %v575_v48 = vmul.f32 0.03125, %v573_v47 }
 0x1bf   : > { %v577_v49 = vadd.f32 1e-06, %v575_v48 }
 0x1c1   : > { %1041 = vrsqrt.f32 %v577_v49 }
 0x1c7   : > { %v1040_v50 = vpop.eup %1039 }
 0x1c8   : > { %v580_v52 = vmul.f32 %v1040_v50, %v564_v32 }
 0x1ca   : > { %v589_v54 = vmul.f32 %v906_v51, %v580_v52 }
 0x1cb   : > { %v1042_v55 = vpop.eup %1041 }
 0x1cc   : > { %v581_v56 = vmul.f32 %v1042_v55, %v565_v36  ;;  %v1183_v57 = vadd.f32 %v907_v53, %v589_v54 }
 0x1ce   : > { %v590_v58 = vmul.f32 %v906_v51, %v581_v56  ;;  %950 = vmatprep.mubr.msk.f32.mxu0 %vm433_vm0, %v1183_v57 }
 0x1d0   : > { %v1187_v59 = vadd.f32 %v907_v53, %v590_v58 }
 0x1d2   : > { %951 = vmatmul.mubr.msk.f32.vlgmr.msra.gmra.mrb[0].mxu0 %vm433_vm0, %v1187_v59 }
 0x2a5   : > { %v952_v23 = vpop.f32.mrb[0].mxu0 }
 0x2a6   : > { %v689_v25 = vadd.f32 %v952_v23, %v908_v22  ;;  %v683_v26 = vpop.f32.mrb[1].mxu0 }
 0x2a7   : > { %v684_v27 = vadd.f32 %v908_v22, %v683_v26 }
 0x2a8   : > { %v693_v24 = vmul.f32 %v689_v25, %v689_v25 }
 0x2a9   : > { %v692_v28 = vmul.f32 %v684_v27, %v684_v27 }
 0x2aa   : > { %v695_v29 = vmul.f32 %v693_v24, %v689_v25 }
 0x2ab   : > { %v694_v30 = vmul.f32 %v692_v28, %v684_v27 }
 0x2ac   : > { %v697_v31 = vmul.f32 0.044715, %v695_v29 }
 0x2ad   : > { %v696_v32 = vmul.f32 0.044715, %v694_v30 }
 0x2ae   : > { %v699_v33 = vadd.f32 %v697_v31, %v689_v25 }
 0x2af   : > { %v698_v34 = vadd.f32 %v696_v32, %v684_v27 }
 0x2b0   : > { %v701_v35 = vmul.f32 0.7978846, %v699_v33 }
 0x2b1   : > { %v700_v36 = vmul.f32 0.7978846, %v698_v34 }
 0x2b2   : > { %1043 = vtanh.f32 %v701_v35 }
 0x2b3   : > { %1045 = vtanh.f32 %v700_v36 }
 0x2bc   : > { %v1044_v37 = vpop.eup %1043 }
 0x2bd   : > { %v1046_v5 = vpop.eup %1045  ;;  %v705_v38 = vadd.f32 1.0, %v1044_v37 }
 0x2be   : > { %v704_v6 = vadd.f32 1.0, %v1046_v5 }
 0x2bf   : > { %v707_v39 = vmul.f32 0.5, %v705_v38 }
 0x2c0   : > { %v706_v40 = vmul.f32 0.5, %v704_v6 }
 0x2c1   : > { %v709_v42 = vmul.f32 %v707_v39, %v689_v25 }
 0x2c2   : > { %v708_v41 = vmul.f32 %v706_v40, %v684_v27 }
 0x2c4   : > { %985 = vmatprep.mubr.f32.mxu1 %v708_v41 }
 0x2c5   : > { %986 = vmatmul.mubr.f32.vlgmr.msra.gmra.mrb[0].mxu1 %v709_v42 }
 0x398   : > { %v987_v44 = vpop.f32.mrb[0].mxu1 }
 0x399   : > { %v805_v45 = vadd.f32 %v987_v44, %v911_v43  ;;  %v799_v46 = vpop.f32.mrb[1].mxu1 }
 0x39a   : > { %v800_v47 = vadd.f32 %v911_v43, %v799_v46 }
 0x39b   : > { %v809_v48 = vadd.f32 %v805_v45, %v1187_v59 }
 0x39c   : > { %v808_v49 = vadd.f32 %v800_v47, %v1183_v57 }
 0x39d   : > { %811 = vst.msk [vmem:[%s426_s15 + $0x8] sm:$0xff] %vm433_vm0, %v809_v48 }
 0x39e   : > { %810 = vst.msk [vmem:[%s426_s15] sm:$0xff] %vm433_vm0, %v808_v49 }
 0x39f PF: > { %s21_s17 = sadd.s32 1, %s1053_s17  }
 0x3a0   : > { %p18_p4 = scmp.ge.s32.totalorder %s21_s17, 4  }
 0x3a2   :  { %20 = sbr.rel (!%p18_p4) target bundleno = 1 (0x1), region = 100 }

// kernel: deco_convnet_forward.59
= control target key start
LH: loop header
LB: loop body
LE: loop exit
PB: predicated region body
PF: predicated region fallthrough
CT: control target
= control target key end

     0   :  { %vm19_vm0 = vcmask 261120   ;;  %s217_s0 = inlined_call_operand.vmem [shape: f32[32,32], index: 0, kind: input, shape index: {}]   ;;  %s218_s1 = inlined_call_operand.vmem [shape: f32[1,32], index: 1, kind: input, shape index: {}]   ;;  %s219_s2 = inlined_call_operand.vmem [shape: f32[1,32], index: 2, kind: input, shape index: {}]   ;;  %s220_s3 = inlined_call_operand.hbm [shape: f32[32,32], index: 3, kind: output, shape index: {}]  }
   0x1   :  { %v15_v0 = vld [vmem:[%s217_s0] sm:$0xff]  ;;  %v17_v1 = vld [vmem:[%s217_s0 + $0x10] sm:$0xff]  ;;  %v16_v2 = vld [vmem:[%s217_s0 + $0x8] sm:$0xff] }
   0x2   :  { %v20_v3 = vsel %vm19_vm0, %v15_v0, 0.0  ;;  %v26_v4 = vsel %vm19_vm0, %v17_v1, 0.0  ;;  %v18_v5 = vld [vmem:[%s217_s0 + $0x18] sm:$0xff] }
   0x3   :  { %8 = vsyncpa [#allocation3], 0  ;;  %21 = vadd.xlane.f32.xlu0 %v20_v3  ;;  %27 = vadd.xlane.f32.xlu1 %v26_v4  ;;  %v23_v6 = vsel %vm19_vm0, %v16_v2, 0.0  ;;  %v29_v7 = vsel %vm19_vm0, %v18_v5, 0.0  ;;  %v115_v41 = vld [vmem:[%s218_s1] ss:$0 sm:$0xff] }
   0x4   :  { %v116_v43 = vld [vmem:[%s219_s2] ss:$0 sm:$0xff]  ;;  %s152_s1 = smov [#allocation2]  }
   0x5   :  { %s104_s23 = sshll.u32 %s152_s1, 4  ;;  %s105_s23 = int_to_ptr.vmem [resolvable:$true] %s104_s23 }
   0x6   :  { %s128_s2 = scalar_lea.vmem %s105_s23, 512  ;;  %p133_p1 = scmp.lt.s32.totalorder %s105_s23, %s105_s23 }
   0x7   :  { %24 = vadd.xlane.f32.xlu0 %v23_v6  ;;  %30 = vadd.xlane.f32.xlu1 %v29_v7  ;;  %p129_p0 = scmp.ne.s32.totalorder %s105_s23, %s128_s2  ;;  %p134_p2 = scmp.lt.s32.totalorder %s128_s2, %s128_s2 }
   0x9   :  { %p135_p3 = por %p134_p2, %p133_p1 }
   0xb   :  { %p136_p4 = pnand %p135_p3, %p129_p0 }
  0x90   :  { %v22_v8 = vpop.xlane.xlu0 %21  ;;  %v28_v9 = vpop.xlane.xlu1 %27 }
  0x91   :  { %v33_v10 = vmul.f32 0.03125, %v22_v8  ;;  %v35_v11 = vmul.f32 0.03125, %v28_v9 }
  0x93   :  { %v37_v12 = vsub.f32 %v15_v0, %v33_v10  ;;  %v39_v13 = vsub.f32 %v17_v1, %v35_v11 }
  0x94   :  { %v25_v14 = vpop.xlane.xlu0 %24  ;;  %v31_v15 = vpop.xlane.xlu1 %30 }
  0x95   :  { %v34_v16 = vmul.f32 0.03125, %v25_v14  ;;  %v36_v17 = vmul.f32 0.03125, %v31_v15  ;;  %v41_v18 = vmul.f32 %v37_v12, %v37_v12  ;;  %v43_v19 = vmul.f32 %v39_v13, %v39_v13 }
  0x97   :  { %v38_v20 = vsub.f32 %v16_v2, %v34_v16  ;;  %v40_v21 = vsub.f32 %v18_v5, %v36_v17  ;;  %v45_v22 = vsel %vm19_vm0, %v41_v18, 0.0  ;;  %v51_v23 = vsel %vm19_vm0, %v43_v19, 0.0 }
  0x98   :  { %46 = vadd.xlane.f32.xlu0 %v45_v22 }
  0x99   :  { %v42_v24 = vmul.f32 %v38_v20, %v38_v20  ;;  %v44_v25 = vmul.f32 %v40_v21, %v40_v21 }
  0x9b   :  { %v48_v26 = vsel %vm19_vm0, %v42_v24, 0.0  ;;  %v54_v27 = vsel %vm19_vm0, %v44_v25, 0.0 }
  0x9c   :  { %52 = vadd.xlane.f32.xlu0 %v51_v23  ;;  %49 = vadd.xlane.f32.xlu1 %v48_v26 }
  0xa0   :  { %55 = vadd.xlane.f32.xlu1 %v54_v27 }
 0x125   :  { %v47_v28 = vpop.xlane.xlu0 %46 }
 0x126   :  { %v57_v29 = vmul.f32 0.03125, %v47_v28 }
 0x128   :  { %v61_v30 = vadd.f32 1e-05, %v57_v29 }
 0x129   :  { %v50_v31 = vpop.xlane.xlu1 %49  ;;  %v53_v32 = vpop.xlane.xlu0 %52 }
 0x12a   :  { %120 = vrsqrt.f32 %v61_v30  ;;  %v58_v33 = vmul.f32 0.03125, %v50_v31  ;;  %v59_v34 = vmul.f32 0.03125, %v53_v32 }
 0x12c   :  { %v62_v35 = vadd.f32 1e-05, %v58_v33  ;;  %v63_v36 = vadd.f32 1e-05, %v59_v34 }
 0x12d   :  { %v56_v37 = vpop.xlane.xlu1 %55 }
 0x12e   :  { %122 = vrsqrt.f32 %v62_v35  ;;  %v60_v38 = vmul.f32 0.03125, %v56_v37 }
 0x12f   :  { %124 = vrsqrt.f32 %v63_v36 }
 0x130   :  { %v64_v39 = vadd.f32 1e-05, %v60_v38 }
 0x132   :  { %126 = vrsqrt.f32 %v64_v39 }
 0x134   :  { %v121_v40 = vpop.eup %120 }
 0x135   :  { %v69_v42 = vmul.f32 %v121_v40, %v37_v12 }
 0x137   :  { %v80_v44 = vmul.f32 %v115_v41, %v69_v42 }
 0x138   :  { %v123_v45 = vpop.eup %122 }
 0x139   :  { %v125_v46 = vpop.eup %124  ;;  %v91_v47 = vadd.f32 %v116_v43, %v80_v44  ;;  %v70_v48 = vmul.f32 %v123_v45, %v38_v20 }
 0x13a   :  { %v71_v49 = vmul.f32 %v125_v46, %v39_v13 }
 0x13b   :  { %95 = vst.msk [vmem:[#allocation2] sm:$0xff] %vm19_vm0, %v91_v47  ;;  %v81_v50 = vmul.f32 %v115_v41, %v70_v48 }
 0x13c   :  { %v127_v51 = vpop.eup %126  ;;  %v82_v52 = vmul.f32 %v115_v41, %v71_v49 }
 0x13d   :  { %v92_v53 = vadd.f32 %v116_v43, %v81_v50  ;;  %v72_v54 = vmul.f32 %v127_v51, %v40_v21 }
 0x13e   :  { %v93_v55 = vadd.f32 %v116_v43, %v82_v52 }
 0x13f   :  { %96 = vst.msk [vmem:[#allocation2 + $0x8] sm:$0xff] %vm19_vm0, %v92_v53  ;;  %v83_v56 = vmul.f32 %v115_v41, %v72_v54 }
 0x140   :  { %97 = vst.msk [vmem:[#allocation2 + $0x10] sm:$0xff] %vm19_vm0, %v93_v55 }
 0x141   :  { %v94_v57 = vadd.f32 %v116_v43, %v83_v56 }
 0x143   :  { %98 = vst.msk [vmem:[#allocation2 + $0x18] sm:$0xff] %vm19_vm0, %v94_v57 }
 0x144   :  { %139 = shalt.err (!%p136_p4)
}
 0x145   :  { %s140_s26 = scalar_lea.hbm %s220_s3, 512 }
 0x146   :  { %p141_p5 = scmp.ne.s32.totalorder %s220_s3, %s140_s26  ;;  %p144_p6 = scmp.lt.u32.totalorder %s140_s26, %s220_s3 }
 0x148   :  { %p146_p7 = pnand %p144_p6, %p141_p5 }
 0x14a   :  { %149 = shalt.err (!%p146_p7)
}
 0x14b   :  { %s153_s4 = smov 128   ;;  %s154_s5 = smov 8  }
 0x14c   :  { %110 = dma.vmem_to_hbm [thread:$0]  %s105_s23, 512, %s220_s3, [#allocation3], %s153_s4, %s153_s4, %s154_s5  }
 0x14d   :  { %150 = dma.done.wait [#allocation3], 512  }
 0x14e   :  { %151 = vsyncadd [#allocation3], 4294966784 }
 0x14f   :  { %114 = vsyncpa [#allocation3], 1 }

</bundles_post_ra>
